<compile_context>
chip_gen: v7x
topology: tpu7x:2x2x1
jax: 0.10.0
libtpu: 0.0.40
codegen_flags: <defaults>
</compile_context>

<pallas_src>
import functools

import jax
import jax.numpy as jnp
from jax.experimental import pallas as pl
from jax.experimental.pallas import tpu as pltpu

EPS = 1e-5  # nn.BatchNorm2d default


def _resblocknet_kernel(x_ref, w_hbm, gamma_ref, beta_ref, o_ref, wbuf, sem,
                        *, N, H, W, C):
    L = N * W * C
    inv_cnt = 1.0 / float(N * H * W)  # BN element count per channel

    # ---- manual per-layer weight prefetch (double buffer in VMEM) ----
    def start_fetch(li, slot):
        pltpu.make_async_copy(w_hbm.at[li], wbuf.at[slot], sem.at[slot]).start()

    def wait_fetch(slot):
        pltpu.make_async_copy(w_hbm.at[0], wbuf.at[slot], sem.at[slot]).wait()

    start_fetch(0, 0)  # prime layer 0 while we set up constants

    x0 = x_ref[...]  # (H, L) float32, lane-dense

    # ---- hoisted constants (shared by all 8 convs / 8 BNs) ----
    # Row-boundary masks for the h-shift (row 0 has no h-1, row H-1 has no h+1).
    hrow = jax.lax.broadcasted_iota(jnp.int32, (H, 1), 0)
    mask_up = (hrow > 0).astype(jnp.float32)       # zero row 0 after roll(+1)
    mask_dn = (hrow < H - 1).astype(jnp.float32)   # zero row H-1 after roll(-1)

    # One-hot channel selectors (channel = lane % C).
    lj = jax.lax.broadcasted_iota(jnp.int32, (L, C), 0)
    cj = jax.lax.broadcasted_iota(jnp.int32, (L, C), 1)
    sel = (lj % C == cj).astype(jnp.float32)       # (L, C): lanes -> channel
    ci2 = jax.lax.broadcasted_iota(jnp.int32, (C, L), 0)
    li2 = jax.lax.broadcasted_iota(jnp.int32, (C, L), 1)
    sel_t = (li2 % C == ci2).astype(jnp.float32)   # (C, L): channel -> lanes

    def conv3x3(a, slot):
        # 3x3 "same" conv, stride 1, no bias.  h-shift on the XLU (sublane roll),
        # h-boundary zeroing on the VPU, w-shift / w-boundary / Cin->Cout folded
        # into the expanded weight.  Three accumulating dots, no concat.
        a_up = pltpu.roll(a, shift=1, axis=0) * mask_up        # row h -> a[h-1]
        a_dn = pltpu.roll(a, shift=H - 1, axis=0) * mask_dn    # row h -> a[h+1]
        w0 = wbuf[slot, 0:L, :]          # ky = 0 block (static slice: free)
        w1 = wbuf[slot, L:2 * L, :]      # ky = 1 block
        w2 = wbuf[slot, 2 * L:3 * L, :]  # ky = 2 block
        r = jnp.dot(a_up, w0, preferred_element_type=jnp.float32)
        r = r + jnp.dot(a, w1, preferred_element_type=jnp.float32)
        r = r + jnp.dot(a_dn, w2, preferred_element_type=jnp.float32)
        return r

    def batchnorm(a, li):
        # Training-mode BatchNorm2d (biased variance), single-pass statistics.
        # Per-channel reduce / broadcast as two stacked M=2 selector matmuls.
        s12 = jnp.concatenate(
            [jnp.sum(a, axis=0, keepdims=True),
             jnp.sum(a * a, axis=0, keepdims=True)], axis=0)              # (2, L)
        mom_c = jnp.dot(s12, sel, preferred_element_type=jnp.float32) * inv_cnt  # (2, C)
        mean_c = mom_c[0:1, :]
        var_c = mom_c[1:2, :] - mean_c * mean_c
        inv_c = jax.lax.rsqrt(var_c + EPS)
        scale_c = gamma_ref[li] * inv_c                                   # (1, C)
        shift_c = beta_ref[li] - mean_c * scale_c                         # (1, C)
        ab = jnp.concatenate([scale_c, shift_c], axis=0)                  # (2, C)
        ab_l = jnp.dot(ab, sel_t, preferred_element_type=jnp.float32)     # (2, L)
        return a * ab_l[0:1, :] + ab_l[1:2, :]

    y = x0
    for blk in range(4):
        r = y
        for half in range(2):
            li = 2 * blk + half
            slot = li & 1
            wait_fetch(slot)                     # weights for layer li ready
            if li + 1 < 8:
                start_fetch(li + 1, 1 - slot)    # prefetch next layer's weights
            r = conv3x3(r, slot)
            r = batchnorm(r, li)
            if half == 0:
                r = jnp.maximum(r, 0.0)          # ReLU between the two convs
        y = r + y                                # ResBlock skip
    o_ref[...] = (y + x0).astype(o_ref.dtype)    # ResBlockNet outer skip


def expand_conv_weights(conv_w, N, W, C):
    # conv_w: (Lyr, 3, 3, Cin, Cout) indexed [layer, ky, kx, cin, cout].
    # Returns (Lyr, 3*L, L) with L = N*W*C:  row index = ky*L + n*W*C + wp*C + ci,
    # col index = n*W*C + w*C + co, value = K[ky, wp-w+1, ci, co] if |wp-w|<=1
    # (w-shift, w-boundary zero-padding and Cin->Cout contraction all folded in).
    lyr = conv_w.shape[0]
    L = N * W * C
    wg = jnp.arange(W)
    dx = wg[:, None] - wg[None, :]                      # (W, W): wp - w
    valid = (jnp.abs(dx) <= 1).astype(conv_w.dtype)
    kx_idx = jnp.clip(dx + 1, 0, 2)
    band = conv_w[:, :, kx_idx]                         # (Lyr, 3, W, W, C, C)
    band = band * valid[None, None, :, :, None, None]
    band = jnp.transpose(band, (0, 1, 2, 4, 3, 5))      # [l, ky, wp, ci, w, co]
    band = band.reshape(lyr, 3, W * C, W * C)
    eye_n = jnp.eye(N, dtype=conv_w.dtype)
    big = jnp.einsum("lkab,nm->lknamb", band, eye_n)    # (Lyr, 3, N, WC, N, WC)
    big = big.reshape(lyr, 3, L, L)
    return big.reshape(lyr, 3 * L, L)


def resblocknet_forward(x_nchw, w_big, gamma, beta):
    # w_big: pre-expanded (8, 3*L, L) weights (hoisted out of the per-call path).
    N, C, H, W = x_nchw.shape
    L = N * W * C  # lane-dense when a multiple of 128 (exactly 128 for the test)

    # NCHW -> (H, N*W*C) lane packing (layout plumbing stays in the wrapper).
    x_p = jnp.transpose(x_nchw, (2, 0, 3, 1)).reshape(H, L)

    kernel = functools.partial(_resblocknet_kernel, N=N, H=H, W=W, C=C)

    flops = 8 * (3 * 2 * H * L * L) + 8 * (2 * 2 * L * C + 2 * 2 * C * L) \
        + 8 * 12 * H * L
    bytes_accessed = (2 * H * L + 8 * 3 * L * L + 2 * 8 * C) * 4
    cost = pl.CostEstimate(flops=flops, transcendentals=8 * C,
                           bytes_accessed=bytes_accessed)

    out_p = pl.pallas_call(
        kernel,
        out_shape=jax.ShapeDtypeStruct((H, L), jnp.float32),
        in_specs=[
            pl.BlockSpec(memory_space=pltpu.MemorySpace.VMEM),   # x_p
            pl.BlockSpec(memory_space=pl.ANY),                   # w_big (HBM, manual DMA)
            pl.BlockSpec(memory_space=pltpu.MemorySpace.VMEM),   # gamma
            pl.BlockSpec(memory_space=pltpu.MemorySpace.VMEM),   # beta
        ],
        out_specs=pl.BlockSpec(memory_space=pltpu.MemorySpace.VMEM),
        scratch_shapes=[
            pltpu.VMEM((2, 3 * L, L), jnp.float32),   # per-layer weight double-buffer
            pltpu.SemaphoreType.DMA((2,)),
        ],
        cost_estimate=cost,
    )(x_p, w_big, gamma, beta)

    # (H, N*W*C) -> NCHW
    return jnp.transpose(out_p.reshape(H, N, W, C), (1, 3, 0, 2))


def reference_forward(x_nchw, conv_w, gamma, beta):
    # Pure-JAX reference (XLA conv, full f32 precision) for the correctness check.
    def conv(x, wi):
        k = conv_w[wi]  # (3, 3, Cin, Cout) = HWIO
        return jax.lax.conv_general_dilated(
            x, k, window_strides=(1, 1), padding="SAME",
            dimension_numbers=("NCHW", "HWIO", "NCHW"),
            precision=jax.lax.Precision.HIGHEST)

    def bn(x, bi):
        mean = jnp.mean(x, axis=(0, 2, 3), keepdims=True)
        var = jnp.mean((x - mean) ** 2, axis=(0, 2, 3), keepdims=True)
        g = gamma[bi].reshape(1, -1, 1, 1)
        b = beta[bi].reshape(1, -1, 1, 1)
        return (x - mean) * jax.lax.rsqrt(var + EPS) * g + b

    y = x_nchw
    for blk in range(4):
        r = bn(conv(y, 2 * blk), 2 * blk)
        r = jnp.maximum(r, 0.0)
        r = bn(conv(r, 2 * blk + 1), 2 * blk + 1)
        y = r + y
    return y + x_nchw


if __name__ == "__main__":
    key = jax.random.PRNGKey(0)
    N, C, H, W = 2, 4, 16, 16  # in_ch == out_ch (required by the ResBlock skip)
    kx, kw, kg, kb = jax.random.split(key, 4)

    x = jax.random.normal(kx, (N, C, H, W), jnp.float32)

    # 8 conv layers (4 blocks x 2), each 3x3 Cin->Cout, no bias.
    # Stored as (layer, ky, kx, Cin, Cout).
    fan_in = C * 9
    bound = 1.0 / (fan_in ** 0.5)
    conv_w = jax.random.uniform(kw, (8, 3, 3, C, C), jnp.float32, -bound, bound)
    # 8 BatchNorm layers (affine), slightly off identity so affine is exercised.
    gamma = 1.0 + 0.1 * jax.random.normal(kg, (8, 1, C), jnp.float32)
    beta = 0.1 * jax.random.normal(kb, (8, 1, C), jnp.float32)

    # Expand conv weights ONCE (hoisted out of the per-call path).
    w_big = jax.block_until_ready(expand_conv_weights(conv_w, N, W, C))

    fwd = jax.jit(resblocknet_forward)
    out = fwd(x, w_big, gamma, beta)
    out = jax.block_until_ready(out)

    ref = reference_forward(x, conv_w, gamma, beta)
    max_err = float(jnp.max(jnp.abs(out - ref)))
    assert out.shape == x.shape, (out.shape, x.shape)
    assert max_err < 1e-2, f"max abs err too large: {max_err}"
    print("KERNEL_OK")
</pallas_src>

<mosaic_0001>
module attributes {stable_mosaic.version = 11 : i64} {
  func.func @_resblocknet_kernel(%arg0: memref<16x128xf32, #tpu.memory_space<vmem>>, %arg1: memref<8x384x128xf32, #tpu.memory_space<any>>, %arg2: memref<8x1x4xf32, #tpu.memory_space<vmem>>, %arg3: memref<8x1x4xf32, #tpu.memory_space<vmem>>, %arg4: memref<16x128xf32, #tpu.memory_space<vmem>>, %arg5: memref<2x384x128xf32, #tpu.memory_space<vmem>>, %arg6: memref<2x!tpu.dma_semaphore, #tpu.memory_space<semaphore_mem>>) attributes {dimension_semantics = [], scalar_prefetch = 0 : i64, scratch_operands = 2 : i64, tpu.core_type = #tpu.core_type<tc>} {
    %c0_i32 = arith.constant 0 : i32
    %c0_i32_0 = arith.constant 0 : i32
    %c0_i32_1 = arith.constant 0 : i32
    %c0_i32_2 = arith.constant 0 : i32
    %c0_i32_3 = arith.constant 0 : i32
    %0 = tpu.memref_slice %arg1[%c0_i32, %c0_i32_2, %c0_i32_3] : memref<8x384x128xf32, #tpu.memory_space<any>> -> memref<1x384x128xf32, #tpu.memory_space<any>>
    %1 = tpu.memref_squeeze %0 : memref<1x384x128xf32, #tpu.memory_space<any>> -> memref<384x128xf32, #tpu.memory_space<any>>
    %c0_i32_4 = arith.constant 0 : i32
    %c0_i32_5 = arith.constant 0 : i32
    %2 = tpu.memref_slice %arg5[%c0_i32_0, %c0_i32_4, %c0_i32_5] : memref<2x384x128xf32, #tpu.memory_space<vmem>> -> memref<1x384x128xf32, #tpu.memory_space<vmem>>
    %3 = tpu.memref_squeeze %2 : memref<1x384x128xf32, #tpu.memory_space<vmem>> -> memref<384x128xf32, #tpu.memory_space<vmem>>
    %4 = tpu.memref_slice %arg6[%c0_i32_1] : memref<2x!tpu.dma_semaphore, #tpu.memory_space<semaphore_mem>> -> memref<1x!tpu.dma_semaphore, #tpu.memory_space<semaphore_mem>>
    %5 = tpu.memref_squeeze %4 : memref<1x!tpu.dma_semaphore, #tpu.memory_space<semaphore_mem>> -> memref<!tpu.dma_semaphore, #tpu.memory_space<semaphore_mem>>
    tpu.enqueue_dma source(%1 : memref<384x128xf32, #tpu.memory_space<any>>) target(%3 : memref<384x128xf32, #tpu.memory_space<vmem>>) target_semaphore(%5 : memref<!tpu.dma_semaphore, #tpu.memory_space<semaphore_mem>>)
    %c0 = arith.constant 0 : index
    %c0_6 = arith.constant 0 : index
    %6 = vector.load %arg0[%c0, %c0_6] : memref<16x128xf32, #tpu.memory_space<vmem>>, vector<16x128xf32>
    %7 = tpu.iota {dimensions = array<i32: 0>} : vector<16x1xi32>
    %c0_i32_7 = arith.constant 0 : i32
    %8 = vector.broadcast %c0_i32_7 : i32 to vector<16x1xi32>
    %9 = arith.cmpi sgt, %7, %8 : vector<16x1xi32>
    %10 = arith.extui %9 : vector<16x1xi1> to vector<16x1xi32>
    %11 = arith.sitofp %10 : vector<16x1xi32> to vector<16x1xf32>
    %c15_i32 = arith.constant 15 : i32
    %12 = vector.broadcast %c15_i32 : i32 to vector<16x1xi32>
    %13 = arith.cmpi slt, %7, %12 : vector<16x1xi32>
    %14 = arith.extui %13 : vector<16x1xi1> to vector<16x1xi32>
    %15 = arith.sitofp %14 : vector<16x1xi32> to vector<16x1xf32>
    %16 = tpu.iota {dimensions = array<i32: 0>} : vector<128x4xi32>
    %17 = tpu.iota {dimensions = array<i32: 1>} : vector<128x4xi32>
    %c4_i32 = arith.constant 4 : i32
    %c0_i32_8 = arith.constant 0 : i32
    %18 = arith.cmpi eq, %c4_i32, %c0_i32_8 : i32
    %c1_i32 = arith.constant 1 : i32
    %19 = arith.select %18, %c1_i32, %c4_i32 : i32
    %20 = vector.broadcast %19 : i32 to vector<128x4xi32>
    %21 = arith.remsi %16, %20 : vector<128x4xi32>
    %c0_i32_9 = arith.constant 0 : i32
    %22 = vector.broadcast %c0_i32_9 : i32 to vector<128x4xi32>
    %23 = arith.cmpi ne, %21, %22 : vector<128x4xi32>
    %c0_i32_10 = arith.constant 0 : i32
    %24 = vector.broadcast %c0_i32_10 : i32 to vector<128x4xi32>
    %25 = arith.cmpi slt, %21, %24 : vector<128x4xi32>
    %c0_i32_11 = arith.constant 0 : i32
    %26 = arith.cmpi slt, %19, %c0_i32_11 : i32
    %27 = vector.broadcast %26 : i1 to vector<128x4xi1>
    %28 = vector.broadcast %27 : vector<128x4xi1> to vector<128x4xi1>
    %29 = arith.xori %25, %28 : vector<128x4xi1>
    %30 = arith.andi %29, %23 : vector<128x4xi1>
    %31 = vector.broadcast %19 : i32 to vector<128x4xi32>
    %32 = arith.addi %21, %31 : vector<128x4xi32>
    %33 = arith.select %30, %32, %21 : vector<128x4xi1>, vector<128x4xi32>
    %34 = arith.cmpi eq, %33, %17 : vector<128x4xi32>
    %35 = arith.extui %34 : vector<128x4xi1> to vector<128x4xi32>
    %36 = arith.sitofp %35 : vector<128x4xi32> to vector<128x4xf32>
    %37 = tpu.iota {dimensions = array<i32: 0>} : vector<4x128xi32>
    %38 = tpu.iota {dimensions = array<i32: 1>} : vector<4x128xi32>
    %c4_i32_12 = arith.constant 4 : i32
    %c0_i32_13 = arith.constant 0 : i32
    %39 = arith.cmpi eq, %c4_i32_12, %c0_i32_13 : i32
    %c1_i32_14 = arith.constant 1 : i32
    %40 = arith.select %39, %c1_i32_14, %c4_i32_12 : i32
    %41 = vector.broadcast %40 : i32 to vector<4x128xi32>
    %42 = arith.remsi %38, %41 : vector<4x128xi32>
    %c0_i32_15 = arith.constant 0 : i32
    %43 = vector.broadcast %c0_i32_15 : i32 to vector<4x128xi32>
    %44 = arith.cmpi ne, %42, %43 : vector<4x128xi32>
    %c0_i32_16 = arith.constant 0 : i32
    %45 = vector.broadcast %c0_i32_16 : i32 to vector<4x128xi32>
    %46 = arith.cmpi slt, %42, %45 : vector<4x128xi32>
    %c0_i32_17 = arith.constant 0 : i32
    %47 = arith.cmpi slt, %40, %c0_i32_17 : i32
    %48 = vector.broadcast %47 : i1 to vector<4x128xi1>
    %49 = vector.broadcast %48 : vector<4x128xi1> to vector<4x128xi1>
    %50 = arith.xori %46, %49 : vector<4x128xi1>
    %51 = arith.andi %50, %44 : vector<4x128xi1>
    %52 = vector.broadcast %40 : i32 to vector<4x128xi32>
    %53 = arith.addi %42, %52 : vector<4x128xi32>
    %54 = arith.select %51, %53, %42 : vector<4x128xi1>, vector<4x128xi32>
    %55 = arith.cmpi eq, %54, %37 : vector<4x128xi32>
    %56 = arith.extui %55 : vector<4x128xi1> to vector<4x128xi32>
    %57 = arith.sitofp %56 : vector<4x128xi32> to vector<4x128xf32>
    %c0_i32_18 = arith.constant 0 : i32
    %c0_i32_19 = arith.constant 0 : i32
    %c0_i32_20 = arith.constant 0 : i32
    %c0_i32_21 = arith.constant 0 : i32
    %c0_i32_22 = arith.constant 0 : i32
    %58 = tpu.memref_slice %arg1[%c0_i32_18, %c0_i32_21, %c0_i32_22] : memref<8x384x128xf32, #tpu.memory_space<any>> -> memref<1x384x128xf32, #tpu.memory_space<any>>
    %59 = tpu.memref_squeeze %58 : memref<1x384x128xf32, #tpu.memory_space<any>> -> memref<384x128xf32, #tpu.memory_space<any>>
    %c0_i32_23 = arith.constant 0 : i32
    %c0_i32_24 = arith.constant 0 : i32
    %60 = tpu.memref_slice %arg5[%c0_i32_19, %c0_i32_23, %c0_i32_24] : memref<2x384x128xf32, #tpu.memory_space<vmem>> -> memref<1x384x128xf32, #tpu.memory_space<vmem>>
    %61 = tpu.memref_squeeze %60 : memref<1x384x128xf32, #tpu.memory_space<vmem>> -> memref<384x128xf32, #tpu.memory_space<vmem>>
    %62 = tpu.memref_slice %arg6[%c0_i32_20] : memref<2x!tpu.dma_semaphore, #tpu.memory_space<semaphore_mem>> -> memref<1x!tpu.dma_semaphore, #tpu.memory_space<semaphore_mem>>
    %63 = tpu.memref_squeeze %62 : memref<1x!tpu.dma_semaphore, #tpu.memory_space<semaphore_mem>> -> memref<!tpu.dma_semaphore, #tpu.memory_space<semaphore_mem>>
    tpu.wait_dma2 semaphore(%63 : memref<!tpu.dma_semaphore, #tpu.memory_space<semaphore_mem>>) src(%59 : memref<384x128xf32, #tpu.memory_space<any>>) dst(%61 : memref<384x128xf32, #tpu.memory_space<vmem>>)
    %c1_i32_25 = arith.constant 1 : i32
    %c1_i32_26 = arith.constant 1 : i32
    %c1_i32_27 = arith.constant 1 : i32
    %c0_i32_28 = arith.constant 0 : i32
    %c0_i32_29 = arith.constant 0 : i32
    %64 = tpu.memref_slice %arg1[%c1_i32_25, %c0_i32_28, %c0_i32_29] : memref<8x384x128xf32, #tpu.memory_space<any>> -> memref<1x384x128xf32, #tpu.memory_space<any>>
    %65 = tpu.memref_squeeze %64 : memref<1x384x128xf32, #tpu.memory_space<any>> -> memref<384x128xf32, #tpu.memory_space<any>>
    %c0_i32_30 = arith.constant 0 : i32
    %c0_i32_31 = arith.constant 0 : i32
    %66 = tpu.memref_slice %arg5[%c1_i32_26, %c0_i32_30, %c0_i32_31] : memref<2x384x128xf32, #tpu.memory_space<vmem>> -> memref<1x384x128xf32, #tpu.memory_space<vmem>>
    %67 = tpu.memref_squeeze %66 : memref<1x384x128xf32, #tpu.memory_space<vmem>> -> memref<384x128xf32, #tpu.memory_space<vmem>>
    %68 = tpu.memref_slice %arg6[%c1_i32_27] : memref<2x!tpu.dma_semaphore, #tpu.memory_space<semaphore_mem>> -> memref<1x!tpu.dma_semaphore, #tpu.memory_space<semaphore_mem>>
    %69 = tpu.memref_squeeze %68 : memref<1x!tpu.dma_semaphore, #tpu.memory_space<semaphore_mem>> -> memref<!tpu.dma_semaphore, #tpu.memory_space<semaphore_mem>>
    tpu.enqueue_dma source(%65 : memref<384x128xf32, #tpu.memory_space<any>>) target(%67 : memref<384x128xf32, #tpu.memory_space<vmem>>) target_semaphore(%69 : memref<!tpu.dma_semaphore, #tpu.memory_space<semaphore_mem>>)
    %c1_i32_32 = arith.constant 1 : i32
    %70 = tpu.dynamic_rotate %6 by %c1_i32_32 dim 0 : vector<16x128xf32>, i32 -> vector<16x128xf32>
    %71 = vector.broadcast %11 : vector<16x1xf32> to vector<16x128xf32>
    %72 = arith.mulf %70, %71 : vector<16x128xf32>
    %c15_i32_33 = arith.constant 15 : i32
    %73 = tpu.dynamic_rotate %6 by %c15_i32_33 dim 0 : vector<16x128xf32>, i32 -> vector<16x128xf32>
    %74 = vector.broadcast %15 : vector<16x1xf32> to vector<16x128xf32>
    %75 = arith.mulf %73, %74 : vector<16x128xf32>
    %c0_34 = arith.constant 0 : index
    %c0_35 = arith.constant 0 : index
    %c0_36 = arith.constant 0 : index
    %76 = vector.load %arg5[%c0_34, %c0_35, %c0_36] : memref<2x384x128xf32, #tpu.memory_space<vmem>>, vector<1x128x128xf32>
    %77 = vector.shape_cast %76 : vector<1x128x128xf32> to vector<128x128xf32>
    %c0_37 = arith.constant 0 : index
    %c128 = arith.constant 128 : index
    %c0_38 = arith.constant 0 : index
    %78 = vector.load %arg5[%c0_37, %c128, %c0_38] : memref<2x384x128xf32, #tpu.memory_space<vmem>>, vector<1x128x128xf32>
    %79 = vector.shape_cast %78 : vector<1x128x128xf32> to vector<128x128xf32>
    %c0_39 = arith.constant 0 : index
    %c256 = arith.constant 256 : index
    %c0_40 = arith.constant 0 : index
    %80 = vector.load %arg5[%c0_39, %c256, %c0_40] : memref<2x384x128xf32, #tpu.memory_space<vmem>>, vector<1x128x128xf32>
    %81 = vector.shape_cast %80 : vector<1x128x128xf32> to vector<128x128xf32>
    %cst = arith.constant dense<0.000000e+00> : vector<16x128xf32>
    %82 = tpu.matmul %72, %77, %cst {dimension_numbers = #tpu.dot_dimension_numbers<[1], [0], [0], [1], [0, 0, 1, 1], [], []>} : vector<16x128xf32>, vector<128x128xf32>, vector<16x128xf32> -> vector<16x128xf32>
    %cst_41 = arith.constant dense<0.000000e+00> : vector<16x128xf32>
    %83 = tpu.matmul %6, %79, %cst_41 {dimension_numbers = #tpu.dot_dimension_numbers<[1], [0], [0], [1], [0, 0, 1, 1], [], []>} : vector<16x128xf32>, vector<128x128xf32>, vector<16x128xf32> -> vector<16x128xf32>
    %84 = arith.addf %82, %83 : vector<16x128xf32>
    %cst_42 = arith.constant dense<0.000000e+00> : vector<16x128xf32>
    %85 = tpu.matmul %75, %81, %cst_42 {dimension_numbers = #tpu.dot_dimension_numbers<[1], [0], [0], [1], [0, 0, 1, 1], [], []>} : vector<16x128xf32>, vector<128x128xf32>, vector<16x128xf32> -> vector<16x128xf32>
    %86 = arith.addf %84, %85 : vector<16x128xf32>
    %cst_43 = arith.constant dense<0.000000e+00> : vector<128xf32>
    %87 = vector.multi_reduction <add>, %86, %cst_43 [0] : vector<16x128xf32> to vector<128xf32>
    %88 = vector.shape_cast %87 : vector<128xf32> to vector<1x128xf32>
    %89 = arith.mulf %86, %86 : vector<16x128xf32>
    %cst_44 = arith.constant dense<0.000000e+00> : vector<128xf32>
    %90 = vector.multi_reduction <add>, %89, %cst_44 [0] : vector<16x128xf32> to vector<128xf32>
    %91 = vector.shape_cast %90 : vector<128xf32> to vector<1x128xf32>
    %92 = tpu.concatenate %88, %91 in 0 : vector<1x128xf32>, vector<1x128xf32> -> vector<2x128xf32>
    %cst_45 = arith.constant dense<0.000000e+00> : vector<2x4xf32>
    %93 = tpu.matmul %92, %36, %cst_45 {dimension_numbers = #tpu.dot_dimension_numbers<[1], [0], [0], [1], [0, 0, 1, 1], [], []>} : vector<2x128xf32>, vector<128x4xf32>, vector<2x4xf32> -> vector<2x4xf32>
    %cst_46 = arith.constant 0.001953125 : f32
    %94 = vector.broadcast %cst_46 : f32 to vector<2x4xf32>
    %95 = arith.mulf %93, %94 : vector<2x4xf32>
    %96 = vector.extract_strided_slice %95 {offsets = [0, 0], sizes = [1, 4], strides = [1, 1]} : vector<2x4xf32> to vector<1x4xf32>
    %97 = vector.extract_strided_slice %95 {offsets = [1, 0], sizes = [1, 4], strides = [1, 1]} : vector<2x4xf32> to vector<1x4xf32>
    %98 = arith.mulf %96, %96 : vector<1x4xf32>
    %99 = arith.subf %97, %98 : vector<1x4xf32>
    %cst_47 = arith.constant 9.99999974E-6 : f32
    %100 = vector.broadcast %cst_47 : f32 to vector<1x4xf32>
    %101 = arith.addf %99, %100 : vector<1x4xf32>
    %102 = math.rsqrt %101 : vector<1x4xf32>
    %c0_48 = arith.constant 0 : index
    %c0_49 = arith.constant 0 : index
    %c0_50 = arith.constant 0 : index
    %103 = vector.load %arg2[%c0_48, %c0_49, %c0_50] : memref<8x1x4xf32, #tpu.memory_space<vmem>>, vector<1x1x4xf32>
    %104 = vector.shape_cast %103 : vector<1x1x4xf32> to vector<1x4xf32>
    %105 = arith.mulf %104, %102 : vector<1x4xf32>
    %c0_51 = arith.constant 0 : index
    %c0_52 = arith.constant 0 : index
    %c0_53 = arith.constant 0 : index
    %106 = vector.load %arg3[%c0_51, %c0_52, %c0_53] : memref<8x1x4xf32, #tpu.memory_space<vmem>>, vector<1x1x4xf32>
    %107 = vector.shape_cast %106 : vector<1x1x4xf32> to vector<1x4xf32>
    %108 = arith.mulf %96, %105 : vector<1x4xf32>
    %109 = arith.subf %107, %108 : vector<1x4xf32>
    %110 = tpu.concatenate %105, %109 in 0 : vector<1x4xf32>, vector<1x4xf32> -> vector<2x4xf32>
    %cst_54 = arith.constant dense<0.000000e+00> : vector<2x128xf32>
    %111 = tpu.matmul %110, %57, %cst_54 {dimension_numbers = #tpu.dot_dimension_numbers<[1], [0], [0], [1], [0, 0, 1, 1], [], []>} : vector<2x4xf32>, vector<4x128xf32>, vector<2x128xf32> -> vector<2x128xf32>
    %112 = vector.extract_strided_slice %111 {offsets = [0, 0], sizes = [1, 128], strides = [1, 1]} : vector<2x128xf32> to vector<1x128xf32>
    %113 = vector.broadcast %112 : vector<1x128xf32> to vector<16x128xf32>
    %114 = arith.mulf %86, %113 : vector<16x128xf32>
    %115 = vector.extract_strided_slice %111 {offsets = [1, 0], sizes = [1, 128], strides = [1, 1]} : vector<2x128xf32> to vector<1x128xf32>
    %116 = vector.broadcast %115 : vector<1x128xf32> to vector<16x128xf32>
    %117 = arith.addf %114, %116 : vector<16x128xf32>
    %cst_55 = arith.constant 0.000000e+00 : f32
    %118 = vector.broadcast %cst_55 : f32 to vector<16x128xf32>
    %119 = arith.maximumf %117, %118 : vector<16x128xf32>
    %c0_i32_56 = arith.constant 0 : i32
    %c1_i32_57 = arith.constant 1 : i32
    %c1_i32_58 = arith.constant 1 : i32
    %c0_i32_59 = arith.constant 0 : i32
    %c0_i32_60 = arith.constant 0 : i32
    %120 = tpu.memref_slice %arg1[%c0_i32_56, %c0_i32_59, %c0_i32_60] : memref<8x384x128xf32, #tpu.memory_space<any>> -> memref<1x384x128xf32, #tpu.memory_space<any>>
    %121 = tpu.memref_squeeze %120 : memref<1x384x128xf32, #tpu.memory_space<any>> -> memref<384x128xf32, #tpu.memory_space<any>>
    %c0_i32_61 = arith.constant 0 : i32
    %c0_i32_62 = arith.constant 0 : i32
    %122 = tpu.memref_slice %arg5[%c1_i32_57, %c0_i32_61, %c0_i32_62] : memref<2x384x128xf32, #tpu.memory_space<vmem>> -> memref<1x384x128xf32, #tpu.memory_space<vmem>>
    %123 = tpu.memref_squeeze %122 : memref<1x384x128xf32, #tpu.memory_space<vmem>> -> memref<384x128xf32, #tpu.memory_space<vmem>>
    %124 = tpu.memref_slice %arg6[%c1_i32_58] : memref<2x!tpu.dma_semaphore, #tpu.memory_space<semaphore_mem>> -> memref<1x!tpu.dma_semaphore, #tpu.memory_space<semaphore_mem>>
    %125 = tpu.memref_squeeze %124 : memref<1x!tpu.dma_semaphore, #tpu.memory_space<semaphore_mem>> -> memref<!tpu.dma_semaphore, #tpu.memory_space<semaphore_mem>>
    tpu.wait_dma2 semaphore(%125 : memref<!tpu.dma_semaphore, #tpu.memory_space<semaphore_mem>>) src(%121 : memref<384x128xf32, #tpu.memory_space<any>>) dst(%123 : memref<384x128xf32, #tpu.memory_space<vmem>>)
    %c2_i32 = arith.constant 2 : i32
    %c0_i32_63 = arith.constant 0 : i32
    %c0_i32_64 = arith.constant 0 : i32
    %c0_i32_65 = arith.constant 0 : i32
    %c0_i32_66 = arith.constant 0 : i32
    %126 = tpu.memref_slice %arg1[%c2_i32, %c0_i32_65, %c0_i32_66] : memref<8x384x128xf32, #tpu.memory_space<any>> -> memref<1x384x128xf32, #tpu.memory_space<any>>
    %127 = tpu.memref_squeeze %126 : memref<1x384x128xf32, #tpu.memory_space<any>> -> memref<384x128xf32, #tpu.memory_space<any>>
    %c0_i32_67 = arith.constant 0 : i32
    %c0_i32_68 = arith.constant 0 : i32
    %128 = tpu.memref_slice %arg5[%c0_i32_63, %c0_i32_67, %c0_i32_68] : memref<2x384x128xf32, #tpu.memory_space<vmem>> -> memref<1x384x128xf32, #tpu.memory_space<vmem>>
    %129 = tpu.memref_squeeze %128 : memref<1x384x128xf32, #tpu.memory_space<vmem>> -> memref<384x128xf32, #tpu.memory_space<vmem>>
    %130 = tpu.memref_slice %arg6[%c0_i32_64] : memref<2x!tpu.dma_semaphore, #tpu.memory_space<semaphore_mem>> -> memref<1x!tpu.dma_semaphore, #tpu.memory_space<semaphore_mem>>
    %131 = tpu.memref_squeeze %130 : memref<1x!tpu.dma_semaphore, #tpu.memory_space<semaphore_mem>> -> memref<!tpu.dma_semaphore, #tpu.memory_space<semaphore_mem>>
    tpu.enqueue_dma source(%127 : memref<384x128xf32, #tpu.memory_space<any>>) target(%129 : memref<384x128xf32, #tpu.memory_space<vmem>>) target_semaphore(%131 : memref<!tpu.dma_semaphore, #tpu.memory_space<semaphore_mem>>)
    %c1_i32_69 = arith.constant 1 : i32
    %132 = tpu.dynamic_rotate %119 by %c1_i32_69 dim 0 : vector<16x128xf32>, i32 -> vector<16x128xf32>
    %133 = vector.broadcast %11 : vector<16x1xf32> to vector<16x128xf32>
    %134 = arith.mulf %132, %133 : vector<16x128xf32>
    %c15_i32_70 = arith.constant 15 : i32
    %135 = tpu.dynamic_rotate %119 by %c15_i32_70 dim 0 : vector<16x128xf32>, i32 -> vector<16x128xf32>
    %136 = vector.broadcast %15 : vector<16x1xf32> to vector<16x128xf32>
    %137 = arith.mulf %135, %136 : vector<16x128xf32>
    %c1 = arith.constant 1 : index
    %c0_71 = arith.constant 0 : index
    %c0_72 = arith.constant 0 : index
    %138 = vector.load %arg5[%c1, %c0_71, %c0_72] : memref<2x384x128xf32, #tpu.memory_space<vmem>>, vector<1x128x128xf32>
    %139 = vector.shape_cast %138 : vector<1x128x128xf32> to vector<128x128xf32>
    %c1_73 = arith.constant 1 : index
    %c128_74 = arith.constant 128 : index
    %c0_75 = arith.constant 0 : index
    %140 = vector.load %arg5[%c1_73, %c128_74, %c0_75] : memref<2x384x128xf32, #tpu.memory_space<vmem>>, vector<1x128x128xf32>
    %141 = vector.shape_cast %140 : vector<1x128x128xf32> to vector<128x128xf32>
    %c1_76 = arith.constant 1 : index
    %c256_77 = arith.constant 256 : index
    %c0_78 = arith.constant 0 : index
    %142 = vector.load %arg5[%c1_76, %c256_77, %c0_78] : memref<2x384x128xf32, #tpu.memory_space<vmem>>, vector<1x128x128xf32>
    %143 = vector.shape_cast %142 : vector<1x128x128xf32> to vector<128x128xf32>
    %cst_79 = arith.constant dense<0.000000e+00> : vector<16x128xf32>
    %144 = tpu.matmul %134, %139, %cst_79 {dimension_numbers = #tpu.dot_dimension_numbers<[1], [0], [0], [1], [0, 0, 1, 1], [], []>} : vector<16x128xf32>, vector<128x128xf32>, vector<16x128xf32> -> vector<16x128xf32>
    %cst_80 = arith.constant dense<0.000000e+00> : vector<16x128xf32>
    %145 = tpu.matmul %119, %141, %cst_80 {dimension_numbers = #tpu.dot_dimension_numbers<[1], [0], [0], [1], [0, 0, 1, 1], [], []>} : vector<16x128xf32>, vector<128x128xf32>, vector<16x128xf32> -> vector<16x128xf32>
    %146 = arith.addf %144, %145 : vector<16x128xf32>
    %cst_81 = arith.constant dense<0.000000e+00> : vector<16x128xf32>
    %147 = tpu.matmul %137, %143, %cst_81 {dimension_numbers = #tpu.dot_dimension_numbers<[1], [0], [0], [1], [0, 0, 1, 1], [], []>} : vector<16x128xf32>, vector<128x128xf32>, vector<16x128xf32> -> vector<16x128xf32>
    %148 = arith.addf %146, %147 : vector<16x128xf32>
    %cst_82 = arith.constant dense<0.000000e+00> : vector<128xf32>
    %149 = vector.multi_reduction <add>, %148, %cst_82 [0] : vector<16x128xf32> to vector<128xf32>
    %150 = vector.shape_cast %149 : vector<128xf32> to vector<1x128xf32>
    %151 = arith.mulf %148, %148 : vector<16x128xf32>
    %cst_83 = arith.constant dense<0.000000e+00> : vector<128xf32>
    %152 = vector.multi_reduction <add>, %151, %cst_83 [0] : vector<16x128xf32> to vector<128xf32>
    %153 = vector.shape_cast %152 : vector<128xf32> to vector<1x128xf32>
    %154 = tpu.concatenate %150, %153 in 0 : vector<1x128xf32>, vector<1x128xf32> -> vector<2x128xf32>
    %cst_84 = arith.constant dense<0.000000e+00> : vector<2x4xf32>
    %155 = tpu.matmul %154, %36, %cst_84 {dimension_numbers = #tpu.dot_dimension_numbers<[1], [0], [0], [1], [0, 0, 1, 1], [], []>} : vector<2x128xf32>, vector<128x4xf32>, vector<2x4xf32> -> vector<2x4xf32>
    %cst_85 = arith.constant 0.001953125 : f32
    %156 = vector.broadcast %cst_85 : f32 to vector<2x4xf32>
    %157 = arith.mulf %155, %156 : vector<2x4xf32>
    %158 = vector.extract_strided_slice %157 {offsets = [0, 0], sizes = [1, 4], strides = [1, 1]} : vector<2x4xf32> to vector<1x4xf32>
    %159 = vector.extract_strided_slice %157 {offsets = [1, 0], sizes = [1, 4], strides = [1, 1]} : vector<2x4xf32> to vector<1x4xf32>
    %160 = arith.mulf %158, %158 : vector<1x4xf32>
    %161 = arith.subf %159, %160 : vector<1x4xf32>
    %cst_86 = arith.constant 9.99999974E-6 : f32
    %162 = vector.broadcast %cst_86 : f32 to vector<1x4xf32>
    %163 = arith.addf %161, %162 : vector<1x4xf32>
    %164 = math.rsqrt %163 : vector<1x4xf32>
    %c1_87 = arith.constant 1 : index
    %c0_88 = arith.constant 0 : index
    %c0_89 = arith.constant 0 : index
    %165 = vector.load %arg2[%c1_87, %c0_88, %c0_89] : memref<8x1x4xf32, #tpu.memory_space<vmem>>, vector<1x1x4xf32>
    %166 = vector.shape_cast %165 : vector<1x1x4xf32> to vector<1x4xf32>
    %167 = arith.mulf %166, %164 : vector<1x4xf32>
    %c1_90 = arith.constant 1 : index
    %c0_91 = arith.constant 0 : index
    %c0_92 = arith.constant 0 : index
    %168 = vector.load %arg3[%c1_90, %c0_91, %c0_92] : memref<8x1x4xf32, #tpu.memory_space<vmem>>, vector<1x1x4xf32>
    %169 = vector.shape_cast %168 : vector<1x1x4xf32> to vector<1x4xf32>
    %170 = arith.mulf %158, %167 : vector<1x4xf32>
    %171 = arith.subf %169, %170 : vector<1x4xf32>
    %172 = tpu.concatenate %167, %171 in 0 : vector<1x4xf32>, vector<1x4xf32> -> vector<2x4xf32>
    %cst_93 = arith.constant dense<0.000000e+00> : vector<2x128xf32>
    %173 = tpu.matmul %172, %57, %cst_93 {dimension_numbers = #tpu.dot_dimension_numbers<[1], [0], [0], [1], [0, 0, 1, 1], [], []>} : vector<2x4xf32>, vector<4x128xf32>, vector<2x128xf32> -> vector<2x128xf32>
    %174 = vector.extract_strided_slice %173 {offsets = [0, 0], sizes = [1, 128], strides = [1, 1]} : vector<2x128xf32> to vector<1x128xf32>
    %175 = vector.broadcast %174 : vector<1x128xf32> to vector<16x128xf32>
    %176 = arith.mulf %148, %175 : vector<16x128xf32>
    %177 = vector.extract_strided_slice %173 {offsets = [1, 0], sizes = [1, 128], strides = [1, 1]} : vector<2x128xf32> to vector<1x128xf32>
    %178 = vector.broadcast %177 : vector<1x128xf32> to vector<16x128xf32>
    %179 = arith.addf %176, %178 : vector<16x128xf32>
    %180 = arith.addf %179, %6 : vector<16x128xf32>
    %c0_i32_94 = arith.constant 0 : i32
    %c0_i32_95 = arith.constant 0 : i32
    %c0_i32_96 = arith.constant 0 : i32
    %c0_i32_97 = arith.constant 0 : i32
    %c0_i32_98 = arith.constant 0 : i32
    %181 = tpu.memref_slice %arg1[%c0_i32_94, %c0_i32_97, %c0_i32_98] : memref<8x384x128xf32, #tpu.memory_space<any>> -> memref<1x384x128xf32, #tpu.memory_space<any>>
    %182 = tpu.memref_squeeze %181 : memref<1x384x128xf32, #tpu.memory_space<any>> -> memref<384x128xf32, #tpu.memory_space<any>>
    %c0_i32_99 = arith.constant 0 : i32
    %c0_i32_100 = arith.constant 0 : i32
    %183 = tpu.memref_slice %arg5[%c0_i32_95, %c0_i32_99, %c0_i32_100] : memref<2x384x128xf32, #tpu.memory_space<vmem>> -> memref<1x384x128xf32, #tpu.memory_space<vmem>>
    %184 = tpu.memref_squeeze %183 : memref<1x384x128xf32, #tpu.memory_space<vmem>> -> memref<384x128xf32, #tpu.memory_space<vmem>>
    %185 = tpu.memref_slice %arg6[%c0_i32_96] : memref<2x!tpu.dma_semaphore, #tpu.memory_space<semaphore_mem>> -> memref<1x!tpu.dma_semaphore, #tpu.memory_space<semaphore_mem>>
    %186 = tpu.memref_squeeze %185 : memref<1x!tpu.dma_semaphore, #tpu.memory_space<semaphore_mem>> -> memref<!tpu.dma_semaphore, #tpu.memory_space<semaphore_mem>>
    tpu.wait_dma2 semaphore(%186 : memref<!tpu.dma_semaphore, #tpu.memory_space<semaphore_mem>>) src(%182 : memref<384x128xf32, #tpu.memory_space<any>>) dst(%184 : memref<384x128xf32, #tpu.memory_space<vmem>>)
    %c3_i32 = arith.constant 3 : i32
    %c1_i32_101 = arith.constant 1 : i32
    %c1_i32_102 = arith.constant 1 : i32
    %c0_i32_103 = arith.constant 0 : i32
    %c0_i32_104 = arith.constant 0 : i32
    %187 = tpu.memref_slice %arg1[%c3_i32, %c0_i32_103, %c0_i32_104] : memref<8x384x128xf32, #tpu.memory_space<any>> -> memref<1x384x128xf32, #tpu.memory_space<any>>
    %188 = tpu.memref_squeeze %187 : memref<1x384x128xf32, #tpu.memory_space<any>> -> memref<384x128xf32, #tpu.memory_space<any>>
    %c0_i32_105 = arith.constant 0 : i32
    %c0_i32_106 = arith.constant 0 : i32
    %189 = tpu.memref_slice %arg5[%c1_i32_101, %c0_i32_105, %c0_i32_106] : memref<2x384x128xf32, #tpu.memory_space<vmem>> -> memref<1x384x128xf32, #tpu.memory_space<vmem>>
    %190 = tpu.memref_squeeze %189 : memref<1x384x128xf32, #tpu.memory_space<vmem>> -> memref<384x128xf32, #tpu.memory_space<vmem>>
    %191 = tpu.memref_slice %arg6[%c1_i32_102] : memref<2x!tpu.dma_semaphore, #tpu.memory_space<semaphore_mem>> -> memref<1x!tpu.dma_semaphore, #tpu.memory_space<semaphore_mem>>
    %192 = tpu.memref_squeeze %191 : memref<1x!tpu.dma_semaphore, #tpu.memory_space<semaphore_mem>> -> memref<!tpu.dma_semaphore, #tpu.memory_space<semaphore_mem>>
    tpu.enqueue_dma source(%188 : memref<384x128xf32, #tpu.memory_space<any>>) target(%190 : memref<384x128xf32, #tpu.memory_space<vmem>>) target_semaphore(%192 : memref<!tpu.dma_semaphore, #tpu.memory_space<semaphore_mem>>)
    %c1_i32_107 = arith.constant 1 : i32
    %193 = tpu.dynamic_rotate %180 by %c1_i32_107 dim 0 : vector<16x128xf32>, i32 -> vector<16x128xf32>
    %194 = vector.broadcast %11 : vector<16x1xf32> to vector<16x128xf32>
    %195 = arith.mulf %193, %194 : vector<16x128xf32>
    %c15_i32_108 = arith.constant 15 : i32
    %196 = tpu.dynamic_rotate %180 by %c15_i32_108 dim 0 : vector<16x128xf32>, i32 -> vector<16x128xf32>
    %197 = vector.broadcast %15 : vector<16x1xf32> to vector<16x128xf32>
    %198 = arith.mulf %196, %197 : vector<16x128xf32>
    %c0_109 = arith.constant 0 : index
    %c0_110 = arith.constant 0 : index
    %c0_111 = arith.constant 0 : index
    %199 = vector.load %arg5[%c0_109, %c0_110, %c0_111] : memref<2x384x128xf32, #tpu.memory_space<vmem>>, vector<1x128x128xf32>
    %200 = vector.shape_cast %199 : vector<1x128x128xf32> to vector<128x128xf32>
    %c0_112 = arith.constant 0 : index
    %c128_113 = arith.constant 128 : index
    %c0_114 = arith.constant 0 : index
    %201 = vector.load %arg5[%c0_112, %c128_113, %c0_114] : memref<2x384x128xf32, #tpu.memory_space<vmem>>, vector<1x128x128xf32>
    %202 = vector.shape_cast %201 : vector<1x128x128xf32> to vector<128x128xf32>
    %c0_115 = arith.constant 0 : index
    %c256_116 = arith.constant 256 : index
    %c0_117 = arith.constant 0 : index
    %203 = vector.load %arg5[%c0_115, %c256_116, %c0_117] : memref<2x384x128xf32, #tpu.memory_space<vmem>>, vector<1x128x128xf32>
    %204 = vector.shape_cast %203 : vector<1x128x128xf32> to vector<128x128xf32>
    %cst_118 = arith.constant dense<0.000000e+00> : vector<16x128xf32>
    %205 = tpu.matmul %195, %200, %cst_118 {dimension_numbers = #tpu.dot_dimension_numbers<[1], [0], [0], [1], [0, 0, 1, 1], [], []>} : vector<16x128xf32>, vector<128x128xf32>, vector<16x128xf32> -> vector<16x128xf32>
    %cst_119 = arith.constant dense<0.000000e+00> : vector<16x128xf32>
    %206 = tpu.matmul %180, %202, %cst_119 {dimension_numbers = #tpu.dot_dimension_numbers<[1], [0], [0], [1], [0, 0, 1, 1], [], []>} : vector<16x128xf32>, vector<128x128xf32>, vector<16x128xf32> -> vector<16x128xf32>
    %207 = arith.addf %205, %206 : vector<16x128xf32>
    %cst_120 = arith.constant dense<0.000000e+00> : vector<16x128xf32>
    %208 = tpu.matmul %198, %204, %cst_120 {dimension_numbers = #tpu.dot_dimension_numbers<[1], [0], [0], [1], [0, 0, 1, 1], [], []>} : vector<16x128xf32>, vector<128x128xf32>, vector<16x128xf32> -> vector<16x128xf32>
    %209 = arith.addf %207, %208 : vector<16x128xf32>
    %cst_121 = arith.constant dense<0.000000e+00> : vector<128xf32>
    %210 = vector.multi_reduction <add>, %209, %cst_121 [0] : vector<16x128xf32> to vector<128xf32>
    %211 = vector.shape_cast %210 : vector<128xf32> to vector<1x128xf32>
    %212 = arith.mulf %209, %209 : vector<16x128xf32>
    %cst_122 = arith.constant dense<0.000000e+00> : vector<128xf32>
    %213 = vector.multi_reduction <add>, %212, %cst_122 [0] : vector<16x128xf32> to vector<128xf32>
    %214 = vector.shape_cast %213 : vector<128xf32> to vector<1x128xf32>
    %215 = tpu.concatenate %211, %214 in 0 : vector<1x128xf32>, vector<1x128xf32> -> vector<2x128xf32>
    %cst_123 = arith.constant dense<0.000000e+00> : vector<2x4xf32>
    %216 = tpu.matmul %215, %36, %cst_123 {dimension_numbers = #tpu.dot_dimension_numbers<[1], [0], [0], [1], [0, 0, 1, 1], [], []>} : vector<2x128xf32>, vector<128x4xf32>, vector<2x4xf32> -> vector<2x4xf32>
    %cst_124 = arith.constant 0.001953125 : f32
    %217 = vector.broadcast %cst_124 : f32 to vector<2x4xf32>
    %218 = arith.mulf %216, %217 : vector<2x4xf32>
    %219 = vector.extract_strided_slice %218 {offsets = [0, 0], sizes = [1, 4], strides = [1, 1]} : vector<2x4xf32> to vector<1x4xf32>
    %220 = vector.extract_strided_slice %218 {offsets = [1, 0], sizes = [1, 4], strides = [1, 1]} : vector<2x4xf32> to vector<1x4xf32>
    %221 = arith.mulf %219, %219 : vector<1x4xf32>
    %222 = arith.subf %220, %221 : vector<1x4xf32>
    %cst_125 = arith.constant 9.99999974E-6 : f32
    %223 = vector.broadcast %cst_125 : f32 to vector<1x4xf32>
    %224 = arith.addf %222, %223 : vector<1x4xf32>
    %225 = math.rsqrt %224 : vector<1x4xf32>
    %c2 = arith.constant 2 : index
    %c0_126 = arith.constant 0 : index
    %c0_127 = arith.constant 0 : index
    %226 = vector.load %arg2[%c2, %c0_126, %c0_127] : memref<8x1x4xf32, #tpu.memory_space<vmem>>, vector<1x1x4xf32>
    %227 = vector.shape_cast %226 : vector<1x1x4xf32> to vector<1x4xf32>
    %228 = arith.mulf %227, %225 : vector<1x4xf32>
    %c2_128 = arith.constant 2 : index
    %c0_129 = arith.constant 0 : index
    %c0_130 = arith.constant 0 : index
    %229 = vector.load %arg3[%c2_128, %c0_129, %c0_130] : memref<8x1x4xf32, #tpu.memory_space<vmem>>, vector<1x1x4xf32>
    %230 = vector.shape_cast %229 : vector<1x1x4xf32> to vector<1x4xf32>
    %231 = arith.mulf %219, %228 : vector<1x4xf32>
    %232 = arith.subf %230, %231 : vector<1x4xf32>
    %233 = tpu.concatenate %228, %232 in 0 : vector<1x4xf32>, vector<1x4xf32> -> vector<2x4xf32>
    %cst_131 = arith.constant dense<0.000000e+00> : vector<2x128xf32>
    %234 = tpu.matmul %233, %57, %cst_131 {dimension_numbers = #tpu.dot_dimension_numbers<[1], [0], [0], [1], [0, 0, 1, 1], [], []>} : vector<2x4xf32>, vector<4x128xf32>, vector<2x128xf32> -> vector<2x128xf32>
    %235 = vector.extract_strided_slice %234 {offsets = [0, 0], sizes = [1, 128], strides = [1, 1]} : vector<2x128xf32> to vector<1x128xf32>
    %236 = vector.broadcast %235 : vector<1x128xf32> to vector<16x128xf32>
    %237 = arith.mulf %209, %236 : vector<16x128xf32>
    %238 = vector.extract_strided_slice %234 {offsets = [1, 0], sizes = [1, 128], strides = [1, 1]} : vector<2x128xf32> to vector<1x128xf32>
    %239 = vector.broadcast %238 : vector<1x128xf32> to vector<16x128xf32>
    %240 = arith.addf %237, %239 : vector<16x128xf32>
    %cst_132 = arith.constant 0.000000e+00 : f32
    %241 = vector.broadcast %cst_132 : f32 to vector<16x128xf32>
    %242 = arith.maximumf %240, %241 : vector<16x128xf32>
    %c0_i32_133 = arith.constant 0 : i32
    %c1_i32_134 = arith.constant 1 : i32
    %c1_i32_135 = arith.constant 1 : i32
    %c0_i32_136 = arith.constant 0 : i32
    %c0_i32_137 = arith.constant 0 : i32
    %243 = tpu.memref_slice %arg1[%c0_i32_133, %c0_i32_136, %c0_i32_137] : memref<8x384x128xf32, #tpu.memory_space<any>> -> memref<1x384x128xf32, #tpu.memory_space<any>>
    %244 = tpu.memref_squeeze %243 : memref<1x384x128xf32, #tpu.memory_space<any>> -> memref<384x128xf32, #tpu.memory_space<any>>
    %c0_i32_138 = arith.constant 0 : i32
    %c0_i32_139 = arith.constant 0 : i32
    %245 = tpu.memref_slice %arg5[%c1_i32_134, %c0_i32_138, %c0_i32_139] : memref<2x384x128xf32, #tpu.memory_space<vmem>> -> memref<1x384x128xf32, #tpu.memory_space<vmem>>
    %246 = tpu.memref_squeeze %245 : memref<1x384x128xf32, #tpu.memory_space<vmem>> -> memref<384x128xf32, #tpu.memory_space<vmem>>
    %247 = tpu.memref_slice %arg6[%c1_i32_135] : memref<2x!tpu.dma_semaphore, #tpu.memory_space<semaphore_mem>> -> memref<1x!tpu.dma_semaphore, #tpu.memory_space<semaphore_mem>>
    %248 = tpu.memref_squeeze %247 : memref<1x!tpu.dma_semaphore, #tpu.memory_space<semaphore_mem>> -> memref<!tpu.dma_semaphore, #tpu.memory_space<semaphore_mem>>
    tpu.wait_dma2 semaphore(%248 : memref<!tpu.dma_semaphore, #tpu.memory_space<semaphore_mem>>) src(%244 : memref<384x128xf32, #tpu.memory_space<any>>) dst(%246 : memref<384x128xf32, #tpu.memory_space<vmem>>)
    %c4_i32_140 = arith.constant 4 : i32
    %c0_i32_141 = arith.constant 0 : i32
    %c0_i32_142 = arith.constant 0 : i32
    %c0_i32_143 = arith.constant 0 : i32
    %c0_i32_144 = arith.constant 0 : i32
    %249 = tpu.memref_slice %arg1[%c4_i32_140, %c0_i32_143, %c0_i32_144] : memref<8x384x128xf32, #tpu.memory_space<any>> -> memref<1x384x128xf32, #tpu.memory_space<any>>
    %250 = tpu.memref_squeeze %249 : memref<1x384x128xf32, #tpu.memory_space<any>> -> memref<384x128xf32, #tpu.memory_space<any>>
    %c0_i32_145 = arith.constant 0 : i32
    %c0_i32_146 = arith.constant 0 : i32
    %251 = tpu.memref_slice %arg5[%c0_i32_141, %c0_i32_145, %c0_i32_146] : memref<2x384x128xf32, #tpu.memory_space<vmem>> -> memref<1x384x128xf32, #tpu.memory_space<vmem>>
    %252 = tpu.memref_squeeze %251 : memref<1x384x128xf32, #tpu.memory_space<vmem>> -> memref<384x128xf32, #tpu.memory_space<vmem>>
    %253 = tpu.memref_slice %arg6[%c0_i32_142] : memref<2x!tpu.dma_semaphore, #tpu.memory_space<semaphore_mem>> -> memref<1x!tpu.dma_semaphore, #tpu.memory_space<semaphore_mem>>
    %254 = tpu.memref_squeeze %253 : memref<1x!tpu.dma_semaphore, #tpu.memory_space<semaphore_mem>> -> memref<!tpu.dma_semaphore, #tpu.memory_space<semaphore_mem>>
    tpu.enqueue_dma source(%250 : memref<384x128xf32, #tpu.memory_space<any>>) target(%252 : memref<384x128xf32, #tpu.memory_space<vmem>>) target_semaphore(%254 : memref<!tpu.dma_semaphore, #tpu.memory_space<semaphore_mem>>)
    %c1_i32_147 = arith.constant 1 : i32
    %255 = tpu.dynamic_rotate %242 by %c1_i32_147 dim 0 : vector<16x128xf32>, i32 -> vector<16x128xf32>
    %256 = vector.broadcast %11 : vector<16x1xf32> to vector<16x128xf32>
    %257 = arith.mulf %255, %256 : vector<16x128xf32>
    %c15_i32_148 = arith.constant 15 : i32
    %258 = tpu.dynamic_rotate %242 by %c15_i32_148 dim 0 : vector<16x128xf32>, i32 -> vector<16x128xf32>
    %259 = vector.broadcast %15 : vector<16x1xf32> to vector<16x128xf32>
    %260 = arith.mulf %258, %259 : vector<16x128xf32>
    %c1_149 = arith.constant 1 : index
    %c0_150 = arith.constant 0 : index
    %c0_151 = arith.constant 0 : index
    %261 = vector.load %arg5[%c1_149, %c0_150, %c0_151] : memref<2x384x128xf32, #tpu.memory_space<vmem>>, vector<1x128x128xf32>
    %262 = vector.shape_cast %261 : vector<1x128x128xf32> to vector<128x128xf32>
    %c1_152 = arith.constant 1 : index
    %c128_153 = arith.constant 128 : index
    %c0_154 = arith.constant 0 : index
    %263 = vector.load %arg5[%c1_152, %c128_153, %c0_154] : memref<2x384x128xf32, #tpu.memory_space<vmem>>, vector<1x128x128xf32>
    %264 = vector.shape_cast %263 : vector<1x128x128xf32> to vector<128x128xf32>
    %c1_155 = arith.constant 1 : index
    %c256_156 = arith.constant 256 : index
    %c0_157 = arith.constant 0 : index
    %265 = vector.load %arg5[%c1_155, %c256_156, %c0_157] : memref<2x384x128xf32, #tpu.memory_space<vmem>>, vector<1x128x128xf32>
    %266 = vector.shape_cast %265 : vector<1x128x128xf32> to vector<128x128xf32>
    %cst_158 = arith.constant dense<0.000000e+00> : vector<16x128xf32>
    %267 = tpu.matmul %257, %262, %cst_158 {dimension_numbers = #tpu.dot_dimension_numbers<[1], [0], [0], [1], [0, 0, 1, 1], [], []>} : vector<16x128xf32>, vector<128x128xf32>, vector<16x128xf32> -> vector<16x128xf32>
    %cst_159 = arith.constant dense<0.000000e+00> : vector<16x128xf32>
    %268 = tpu.matmul %242, %264, %cst_159 {dimension_numbers = #tpu.dot_dimension_numbers<[1], [0], [0], [1], [0, 0, 1, 1], [], []>} : vector<16x128xf32>, vector<128x128xf32>, vector<16x128xf32> -> vector<16x128xf32>
    %269 = arith.addf %267, %268 : vector<16x128xf32>
    %cst_160 = arith.constant dense<0.000000e+00> : vector<16x128xf32>
    %270 = tpu.matmul %260, %266, %cst_160 {dimension_numbers = #tpu.dot_dimension_numbers<[1], [0], [0], [1], [0, 0, 1, 1], [], []>} : vector<16x128xf32>, vector<128x128xf32>, vector<16x128xf32> -> vector<16x128xf32>
    %271 = arith.addf %269, %270 : vector<16x128xf32>
    %cst_161 = arith.constant dense<0.000000e+00> : vector<128xf32>
    %272 = vector.multi_reduction <add>, %271, %cst_161 [0] : vector<16x128xf32> to vector<128xf32>
    %273 = vector.shape_cast %272 : vector<128xf32> to vector<1x128xf32>
    %274 = arith.mulf %271, %271 : vector<16x128xf32>
    %cst_162 = arith.constant dense<0.000000e+00> : vector<128xf32>
    %275 = vector.multi_reduction <add>, %274, %cst_162 [0] : vector<16x128xf32> to vector<128xf32>
    %276 = vector.shape_cast %275 : vector<128xf32> to vector<1x128xf32>
    %277 = tpu.concatenate %273, %276 in 0 : vector<1x128xf32>, vector<1x128xf32> -> vector<2x128xf32>
    %cst_163 = arith.constant dense<0.000000e+00> : vector<2x4xf32>
    %278 = tpu.matmul %277, %36, %cst_163 {dimension_numbers = #tpu.dot_dimension_numbers<[1], [0], [0], [1], [0, 0, 1, 1], [], []>} : vector<2x128xf32>, vector<128x4xf32>, vector<2x4xf32> -> vector<2x4xf32>
    %cst_164 = arith.constant 0.001953125 : f32
    %279 = vector.broadcast %cst_164 : f32 to vector<2x4xf32>
    %280 = arith.mulf %278, %279 : vector<2x4xf32>
    %281 = vector.extract_strided_slice %280 {offsets = [0, 0], sizes = [1, 4], strides = [1, 1]} : vector<2x4xf32> to vector<1x4xf32>
    %282 = vector.extract_strided_slice %280 {offsets = [1, 0], sizes = [1, 4], strides = [1, 1]} : vector<2x4xf32> to vector<1x4xf32>
    %283 = arith.mulf %281, %281 : vector<1x4xf32>
    %284 = arith.subf %282, %283 : vector<1x4xf32>
    %cst_165 = arith.constant 9.99999974E-6 : f32
    %285 = vector.broadcast %cst_165 : f32 to vector<1x4xf32>
    %286 = arith.addf %284, %285 : vector<1x4xf32>
    %287 = math.rsqrt %286 : vector<1x4xf32>
    %c3 = arith.constant 3 : index
    %c0_166 = arith.constant 0 : index
    %c0_167 = arith.constant 0 : index
    %288 = vector.load %arg2[%c3, %c0_166, %c0_167] : memref<8x1x4xf32, #tpu.memory_space<vmem>>, vector<1x1x4xf32>
    %289 = vector.shape_cast %288 : vector<1x1x4xf32> to vector<1x4xf32>
    %290 = arith.mulf %289, %287 : vector<1x4xf32>
    %c3_168 = arith.constant 3 : index
    %c0_169 = arith.constant 0 : index
    %c0_170 = arith.constant 0 : index
    %291 = vector.load %arg3[%c3_168, %c0_169, %c0_170] : memref<8x1x4xf32, #tpu.memory_space<vmem>>, vector<1x1x4xf32>
    %292 = vector.shape_cast %291 : vector<1x1x4xf32> to vector<1x4xf32>
    %293 = arith.mulf %281, %290 : vector<1x4xf32>
    %294 = arith.subf %292, %293 : vector<1x4xf32>
    %295 = tpu.concatenate %290, %294 in 0 : vector<1x4xf32>, vector<1x4xf32> -> vector<2x4xf32>
    %cst_171 = arith.constant dense<0.000000e+00> : vector<2x128xf32>
    %296 = tpu.matmul %295, %57, %cst_171 {dimension_numbers = #tpu.dot_dimension_numbers<[1], [0], [0], [1], [0, 0, 1, 1], [], []>} : vector<2x4xf32>, vector<4x128xf32>, vector<2x128xf32> -> vector<2x128xf32>
    %297 = vector.extract_strided_slice %296 {offsets = [0, 0], sizes = [1, 128], strides = [1, 1]} : vector<2x128xf32> to vector<1x128xf32>
    %298 = vector.broadcast %297 : vector<1x128xf32> to vector<16x128xf32>
    %299 = arith.mulf %271, %298 : vector<16x128xf32>
    %300 = vector.extract_strided_slice %296 {offsets = [1, 0], sizes = [1, 128], strides = [1, 1]} : vector<2x128xf32> to vector<1x128xf32>
    %301 = vector.broadcast %300 : vector<1x128xf32> to vector<16x128xf32>
    %302 = arith.addf %299, %301 : vector<16x128xf32>
    %303 = arith.addf %302, %180 : vector<16x128xf32>
    %c0_i32_172 = arith.constant 0 : i32
    %c0_i32_173 = arith.constant 0 : i32
    %c0_i32_174 = arith.constant 0 : i32
    %c0_i32_175 = arith.constant 0 : i32
    %c0_i32_176 = arith.constant 0 : i32
    %304 = tpu.memref_slice %arg1[%c0_i32_172, %c0_i32_175, %c0_i32_176] : memref<8x384x128xf32, #tpu.memory_space<any>> -> memref<1x384x128xf32, #tpu.memory_space<any>>
    %305 = tpu.memref_squeeze %304 : memref<1x384x128xf32, #tpu.memory_space<any>> -> memref<384x128xf32, #tpu.memory_space<any>>
    %c0_i32_177 = arith.constant 0 : i32
    %c0_i32_178 = arith.constant 0 : i32
    %306 = tpu.memref_slice %arg5[%c0_i32_173, %c0_i32_177, %c0_i32_178] : memref<2x384x128xf32, #tpu.memory_space<vmem>> -> memref<1x384x128xf32, #tpu.memory_space<vmem>>
    %307 = tpu.memref_squeeze %306 : memref<1x384x128xf32, #tpu.memory_space<vmem>> -> memref<384x128xf32, #tpu.memory_space<vmem>>
    %308 = tpu.memref_slice %arg6[%c0_i32_174] : memref<2x!tpu.dma_semaphore, #tpu.memory_space<semaphore_mem>> -> memref<1x!tpu.dma_semaphore, #tpu.memory_space<semaphore_mem>>
    %309 = tpu.memref_squeeze %308 : memref<1x!tpu.dma_semaphore, #tpu.memory_space<semaphore_mem>> -> memref<!tpu.dma_semaphore, #tpu.memory_space<semaphore_mem>>
    tpu.wait_dma2 semaphore(%309 : memref<!tpu.dma_semaphore, #tpu.memory_space<semaphore_mem>>) src(%305 : memref<384x128xf32, #tpu.memory_space<any>>) dst(%307 : memref<384x128xf32, #tpu.memory_space<vmem>>)
    %c5_i32 = arith.constant 5 : i32
    %c1_i32_179 = arith.constant 1 : i32
    %c1_i32_180 = arith.constant 1 : i32
    %c0_i32_181 = arith.constant 0 : i32
    %c0_i32_182 = arith.constant 0 : i32
    %310 = tpu.memref_slice %arg1[%c5_i32, %c0_i32_181, %c0_i32_182] : memref<8x384x128xf32, #tpu.memory_space<any>> -> memref<1x384x128xf32, #tpu.memory_space<any>>
    %311 = tpu.memref_squeeze %310 : memref<1x384x128xf32, #tpu.memory_space<any>> -> memref<384x128xf32, #tpu.memory_space<any>>
    %c0_i32_183 = arith.constant 0 : i32
    %c0_i32_184 = arith.constant 0 : i32
    %312 = tpu.memref_slice %arg5[%c1_i32_179, %c0_i32_183, %c0_i32_184] : memref<2x384x128xf32, #tpu.memory_space<vmem>> -> memref<1x384x128xf32, #tpu.memory_space<vmem>>
    %313 = tpu.memref_squeeze %312 : memref<1x384x128xf32, #tpu.memory_space<vmem>> -> memref<384x128xf32, #tpu.memory_space<vmem>>
    %314 = tpu.memref_slice %arg6[%c1_i32_180] : memref<2x!tpu.dma_semaphore, #tpu.memory_space<semaphore_mem>> -> memref<1x!tpu.dma_semaphore, #tpu.memory_space<semaphore_mem>>
    %315 = tpu.memref_squeeze %314 : memref<1x!tpu.dma_semaphore, #tpu.memory_space<semaphore_mem>> -> memref<!tpu.dma_semaphore, #tpu.memory_space<semaphore_mem>>
    tpu.enqueue_dma source(%311 : memref<384x128xf32, #tpu.memory_space<any>>) target(%313 : memref<384x128xf32, #tpu.memory_space<vmem>>) target_semaphore(%315 : memref<!tpu.dma_semaphore, #tpu.memory_space<semaphore_mem>>)
    %c1_i32_185 = arith.constant 1 : i32
    %316 = tpu.dynamic_rotate %303 by %c1_i32_185 dim 0 : vector<16x128xf32>, i32 -> vector<16x128xf32>
    %317 = vector.broadcast %11 : vector<16x1xf32> to vector<16x128xf32>
    %318 = arith.mulf %316, %317 : vector<16x128xf32>
    %c15_i32_186 = arith.constant 15 : i32
    %319 = tpu.dynamic_rotate %303 by %c15_i32_186 dim 0 : vector<16x128xf32>, i32 -> vector<16x128xf32>
    %320 = vector.broadcast %15 : vector<16x1xf32> to vector<16x128xf32>
    %321 = arith.mulf %319, %320 : vector<16x128xf32>
    %c0_187 = arith.constant 0 : index
    %c0_188 = arith.constant 0 : index
    %c0_189 = arith.constant 0 : index
    %322 = vector.load %arg5[%c0_187, %c0_188, %c0_189] : memref<2x384x128xf32, #tpu.memory_space<vmem>>, vector<1x128x128xf32>
    %323 = vector.shape_cast %322 : vector<1x128x128xf32> to vector<128x128xf32>
    %c0_190 = arith.constant 0 : index
    %c128_191 = arith.constant 128 : index
    %c0_192 = arith.constant 0 : index
    %324 = vector.load %arg5[%c0_190, %c128_191, %c0_192] : memref<2x384x128xf32, #tpu.memory_space<vmem>>, vector<1x128x128xf32>
    %325 = vector.shape_cast %324 : vector<1x128x128xf32> to vector<128x128xf32>
    %c0_193 = arith.constant 0 : index
    %c256_194 = arith.constant 256 : index
    %c0_195 = arith.constant 0 : index
    %326 = vector.load %arg5[%c0_193, %c256_194, %c0_195] : memref<2x384x128xf32, #tpu.memory_space<vmem>>, vector<1x128x128xf32>
    %327 = vector.shape_cast %326 : vector<1x128x128xf32> to vector<128x128xf32>
    %cst_196 = arith.constant dense<0.000000e+00> : vector<16x128xf32>
    %328 = tpu.matmul %318, %323, %cst_196 {dimension_numbers = #tpu.dot_dimension_numbers<[1], [0], [0], [1], [0, 0, 1, 1], [], []>} : vector<16x128xf32>, vector<128x128xf32>, vector<16x128xf32> -> vector<16x128xf32>
    %cst_197 = arith.constant dense<0.000000e+00> : vector<16x128xf32>
    %329 = tpu.matmul %303, %325, %cst_197 {dimension_numbers = #tpu.dot_dimension_numbers<[1], [0], [0], [1], [0, 0, 1, 1], [], []>} : vector<16x128xf32>, vector<128x128xf32>, vector<16x128xf32> -> vector<16x128xf32>
    %330 = arith.addf %328, %329 : vector<16x128xf32>
    %cst_198 = arith.constant dense<0.000000e+00> : vector<16x128xf32>
    %331 = tpu.matmul %321, %327, %cst_198 {dimension_numbers = #tpu.dot_dimension_numbers<[1], [0], [0], [1], [0, 0, 1, 1], [], []>} : vector<16x128xf32>, vector<128x128xf32>, vector<16x128xf32> -> vector<16x128xf32>
    %332 = arith.addf %330, %331 : vector<16x128xf32>
    %cst_199 = arith.constant dense<0.000000e+00> : vector<128xf32>
    %333 = vector.multi_reduction <add>, %332, %cst_199 [0] : vector<16x128xf32> to vector<128xf32>
    %334 = vector.shape_cast %333 : vector<128xf32> to vector<1x128xf32>
    %335 = arith.mulf %332, %332 : vector<16x128xf32>
    %cst_200 = arith.constant dense<0.000000e+00> : vector<128xf32>
    %336 = vector.multi_reduction <add>, %335, %cst_200 [0] : vector<16x128xf32> to vector<128xf32>
    %337 = vector.shape_cast %336 : vector<128xf32> to vector<1x128xf32>
    %338 = tpu.concatenate %334, %337 in 0 : vector<1x128xf32>, vector<1x128xf32> -> vector<2x128xf32>
    %cst_201 = arith.constant dense<0.000000e+00> : vector<2x4xf32>
    %339 = tpu.matmul %338, %36, %cst_201 {dimension_numbers = #tpu.dot_dimension_numbers<[1], [0], [0], [1], [0, 0, 1, 1], [], []>} : vector<2x128xf32>, vector<128x4xf32>, vector<2x4xf32> -> vector<2x4xf32>
    %cst_202 = arith.constant 0.001953125 : f32
    %340 = vector.broadcast %cst_202 : f32 to vector<2x4xf32>
    %341 = arith.mulf %339, %340 : vector<2x4xf32>
    %342 = vector.extract_strided_slice %341 {offsets = [0, 0], sizes = [1, 4], strides = [1, 1]} : vector<2x4xf32> to vector<1x4xf32>
    %343 = vector.extract_strided_slice %341 {offsets = [1, 0], sizes = [1, 4], strides = [1, 1]} : vector<2x4xf32> to vector<1x4xf32>
    %344 = arith.mulf %342, %342 : vector<1x4xf32>
    %345 = arith.subf %343, %344 : vector<1x4xf32>
    %cst_203 = arith.constant 9.99999974E-6 : f32
    %346 = vector.broadcast %cst_203 : f32 to vector<1x4xf32>
    %347 = arith.addf %345, %346 : vector<1x4xf32>
    %348 = math.rsqrt %347 : vector<1x4xf32>
    %c4 = arith.constant 4 : index
    %c0_204 = arith.constant 0 : index
    %c0_205 = arith.constant 0 : index
    %349 = vector.load %arg2[%c4, %c0_204, %c0_205] : memref<8x1x4xf32, #tpu.memory_space<vmem>>, vector<1x1x4xf32>
    %350 = vector.shape_cast %349 : vector<1x1x4xf32> to vector<1x4xf32>
    %351 = arith.mulf %350, %348 : vector<1x4xf32>
    %c4_206 = arith.constant 4 : index
    %c0_207 = arith.constant 0 : index
    %c0_208 = arith.constant 0 : index
    %352 = vector.load %arg3[%c4_206, %c0_207, %c0_208] : memref<8x1x4xf32, #tpu.memory_space<vmem>>, vector<1x1x4xf32>
    %353 = vector.shape_cast %352 : vector<1x1x4xf32> to vector<1x4xf32>
    %354 = arith.mulf %342, %351 : vector<1x4xf32>
    %355 = arith.subf %353, %354 : vector<1x4xf32>
    %356 = tpu.concatenate %351, %355 in 0 : vector<1x4xf32>, vector<1x4xf32> -> vector<2x4xf32>
    %cst_209 = arith.constant dense<0.000000e+00> : vector<2x128xf32>
    %357 = tpu.matmul %356, %57, %cst_209 {dimension_numbers = #tpu.dot_dimension_numbers<[1], [0], [0], [1], [0, 0, 1, 1], [], []>} : vector<2x4xf32>, vector<4x128xf32>, vector<2x128xf32> -> vector<2x128xf32>
    %358 = vector.extract_strided_slice %357 {offsets = [0, 0], sizes = [1, 128], strides = [1, 1]} : vector<2x128xf32> to vector<1x128xf32>
    %359 = vector.broadcast %358 : vector<1x128xf32> to vector<16x128xf32>
    %360 = arith.mulf %332, %359 : vector<16x128xf32>
    %361 = vector.extract_strided_slice %357 {offsets = [1, 0], sizes = [1, 128], strides = [1, 1]} : vector<2x128xf32> to vector<1x128xf32>
    %362 = vector.broadcast %361 : vector<1x128xf32> to vector<16x128xf32>
    %363 = arith.addf %360, %362 : vector<16x128xf32>
    %cst_210 = arith.constant 0.000000e+00 : f32
    %364 = vector.broadcast %cst_210 : f32 to vector<16x128xf32>
    %365 = arith.maximumf %363, %364 : vector<16x128xf32>
    %c0_i32_211 = arith.constant 0 : i32
    %c1_i32_212 = arith.constant 1 : i32
    %c1_i32_213 = arith.constant 1 : i32
    %c0_i32_214 = arith.constant 0 : i32
    %c0_i32_215 = arith.constant 0 : i32
    %366 = tpu.memref_slice %arg1[%c0_i32_211, %c0_i32_214, %c0_i32_215] : memref<8x384x128xf32, #tpu.memory_space<any>> -> memref<1x384x128xf32, #tpu.memory_space<any>>
    %367 = tpu.memref_squeeze %366 : memref<1x384x128xf32, #tpu.memory_space<any>> -> memref<384x128xf32, #tpu.memory_space<any>>
    %c0_i32_216 = arith.constant 0 : i32
    %c0_i32_217 = arith.constant 0 : i32
    %368 = tpu.memref_slice %arg5[%c1_i32_212, %c0_i32_216, %c0_i32_217] : memref<2x384x128xf32, #tpu.memory_space<vmem>> -> memref<1x384x128xf32, #tpu.memory_space<vmem>>
    %369 = tpu.memref_squeeze %368 : memref<1x384x128xf32, #tpu.memory_space<vmem>> -> memref<384x128xf32, #tpu.memory_space<vmem>>
    %370 = tpu.memref_slice %arg6[%c1_i32_213] : memref<2x!tpu.dma_semaphore, #tpu.memory_space<semaphore_mem>> -> memref<1x!tpu.dma_semaphore, #tpu.memory_space<semaphore_mem>>
    %371 = tpu.memref_squeeze %370 : memref<1x!tpu.dma_semaphore, #tpu.memory_space<semaphore_mem>> -> memref<!tpu.dma_semaphore, #tpu.memory_space<semaphore_mem>>
    tpu.wait_dma2 semaphore(%371 : memref<!tpu.dma_semaphore, #tpu.memory_space<semaphore_mem>>) src(%367 : memref<384x128xf32, #tpu.memory_space<any>>) dst(%369 : memref<384x128xf32, #tpu.memory_space<vmem>>)
    %c6_i32 = arith.constant 6 : i32
    %c0_i32_218 = arith.constant 0 : i32
    %c0_i32_219 = arith.constant 0 : i32
    %c0_i32_220 = arith.constant 0 : i32
    %c0_i32_221 = arith.constant 0 : i32
    %372 = tpu.memref_slice %arg1[%c6_i32, %c0_i32_220, %c0_i32_221] : memref<8x384x128xf32, #tpu.memory_space<any>> -> memref<1x384x128xf32, #tpu.memory_space<any>>
    %373 = tpu.memref_squeeze %372 : memref<1x384x128xf32, #tpu.memory_space<any>> -> memref<384x128xf32, #tpu.memory_space<any>>
    %c0_i32_222 = arith.constant 0 : i32
    %c0_i32_223 = arith.constant 0 : i32
    %374 = tpu.memref_slice %arg5[%c0_i32_218, %c0_i32_222, %c0_i32_223] : memref<2x384x128xf32, #tpu.memory_space<vmem>> -> memref<1x384x128xf32, #tpu.memory_space<vmem>>
    %375 = tpu.memref_squeeze %374 : memref<1x384x128xf32, #tpu.memory_space<vmem>> -> memref<384x128xf32, #tpu.memory_space<vmem>>
    %376 = tpu.memref_slice %arg6[%c0_i32_219] : memref<2x!tpu.dma_semaphore, #tpu.memory_space<semaphore_mem>> -> memref<1x!tpu.dma_semaphore, #tpu.memory_space<semaphore_mem>>
    %377 = tpu.memref_squeeze %376 : memref<1x!tpu.dma_semaphore, #tpu.memory_space<semaphore_mem>> -> memref<!tpu.dma_semaphore, #tpu.memory_space<semaphore_mem>>
    tpu.enqueue_dma source(%373 : memref<384x128xf32, #tpu.memory_space<any>>) target(%375 : memref<384x128xf32, #tpu.memory_space<vmem>>) target_semaphore(%377 : memref<!tpu.dma_semaphore, #tpu.memory_space<semaphore_mem>>)
    %c1_i32_224 = arith.constant 1 : i32
    %378 = tpu.dynamic_rotate %365 by %c1_i32_224 dim 0 : vector<16x128xf32>, i32 -> vector<16x128xf32>
    %379 = vector.broadcast %11 : vector<16x1xf32> to vector<16x128xf32>
    %380 = arith.mulf %378, %379 : vector<16x128xf32>
    %c15_i32_225 = arith.constant 15 : i32
    %381 = tpu.dynamic_rotate %365 by %c15_i32_225 dim 0 : vector<16x128xf32>, i32 -> vector<16x128xf32>
    %382 = vector.broadcast %15 : vector<16x1xf32> to vector<16x128xf32>
    %383 = arith.mulf %381, %382 : vector<16x128xf32>
    %c1_226 = arith.constant 1 : index
    %c0_227 = arith.constant 0 : index
    %c0_228 = arith.constant 0 : index
    %384 = vector.load %arg5[%c1_226, %c0_227, %c0_228] : memref<2x384x128xf32, #tpu.memory_space<vmem>>, vector<1x128x128xf32>
    %385 = vector.shape_cast %384 : vector<1x128x128xf32> to vector<128x128xf32>
    %c1_229 = arith.constant 1 : index
    %c128_230 = arith.constant 128 : index
    %c0_231 = arith.constant 0 : index
    %386 = vector.load %arg5[%c1_229, %c128_230, %c0_231] : memref<2x384x128xf32, #tpu.memory_space<vmem>>, vector<1x128x128xf32>
    %387 = vector.shape_cast %386 : vector<1x128x128xf32> to vector<128x128xf32>
    %c1_232 = arith.constant 1 : index
    %c256_233 = arith.constant 256 : index
    %c0_234 = arith.constant 0 : index
    %388 = vector.load %arg5[%c1_232, %c256_233, %c0_234] : memref<2x384x128xf32, #tpu.memory_space<vmem>>, vector<1x128x128xf32>
    %389 = vector.shape_cast %388 : vector<1x128x128xf32> to vector<128x128xf32>
    %cst_235 = arith.constant dense<0.000000e+00> : vector<16x128xf32>
    %390 = tpu.matmul %380, %385, %cst_235 {dimension_numbers = #tpu.dot_dimension_numbers<[1], [0], [0], [1], [0, 0, 1, 1], [], []>} : vector<16x128xf32>, vector<128x128xf32>, vector<16x128xf32> -> vector<16x128xf32>
    %cst_236 = arith.constant dense<0.000000e+00> : vector<16x128xf32>
    %391 = tpu.matmul %365, %387, %cst_236 {dimension_numbers = #tpu.dot_dimension_numbers<[1], [0], [0], [1], [0, 0, 1, 1], [], []>} : vector<16x128xf32>, vector<128x128xf32>, vector<16x128xf32> -> vector<16x128xf32>
    %392 = arith.addf %390, %391 : vector<16x128xf32>
    %cst_237 = arith.constant dense<0.000000e+00> : vector<16x128xf32>
    %393 = tpu.matmul %383, %389, %cst_237 {dimension_numbers = #tpu.dot_dimension_numbers<[1], [0], [0], [1], [0, 0, 1, 1], [], []>} : vector<16x128xf32>, vector<128x128xf32>, vector<16x128xf32> -> vector<16x128xf32>
    %394 = arith.addf %392, %393 : vector<16x128xf32>
    %cst_238 = arith.constant dense<0.000000e+00> : vector<128xf32>
    %395 = vector.multi_reduction <add>, %394, %cst_238 [0] : vector<16x128xf32> to vector<128xf32>
    %396 = vector.shape_cast %395 : vector<128xf32> to vector<1x128xf32>
    %397 = arith.mulf %394, %394 : vector<16x128xf32>
    %cst_239 = arith.constant dense<0.000000e+00> : vector<128xf32>
    %398 = vector.multi_reduction <add>, %397, %cst_239 [0] : vector<16x128xf32> to vector<128xf32>
    %399 = vector.shape_cast %398 : vector<128xf32> to vector<1x128xf32>
    %400 = tpu.concatenate %396, %399 in 0 : vector<1x128xf32>, vector<1x128xf32> -> vector<2x128xf32>
    %cst_240 = arith.constant dense<0.000000e+00> : vector<2x4xf32>
    %401 = tpu.matmul %400, %36, %cst_240 {dimension_numbers = #tpu.dot_dimension_numbers<[1], [0], [0], [1], [0, 0, 1, 1], [], []>} : vector<2x128xf32>, vector<128x4xf32>, vector<2x4xf32> -> vector<2x4xf32>
    %cst_241 = arith.constant 0.001953125 : f32
    %402 = vector.broadcast %cst_241 : f32 to vector<2x4xf32>
    %403 = arith.mulf %401, %402 : vector<2x4xf32>
    %404 = vector.extract_strided_slice %403 {offsets = [0, 0], sizes = [1, 4], strides = [1, 1]} : vector<2x4xf32> to vector<1x4xf32>
    %405 = vector.extract_strided_slice %403 {offsets = [1, 0], sizes = [1, 4], strides = [1, 1]} : vector<2x4xf32> to vector<1x4xf32>
    %406 = arith.mulf %404, %404 : vector<1x4xf32>
    %407 = arith.subf %405, %406 : vector<1x4xf32>
    %cst_242 = arith.constant 9.99999974E-6 : f32
    %408 = vector.broadcast %cst_242 : f32 to vector<1x4xf32>
    %409 = arith.addf %407, %408 : vector<1x4xf32>
    %410 = math.rsqrt %409 : vector<1x4xf32>
    %c5 = arith.constant 5 : index
    %c0_243 = arith.constant 0 : index
    %c0_244 = arith.constant 0 : index
    %411 = vector.load %arg2[%c5, %c0_243, %c0_244] : memref<8x1x4xf32, #tpu.memory_space<vmem>>, vector<1x1x4xf32>
    %412 = vector.shape_cast %411 : vector<1x1x4xf32> to vector<1x4xf32>
    %413 = arith.mulf %412, %410 : vector<1x4xf32>
    %c5_245 = arith.constant 5 : index
    %c0_246 = arith.constant 0 : index
    %c0_247 = arith.constant 0 : index
    %414 = vector.load %arg3[%c5_245, %c0_246, %c0_247] : memref<8x1x4xf32, #tpu.memory_space<vmem>>, vector<1x1x4xf32>
    %415 = vector.shape_cast %414 : vector<1x1x4xf32> to vector<1x4xf32>
    %416 = arith.mulf %404, %413 : vector<1x4xf32>
    %417 = arith.subf %415, %416 : vector<1x4xf32>
    %418 = tpu.concatenate %413, %417 in 0 : vector<1x4xf32>, vector<1x4xf32> -> vector<2x4xf32>
    %cst_248 = arith.constant dense<0.000000e+00> : vector<2x128xf32>
    %419 = tpu.matmul %418, %57, %cst_248 {dimension_numbers = #tpu.dot_dimension_numbers<[1], [0], [0], [1], [0, 0, 1, 1], [], []>} : vector<2x4xf32>, vector<4x128xf32>, vector<2x128xf32> -> vector<2x128xf32>
    %420 = vector.extract_strided_slice %419 {offsets = [0, 0], sizes = [1, 128], strides = [1, 1]} : vector<2x128xf32> to vector<1x128xf32>
    %421 = vector.broadcast %420 : vector<1x128xf32> to vector<16x128xf32>
    %422 = arith.mulf %394, %421 : vector<16x128xf32>
    %423 = vector.extract_strided_slice %419 {offsets = [1, 0], sizes = [1, 128], strides = [1, 1]} : vector<2x128xf32> to vector<1x128xf32>
    %424 = vector.broadcast %423 : vector<1x128xf32> to vector<16x128xf32>
    %425 = arith.addf %422, %424 : vector<16x128xf32>
    %426 = arith.addf %425, %303 : vector<16x128xf32>
    %c0_i32_249 = arith.constant 0 : i32
    %c0_i32_250 = arith.constant 0 : i32
    %c0_i32_251 = arith.constant 0 : i32
    %c0_i32_252 = arith.constant 0 : i32
    %c0_i32_253 = arith.constant 0 : i32
    %427 = tpu.memref_slice %arg1[%c0_i32_249, %c0_i32_252, %c0_i32_253] : memref<8x384x128xf32, #tpu.memory_space<any>> -> memref<1x384x128xf32, #tpu.memory_space<any>>
    %428 = tpu.memref_squeeze %427 : memref<1x384x128xf32, #tpu.memory_space<any>> -> memref<384x128xf32, #tpu.memory_space<any>>
    %c0_i32_254 = arith.constant 0 : i32
    %c0_i32_255 = arith.constant 0 : i32
    %429 = tpu.memref_slice %arg5[%c0_i32_250, %c0_i32_254, %c0_i32_255] : memref<2x384x128xf32, #tpu.memory_space<vmem>> -> memref<1x384x128xf32, #tpu.memory_space<vmem>>
    %430 = tpu.memref_squeeze %429 : memref<1x384x128xf32, #tpu.memory_space<vmem>> -> memref<384x128xf32, #tpu.memory_space<vmem>>
    %431 = tpu.memref_slice %arg6[%c0_i32_251] : memref<2x!tpu.dma_semaphore, #tpu.memory_space<semaphore_mem>> -> memref<1x!tpu.dma_semaphore, #tpu.memory_space<semaphore_mem>>
    %432 = tpu.memref_squeeze %431 : memref<1x!tpu.dma_semaphore, #tpu.memory_space<semaphore_mem>> -> memref<!tpu.dma_semaphore, #tpu.memory_space<semaphore_mem>>
    tpu.wait_dma2 semaphore(%432 : memref<!tpu.dma_semaphore, #tpu.memory_space<semaphore_mem>>) src(%428 : memref<384x128xf32, #tpu.memory_space<any>>) dst(%430 : memref<384x128xf32, #tpu.memory_space<vmem>>)
    %c7_i32 = arith.constant 7 : i32
    %c1_i32_256 = arith.constant 1 : i32
    %c1_i32_257 = arith.constant 1 : i32
    %c0_i32_258 = arith.constant 0 : i32
    %c0_i32_259 = arith.constant 0 : i32
    %433 = tpu.memref_slice %arg1[%c7_i32, %c0_i32_258, %c0_i32_259] : memref<8x384x128xf32, #tpu.memory_space<any>> -> memref<1x384x128xf32, #tpu.memory_space<any>>
    %434 = tpu.memref_squeeze %433 : memref<1x384x128xf32, #tpu.memory_space<any>> -> memref<384x128xf32, #tpu.memory_space<any>>
    %c0_i32_260 = arith.constant 0 : i32
    %c0_i32_261 = arith.constant 0 : i32
    %435 = tpu.memref_slice %arg5[%c1_i32_256, %c0_i32_260, %c0_i32_261] : memref<2x384x128xf32, #tpu.memory_space<vmem>> -> memref<1x384x128xf32, #tpu.memory_space<vmem>>
    %436 = tpu.memref_squeeze %435 : memref<1x384x128xf32, #tpu.memory_space<vmem>> -> memref<384x128xf32, #tpu.memory_space<vmem>>
    %437 = tpu.memref_slice %arg6[%c1_i32_257] : memref<2x!tpu.dma_semaphore, #tpu.memory_space<semaphore_mem>> -> memref<1x!tpu.dma_semaphore, #tpu.memory_space<semaphore_mem>>
    %438 = tpu.memref_squeeze %437 : memref<1x!tpu.dma_semaphore, #tpu.memory_space<semaphore_mem>> -> memref<!tpu.dma_semaphore, #tpu.memory_space<semaphore_mem>>
    tpu.enqueue_dma source(%434 : memref<384x128xf32, #tpu.memory_space<any>>) target(%436 : memref<384x128xf32, #tpu.memory_space<vmem>>) target_semaphore(%438 : memref<!tpu.dma_semaphore, #tpu.memory_space<semaphore_mem>>)
    %c1_i32_262 = arith.constant 1 : i32
    %439 = tpu.dynamic_rotate %426 by %c1_i32_262 dim 0 : vector<16x128xf32>, i32 -> vector<16x128xf32>
    %440 = vector.broadcast %11 : vector<16x1xf32> to vector<16x128xf32>
    %441 = arith.mulf %439, %440 : vector<16x128xf32>
    %c15_i32_263 = arith.constant 15 : i32
    %442 = tpu.dynamic_rotate %426 by %c15_i32_263 dim 0 : vector<16x128xf32>, i32 -> vector<16x128xf32>
    %443 = vector.broadcast %15 : vector<16x1xf32> to vector<16x128xf32>
    %444 = arith.mulf %442, %443 : vector<16x128xf32>
    %c0_264 = arith.constant 0 : index
    %c0_265 = arith.constant 0 : index
    %c0_266 = arith.constant 0 : index
    %445 = vector.load %arg5[%c0_264, %c0_265, %c0_266] : memref<2x384x128xf32, #tpu.memory_space<vmem>>, vector<1x128x128xf32>
    %446 = vector.shape_cast %445 : vector<1x128x128xf32> to vector<128x128xf32>
    %c0_267 = arith.constant 0 : index
    %c128_268 = arith.constant 128 : index
    %c0_269 = arith.constant 0 : index
    %447 = vector.load %arg5[%c0_267, %c128_268, %c0_269] : memref<2x384x128xf32, #tpu.memory_space<vmem>>, vector<1x128x128xf32>
    %448 = vector.shape_cast %447 : vector<1x128x128xf32> to vector<128x128xf32>
    %c0_270 = arith.constant 0 : index
    %c256_271 = arith.constant 256 : index
    %c0_272 = arith.constant 0 : index
    %449 = vector.load %arg5[%c0_270, %c256_271, %c0_272] : memref<2x384x128xf32, #tpu.memory_space<vmem>>, vector<1x128x128xf32>
    %450 = vector.shape_cast %449 : vector<1x128x128xf32> to vector<128x128xf32>
    %cst_273 = arith.constant dense<0.000000e+00> : vector<16x128xf32>
    %451 = tpu.matmul %441, %446, %cst_273 {dimension_numbers = #tpu.dot_dimension_numbers<[1], [0], [0], [1], [0, 0, 1, 1], [], []>} : vector<16x128xf32>, vector<128x128xf32>, vector<16x128xf32> -> vector<16x128xf32>
    %cst_274 = arith.constant dense<0.000000e+00> : vector<16x128xf32>
    %452 = tpu.matmul %426, %448, %cst_274 {dimension_numbers = #tpu.dot_dimension_numbers<[1], [0], [0], [1], [0, 0, 1, 1], [], []>} : vector<16x128xf32>, vector<128x128xf32>, vector<16x128xf32> -> vector<16x128xf32>
    %453 = arith.addf %451, %452 : vector<16x128xf32>
    %cst_275 = arith.constant dense<0.000000e+00> : vector<16x128xf32>
    %454 = tpu.matmul %444, %450, %cst_275 {dimension_numbers = #tpu.dot_dimension_numbers<[1], [0], [0], [1], [0, 0, 1, 1], [], []>} : vector<16x128xf32>, vector<128x128xf32>, vector<16x128xf32> -> vector<16x128xf32>
    %455 = arith.addf %453, %454 : vector<16x128xf32>
    %cst_276 = arith.constant dense<0.000000e+00> : vector<128xf32>
    %456 = vector.multi_reduction <add>, %455, %cst_276 [0] : vector<16x128xf32> to vector<128xf32>
    %457 = vector.shape_cast %456 : vector<128xf32> to vector<1x128xf32>
    %458 = arith.mulf %455, %455 : vector<16x128xf32>
    %cst_277 = arith.constant dense<0.000000e+00> : vector<128xf32>
    %459 = vector.multi_reduction <add>, %458, %cst_277 [0] : vector<16x128xf32> to vector<128xf32>
    %460 = vector.shape_cast %459 : vector<128xf32> to vector<1x128xf32>
    %461 = tpu.concatenate %457, %460 in 0 : vector<1x128xf32>, vector<1x128xf32> -> vector<2x128xf32>
    %cst_278 = arith.constant dense<0.000000e+00> : vector<2x4xf32>
    %462 = tpu.matmul %461, %36, %cst_278 {dimension_numbers = #tpu.dot_dimension_numbers<[1], [0], [0], [1], [0, 0, 1, 1], [], []>} : vector<2x128xf32>, vector<128x4xf32>, vector<2x4xf32> -> vector<2x4xf32>
    %cst_279 = arith.constant 0.001953125 : f32
    %463 = vector.broadcast %cst_279 : f32 to vector<2x4xf32>
    %464 = arith.mulf %462, %463 : vector<2x4xf32>
    %465 = vector.extract_strided_slice %464 {offsets = [0, 0], sizes = [1, 4], strides = [1, 1]} : vector<2x4xf32> to vector<1x4xf32>
    %466 = vector.extract_strided_slice %464 {offsets = [1, 0], sizes = [1, 4], strides = [1, 1]} : vector<2x4xf32> to vector<1x4xf32>
    %467 = arith.mulf %465, %465 : vector<1x4xf32>
    %468 = arith.subf %466, %467 : vector<1x4xf32>
    %cst_280 = arith.constant 9.99999974E-6 : f32
    %469 = vector.broadcast %cst_280 : f32 to vector<1x4xf32>
    %470 = arith.addf %468, %469 : vector<1x4xf32>
    %471 = math.rsqrt %470 : vector<1x4xf32>
    %c6 = arith.constant 6 : index
    %c0_281 = arith.constant 0 : index
    %c0_282 = arith.constant 0 : index
    %472 = vector.load %arg2[%c6, %c0_281, %c0_282] : memref<8x1x4xf32, #tpu.memory_space<vmem>>, vector<1x1x4xf32>
    %473 = vector.shape_cast %472 : vector<1x1x4xf32> to vector<1x4xf32>
    %474 = arith.mulf %473, %471 : vector<1x4xf32>
    %c6_283 = arith.constant 6 : index
    %c0_284 = arith.constant 0 : index
    %c0_285 = arith.constant 0 : index
    %475 = vector.load %arg3[%c6_283, %c0_284, %c0_285] : memref<8x1x4xf32, #tpu.memory_space<vmem>>, vector<1x1x4xf32>
    %476 = vector.shape_cast %475 : vector<1x1x4xf32> to vector<1x4xf32>
    %477 = arith.mulf %465, %474 : vector<1x4xf32>
    %478 = arith.subf %476, %477 : vector<1x4xf32>
    %479 = tpu.concatenate %474, %478 in 0 : vector<1x4xf32>, vector<1x4xf32> -> vector<2x4xf32>
    %cst_286 = arith.constant dense<0.000000e+00> : vector<2x128xf32>
    %480 = tpu.matmul %479, %57, %cst_286 {dimension_numbers = #tpu.dot_dimension_numbers<[1], [0], [0], [1], [0, 0, 1, 1], [], []>} : vector<2x4xf32>, vector<4x128xf32>, vector<2x128xf32> -> vector<2x128xf32>
    %481 = vector.extract_strided_slice %480 {offsets = [0, 0], sizes = [1, 128], strides = [1, 1]} : vector<2x128xf32> to vector<1x128xf32>
    %482 = vector.broadcast %481 : vector<1x128xf32> to vector<16x128xf32>
    %483 = arith.mulf %455, %482 : vector<16x128xf32>
    %484 = vector.extract_strided_slice %480 {offsets = [1, 0], sizes = [1, 128], strides = [1, 1]} : vector<2x128xf32> to vector<1x128xf32>
    %485 = vector.broadcast %484 : vector<1x128xf32> to vector<16x128xf32>
    %486 = arith.addf %483, %485 : vector<16x128xf32>
    %cst_287 = arith.constant 0.000000e+00 : f32
    %487 = vector.broadcast %cst_287 : f32 to vector<16x128xf32>
    %488 = arith.maximumf %486, %487 : vector<16x128xf32>
    %c0_i32_288 = arith.constant 0 : i32
    %c1_i32_289 = arith.constant 1 : i32
    %c1_i32_290 = arith.constant 1 : i32
    %c0_i32_291 = arith.constant 0 : i32
    %c0_i32_292 = arith.constant 0 : i32
    %489 = tpu.memref_slice %arg1[%c0_i32_288, %c0_i32_291, %c0_i32_292] : memref<8x384x128xf32, #tpu.memory_space<any>> -> memref<1x384x128xf32, #tpu.memory_space<any>>
    %490 = tpu.memref_squeeze %489 : memref<1x384x128xf32, #tpu.memory_space<any>> -> memref<384x128xf32, #tpu.memory_space<any>>
    %c0_i32_293 = arith.constant 0 : i32
    %c0_i32_294 = arith.constant 0 : i32
    %491 = tpu.memref_slice %arg5[%c1_i32_289, %c0_i32_293, %c0_i32_294] : memref<2x384x128xf32, #tpu.memory_space<vmem>> -> memref<1x384x128xf32, #tpu.memory_space<vmem>>
    %492 = tpu.memref_squeeze %491 : memref<1x384x128xf32, #tpu.memory_space<vmem>> -> memref<384x128xf32, #tpu.memory_space<vmem>>
    %493 = tpu.memref_slice %arg6[%c1_i32_290] : memref<2x!tpu.dma_semaphore, #tpu.memory_space<semaphore_mem>> -> memref<1x!tpu.dma_semaphore, #tpu.memory_space<semaphore_mem>>
    %494 = tpu.memref_squeeze %493 : memref<1x!tpu.dma_semaphore, #tpu.memory_space<semaphore_mem>> -> memref<!tpu.dma_semaphore, #tpu.memory_space<semaphore_mem>>
    tpu.wait_dma2 semaphore(%494 : memref<!tpu.dma_semaphore, #tpu.memory_space<semaphore_mem>>) src(%490 : memref<384x128xf32, #tpu.memory_space<any>>) dst(%492 : memref<384x128xf32, #tpu.memory_space<vmem>>)
    %c1_i32_295 = arith.constant 1 : i32
    %495 = tpu.dynamic_rotate %488 by %c1_i32_295 dim 0 : vector<16x128xf32>, i32 -> vector<16x128xf32>
    %496 = vector.broadcast %11 : vector<16x1xf32> to vector<16x128xf32>
    %497 = arith.mulf %495, %496 : vector<16x128xf32>
    %c15_i32_296 = arith.constant 15 : i32
    %498 = tpu.dynamic_rotate %488 by %c15_i32_296 dim 0 : vector<16x128xf32>, i32 -> vector<16x128xf32>
    %499 = vector.broadcast %15 : vector<16x1xf32> to vector<16x128xf32>
    %500 = arith.mulf %498, %499 : vector<16x128xf32>
    %c1_297 = arith.constant 1 : index
    %c0_298 = arith.constant 0 : index
    %c0_299 = arith.constant 0 : index
    %501 = vector.load %arg5[%c1_297, %c0_298, %c0_299] : memref<2x384x128xf32, #tpu.memory_space<vmem>>, vector<1x128x128xf32>
    %502 = vector.shape_cast %501 : vector<1x128x128xf32> to vector<128x128xf32>
    %c1_300 = arith.constant 1 : index
    %c128_301 = arith.constant 128 : index
    %c0_302 = arith.constant 0 : index
    %503 = vector.load %arg5[%c1_300, %c128_301, %c0_302] : memref<2x384x128xf32, #tpu.memory_space<vmem>>, vector<1x128x128xf32>
    %504 = vector.shape_cast %503 : vector<1x128x128xf32> to vector<128x128xf32>
    %c1_303 = arith.constant 1 : index
    %c256_304 = arith.constant 256 : index
    %c0_305 = arith.constant 0 : index
    %505 = vector.load %arg5[%c1_303, %c256_304, %c0_305] : memref<2x384x128xf32, #tpu.memory_space<vmem>>, vector<1x128x128xf32>
    %506 = vector.shape_cast %505 : vector<1x128x128xf32> to vector<128x128xf32>
    %cst_306 = arith.constant dense<0.000000e+00> : vector<16x128xf32>
    %507 = tpu.matmul %497, %502, %cst_306 {dimension_numbers = #tpu.dot_dimension_numbers<[1], [0], [0], [1], [0, 0, 1, 1], [], []>} : vector<16x128xf32>, vector<128x128xf32>, vector<16x128xf32> -> vector<16x128xf32>
    %cst_307 = arith.constant dense<0.000000e+00> : vector<16x128xf32>
    %508 = tpu.matmul %488, %504, %cst_307 {dimension_numbers = #tpu.dot_dimension_numbers<[1], [0], [0], [1], [0, 0, 1, 1], [], []>} : vector<16x128xf32>, vector<128x128xf32>, vector<16x128xf32> -> vector<16x128xf32>
    %509 = arith.addf %507, %508 : vector<16x128xf32>
    %cst_308 = arith.constant dense<0.000000e+00> : vector<16x128xf32>
    %510 = tpu.matmul %500, %506, %cst_308 {dimension_numbers = #tpu.dot_dimension_numbers<[1], [0], [0], [1], [0, 0, 1, 1], [], []>} : vector<16x128xf32>, vector<128x128xf32>, vector<16x128xf32> -> vector<16x128xf32>
    %511 = arith.addf %509, %510 : vector<16x128xf32>
    %cst_309 = arith.constant dense<0.000000e+00> : vector<128xf32>
    %512 = vector.multi_reduction <add>, %511, %cst_309 [0] : vector<16x128xf32> to vector<128xf32>
    %513 = vector.shape_cast %512 : vector<128xf32> to vector<1x128xf32>
    %514 = arith.mulf %511, %511 : vector<16x128xf32>
    %cst_310 = arith.constant dense<0.000000e+00> : vector<128xf32>
    %515 = vector.multi_reduction <add>, %514, %cst_310 [0] : vector<16x128xf32> to vector<128xf32>
    %516 = vector.shape_cast %515 : vector<128xf32> to vector<1x128xf32>
    %517 = tpu.concatenate %513, %516 in 0 : vector<1x128xf32>, vector<1x128xf32> -> vector<2x128xf32>
    %cst_311 = arith.constant dense<0.000000e+00> : vector<2x4xf32>
    %518 = tpu.matmul %517, %36, %cst_311 {dimension_numbers = #tpu.dot_dimension_numbers<[1], [0], [0], [1], [0, 0, 1, 1], [], []>} : vector<2x128xf32>, vector<128x4xf32>, vector<2x4xf32> -> vector<2x4xf32>
    %cst_312 = arith.constant 0.001953125 : f32
    %519 = vector.broadcast %cst_312 : f32 to vector<2x4xf32>
    %520 = arith.mulf %518, %519 : vector<2x4xf32>
    %521 = vector.extract_strided_slice %520 {offsets = [0, 0], sizes = [1, 4], strides = [1, 1]} : vector<2x4xf32> to vector<1x4xf32>
    %522 = vector.extract_strided_slice %520 {offsets = [1, 0], sizes = [1, 4], strides = [1, 1]} : vector<2x4xf32> to vector<1x4xf32>
    %523 = arith.mulf %521, %521 : vector<1x4xf32>
    %524 = arith.subf %522, %523 : vector<1x4xf32>
    %cst_313 = arith.constant 9.99999974E-6 : f32
    %525 = vector.broadcast %cst_313 : f32 to vector<1x4xf32>
    %526 = arith.addf %524, %525 : vector<1x4xf32>
    %527 = math.rsqrt %526 : vector<1x4xf32>
    %c7 = arith.constant 7 : index
    %c0_314 = arith.constant 0 : index
    %c0_315 = arith.constant 0 : index
    %528 = vector.load %arg2[%c7, %c0_314, %c0_315] : memref<8x1x4xf32, #tpu.memory_space<vmem>>, vector<1x1x4xf32>
    %529 = vector.shape_cast %528 : vector<1x1x4xf32> to vector<1x4xf32>
    %530 = arith.mulf %529, %527 : vector<1x4xf32>
    %c7_316 = arith.constant 7 : index
    %c0_317 = arith.constant 0 : index
    %c0_318 = arith.constant 0 : index
    %531 = vector.load %arg3[%c7_316, %c0_317, %c0_318] : memref<8x1x4xf32, #tpu.memory_space<vmem>>, vector<1x1x4xf32>
    %532 = vector.shape_cast %531 : vector<1x1x4xf32> to vector<1x4xf32>
    %533 = arith.mulf %521, %530 : vector<1x4xf32>
    %534 = arith.subf %532, %533 : vector<1x4xf32>
    %535 = tpu.concatenate %530, %534 in 0 : vector<1x4xf32>, vector<1x4xf32> -> vector<2x4xf32>
    %cst_319 = arith.constant dense<0.000000e+00> : vector<2x128xf32>
    %536 = tpu.matmul %535, %57, %cst_319 {dimension_numbers = #tpu.dot_dimension_numbers<[1], [0], [0], [1], [0, 0, 1, 1], [], []>} : vector<2x4xf32>, vector<4x128xf32>, vector<2x128xf32> -> vector<2x128xf32>
    %537 = vector.extract_strided_slice %536 {offsets = [0, 0], sizes = [1, 128], strides = [1, 1]} : vector<2x128xf32> to vector<1x128xf32>
    %538 = vector.broadcast %537 : vector<1x128xf32> to vector<16x128xf32>
    %539 = arith.mulf %511, %538 : vector<16x128xf32>
    %540 = vector.extract_strided_slice %536 {offsets = [1, 0], sizes = [1, 128], strides = [1, 1]} : vector<2x128xf32> to vector<1x128xf32>
    %541 = vector.broadcast %540 : vector<1x128xf32> to vector<16x128xf32>
    %542 = arith.addf %539, %541 : vector<16x128xf32>
    %543 = arith.addf %542, %426 : vector<16x128xf32>
    %544 = arith.addf %543, %6 : vector<16x128xf32>
    %c0_320 = arith.constant 0 : index
    %c0_321 = arith.constant 0 : index
    %545 = vector.load %arg4[%c0_320, %c0_321] : memref<16x128xf32, #tpu.memory_space<vmem>>, vector<16x128xf32>
    tpu.vector_store %arg4[%c0_320, %c0_321], %544 {strides = array<i32>} : memref<16x128xf32, #tpu.memory_space<vmem>>, vector<16x128xf32>,
    return
  }
}

</mosaic_0001>

<bundles_post_ra>
// kernel: resblocknet_forward.1
= control target key start
LH: loop header
LB: loop body
LE: loop exit
PB: predicated region body
PF: predicated region fallthrough
CT: control target
= control target key end

     0   :  { %v28_v0 = vlaneseq  ;;  %s7595_s15 = smov [#allocation2]   ;;  %s8590_s0 = inlined_call_operand.vmem [shape: f32[16,128], index: 0, kind: input, shape index: {}]   ;;  %s8591_s1 = inlined_call_operand.hbm [shape: f32[8,384,128], index: 1, kind: input, shape index: {}]   ;;  %s8592_s2 = inlined_call_operand.vmem [shape: f32[8,1,4], index: 2, kind: input, shape index: {}]   ;;  %s8593_s3 = inlined_call_operand.vmem [shape: f32[8,1,4], index: 3, kind: input, shape index: {}]   ;;  %s8594_s4 = inlined_call_operand.vmem [shape: f32[16,128], index: 4, kind: output, shape index: {}]  }
   0x1   :  { %s22_s16 = sshll.u32 %s7595_s15, 4  ;;  %v7630_v1 = vld [vmem:[%s8590_s0] sm:$0xff]  ;;  %v7635_v2 = vld [vmem:[%s8590_s0 + $0x8] sm:$0xff]  ;;  %s7644_s23 = scalar_lea.hbm %s8591_s1, 6144  ;;  %s7637_s16 = int_to_ptr.vmem [resolvable:$true] %s22_s16 }
   0x2   :  { %v7639_v3 = vshrl.u32 %v28_v0, 7  ;;  %p7383_p0 = scmp.ne.s32.totalorder %s8591_s1, %s7644_s23  ;;  %s7653_s27 = scalar_lea.hbm %s8591_s1, 49152 }
   0x3   :  { %p7385_p1 = scmp.lt.u32.totalorder %s7653_s27, %s7644_s23  ;;  %p7386_p2 = scmp.lt.u32.totalorder %s7644_s23, %s8591_s1 }
   0x5   :  { %p7387_p3 = por %p7386_p2, %p7385_p1 }
   0x7   :  { %p7388_p4 = pnand %p7387_p3, %p7383_p0 }
   0x9   :  { %7391 = shalt.err (!%p7388_p4)  }
   0xa   :  { %s7392_s6 = scalar_lea.vmem %s7637_s16, 6144  ;;  %s7396_s7 = scalar_lea.vmem %s7637_s16, 12288 }
   0xb   :  { %p7393_p5 = scmp.ne.s32.totalorder %s7637_s16, %s7392_s6  ;;  %p7397_p6 = scmp.lt.s32.totalorder %s7637_s16, %s7637_s16 }
   0xc   :  { %p7398_p7 = scmp.lt.s32.totalorder %s7396_s7, %s7392_s6 }
   0xe   :  { %p7399_p8 = por %p7398_p7, %p7397_p6 }
  0x10   :  { %p7673_p9 = pnand %p7399_p8, %p7393_p5 }
  0x12   :  { %7403 = shalt.err (!%p7673_p9)  }
  0x13   :  { %25 = dma.hbm_to_vmem [thread:$0]  %s8591_s1, 6144, %s7637_s16, [#allocation3]  ;;  %v58_v4 = vand.u32 127, %v28_v0  ;;  %v30_v5 = vadd.s32 8, %v7639_v3  ;;  %vm31_vm0 = vcmp.gt.s32.totalorder %v7639_v3, 0  ;;  %v43_v6 = vadd.s32 16, %v7639_v3 }
  0x14   :  { %v44_v7 = vadd.s32 24, %v7639_v3  ;;  %v7596_v8 = vmov 0.0   ;;  %v45_v10 = vadd.s32 32, %v7639_v3  ;;  %v46_v11 = vadd.s32 40, %v7639_v3 }
  0x15   :  { %v7688_v9 = vsel %vm31_vm0, 1.0, %v7596_v8  ;;  %v47_v12 = vadd.s32 48, %v7639_v3  ;;  %vm38_vm1 = vcmp.lt.s32.totalorder %v30_v5, 15  ;;  %v48_v13 = vadd.s32 56, %v7639_v3 }
  0x16   :  { %v49_v14 = vadd.s32 64, %v7639_v3  ;;  %v50_v15 = vadd.s32 72, %v7639_v3  ;;  %v7697_v16 = vsel %vm38_vm1, 1.0, %v7596_v8  ;;  %v51_v17 = vadd.s32 80, %v7639_v3 }
  0x17   :  { %v52_v18 = vadd.s32 88, %v7639_v3  ;;  %v53_v19 = vadd.s32 96, %v7639_v3  ;;  %v54_v20 = vadd.s32 104, %v7639_v3  ;;  %v55_v21 = vadd.s32 112, %v7639_v3 }
  0x18   :  { %v56_v22 = vadd.s32 120, %v7639_v3  ;;  %v63_v23 = vand.u32 3, %v7639_v3  ;;  %v70_v24 = vand.u32 3, %v30_v5  ;;  %v77_v25 = vand.u32 3, %v43_v6 }
  0x19   :  { %v84_v26 = vand.u32 3, %v44_v7  ;;  %v91_v27 = vand.u32 3, %v45_v10  ;;  %v98_v28 = vand.u32 3, %v46_v11  ;;  %v105_v29 = vand.u32 3, %v47_v12 }
  0x1a   :  { %v112_v30 = vand.u32 3, %v48_v13  ;;  %v119_v31 = vand.u32 3, %v49_v14  ;;  %v126_v32 = vand.u32 3, %v50_v15  ;;  %v133_v33 = vand.u32 3, %v51_v17 }
  0x1b   :  { %v140_v34 = vand.u32 3, %v52_v18  ;;  %v147_v35 = vand.u32 3, %v53_v19  ;;  %v154_v36 = vand.u32 3, %v54_v20  ;;  %v161_v37 = vand.u32 3, %v55_v21 }
  0x1c   :  { %v168_v38 = vand.u32 3, %v56_v22  ;;  %vm7706_vm2 = vcmp.eq.s32.totalorder %v63_v23, %v58_v4  ;;  %vm7710_vm3 = vcmp.eq.s32.totalorder %v70_v24, %v58_v4  ;;  %vm7714_vm4 = vcmp.eq.s32.totalorder %v77_v25, %v58_v4 }
  0x1d   :  { %vm7718_vm5 = vcmp.eq.s32.totalorder %v84_v26, %v58_v4  ;;  %vm7722_vm6 = vcmp.eq.s32.totalorder %v91_v27, %v58_v4  ;;  %vm7726_vm7 = vcmp.eq.s32.totalorder %v98_v28, %v58_v4  ;;  %vm7730_vm8 = vcmp.eq.s32.totalorder %v105_v29, %v58_v4 }
  0x1e   :  { %vm7734_vm9 = vcmp.eq.s32.totalorder %v112_v30, %v58_v4  ;;  %vm7738_vm10 = vcmp.eq.s32.totalorder %v119_v31, %v58_v4  ;;  %vm7742_vm11 = vcmp.eq.s32.totalorder %v126_v32, %v58_v4  ;;  %vm7746_vm12 = vcmp.eq.s32.totalorder %v133_v33, %v58_v4 }
  0x1f   :  { %v8616_v49 = vmov 0  ;;  %vm7750_vm13 = vcmp.eq.s32.totalorder %v140_v34, %v58_v4  ;;  %vm7754_vm14 = vcmp.eq.s32.totalorder %v147_v35, %v58_v4  ;;  %vm7758_vm15 = vcmp.eq.s32.totalorder %v154_v36, %v58_v4 }
  0x20   :  { %v8617_v49 = vsel %vm7746_vm12, 4294967295, %v8616_v49  ;;  %vm7762_vm0 = vcmp.eq.s32.totalorder %v161_v37, %v58_v4  ;;  %vm7766_vm1 = vcmp.eq.s32.totalorder %v168_v38, %v58_v4  ;;  %v8626_v54 = vmov 0 }
  0x21   :  { %v8627_v54 = vsel %vm7766_vm1, 4294967295, %v8626_v54  ;;  %v303_v55 = vand.u32 3, %v58_v4 }
  0x23   :  { %vm311_vm12 = vcmp.eq.s32.totalorder %v303_v55, %v7639_v3 }
  0x24   :  { %v7772_v56 = vsel %vm311_vm12, 1.0, %v7596_v8 }
  0x25   :  { %7579 = dma.done.wait [#allocation3], 6144 }
  0x26   :  { %7580 = vsyncadd [#allocation3], 4294961152  ;;  %5239 = vmatprep.mubr.f32.mxu0 %v7630_v1  ;;  %s7597_s11 = smov [#allocation2 + $0x180]   ;;  %s7788_s15 = scalar_lea.hbm %s8591_s1, 12288 }
  0x27   :  { %s327_s12 = sshll.u32 %s7597_s11, 4  ;;  %vm7779_vm1 = vmpackc.low %vm7710_vm3, %vm7706_vm2  ;;  %p7405_p10 = scmp.ne.s32.totalorder %s7644_s23, %s7788_s15  ;;  %s7783_s12 = int_to_ptr.vmem [resolvable:$true] %s327_s12 }
  0x28   :  { %p7408_p11 = scmp.lt.u32.totalorder %s7653_s27, %s7788_s15  ;;  %p7410_p13 = scmp.lt.u32.totalorder %s7788_s15, %s7644_s23 }
  0x2a   :  { %p7409_p12 = por %p7408_p11, %p7386_p2 }
  0x2c   :  { %p7411_p0 = por %p7410_p13, %p7409_p12 }
  0x2e   :  { %p7412_p1 = pnand %p7411_p0, %p7405_p10 }
  0x30   :  { %7415 = shalt.err (!%p7412_p1)  }
  0x31   :  { %s7416_s19 = scalar_lea.vmem %s7783_s12, 6144  ;;  %p7421_p4 = scmp.lt.s32.totalorder %s7783_s12, %s7637_s16 }
  0x32   :  { %p7417_p3 = scmp.ne.s32.totalorder %s7783_s12, %s7416_s19  ;;  %p7422_p5 = scmp.lt.s32.totalorder %s7396_s7, %s7416_s19 }
  0x34   :  { %p7423_p6 = por %p7422_p5, %p7421_p4 }
  0x36   :  { %p7807_p7 = pnand %p7423_p6, %p7417_p3 }
  0x38   :  { %7427 = shalt.err (!%p7807_p7)  }
  0x39   :  { %330 = dma.hbm_to_vmem [thread:$0]  %s7644_s23, 6144, %s7783_s12, [#allocation3 + $0x1]  ;;  %v7598_v58 = vmov 0.0|0.0   ;;  %v7599_v59 = vmov 1.0|1.0   ;;  %vm7824_vm2 = vmpackc.low %vm7718_vm5, %vm7714_vm4  ;;  %v331_v28 = vrot.slane %v7630_v1, 7 }
  0x3a   :  { %6463 = vmatprep.subr.bf16.mxu1 %v7598_v58  ;;  %vm7836_vm3 = vmpackc.low %vm7726_vm7, %vm7722_vm6  ;;  %v361_v62 = vld [vmem:[#allocation2 + $0x80] sm:$0xff]  ;;  %v362_v63 = vld [vmem:[#allocation2 + $0x88] sm:$0xff]  ;;  %v332_v29 = vrot.slane %v7635_v2, 7  ;;  %vm333_vm4 = vcmp.lt.s32.totalorder %v7639_v3, 1  ;;  %vm340_vm5 = vcmp.lt.s32.totalorder %v7639_v3, 7 }
  0x3b   :  { %6465 = vmatpush3.bf16.msk.msra.mxu1 %vm7779_vm1, %v7599_v59  ;;  %v363_v0 = vld [vmem:[#allocation2 + $0x90] sm:$0xff]  ;;  %v6367_v4 = vpack.c.bf16 %v362_v63, %v361_v62  ;;  %v364_v5 = vld [vmem:[#allocation2 + $0x98] sm:$0xff]  ;;  %v365_v7 = vld [vmem:[#allocation2 + $0xa0] sm:$0xff] }
  0x3c   :  { %6466 = vmatprep.subr.bf16.mxu1 %v7598_v58  ;;  %v6371_v6 = vpack.c.bf16 %v364_v5, %v363_v0  ;;  %v366_v10 = vld [vmem:[#allocation2 + $0xa8] sm:$0xff]  ;;  %v367_v12 = vld [vmem:[#allocation2 + $0xb0] sm:$0xff]  ;;  %v368_v13 = vld [vmem:[#allocation2 + $0xb8] sm:$0xff]  ;;  %v335_v33 = vsel %vm333_vm4, %v332_v29, %v331_v28 }
  0x3d   :  { %6368 = vmatprep.subr.bf16.mxu0 %v6367_v4  ;;  %v6375_v11 = vpack.c.bf16 %v366_v10, %v365_v7  ;;  %v6379_v14 = vpack.c.bf16 %v368_v13, %v367_v12  ;;  %v369_v15 = vld [vmem:[#allocation2 + $0xc0] sm:$0xff]  ;;  %v370_v17 = vld [vmem:[#allocation2 + $0xc8] sm:$0xff]  ;;  %v371_v19 = vld [vmem:[#allocation2 + $0xd0] sm:$0xff]  ;;  %v336_v36 = vmul.f32 %v7688_v9, %v335_v33 }
  0x3e   :  { %6370 = vmatpush3.bf16.msra.mxu0 %v6367_v4  ;;  %v6383_v18 = vpack.c.bf16 %v370_v17, %v369_v15  ;;  %v372_v20 = vld [vmem:[#allocation2 + $0xd8] sm:$0xff]  ;;  %v373_v22 = vld [vmem:[#allocation2 + $0xe0] sm:$0xff]  ;;  %v374_v23 = vld [vmem:[#allocation2 + $0xe8] sm:$0xff]  ;;  %v338_v17 = vrot.slane %v7630_v1, 1 }
  0x3f   :  { %6468 = vmatpush3.bf16.msk.msra.mxu1 %vm7824_vm2, %v7599_v59  ;;  %6372 = vmatprep.subr.bf16.mxu0 %v6371_v6  ;;  %v6387_v21 = vpack.c.bf16 %v372_v20, %v371_v19  ;;  %v6391_v24 = vpack.c.bf16 %v374_v23, %v373_v22  ;;  %v375_v25 = vld [vmem:[#allocation2 + $0xf0] sm:$0xff]  ;;  %v376_v26 = vld [vmem:[#allocation2 + $0xf8] sm:$0xff]  ;;  %v345_v30 = vld [vmem:[#allocation2] sm:$0xff] }
  0x40   :  { %6469 = vmatprep.subr.bf16.mxu1 %v7598_v58  ;;  %v6395_v27 = vpack.c.bf16 %v376_v26, %v375_v25  ;;  %v346_v31 = vld [vmem:[#allocation2 + $0x8] sm:$0xff]  ;;  %v347_v34 = vld [vmem:[#allocation2 + $0x10] sm:$0xff]  ;;  %v348_v35 = vld [vmem:[#allocation2 + $0x18] sm:$0xff] }
  0x41   :  { %v6399_v32 = vpack.c.bf16 %v346_v31, %v345_v30  ;;  %v6403_v37 = vpack.c.bf16 %v348_v35, %v347_v34  ;;  %v349_v38 = vld [vmem:[#allocation2 + $0x20] sm:$0xff]  ;;  %v350_v39 = vld [vmem:[#allocation2 + $0x28] sm:$0xff]  ;;  %v351_v41 = vld [vmem:[#allocation2 + $0x30] sm:$0xff] }
  0x42   :  { %6374 = vmatpush3.bf16.msra.mxu0 %v6371_v6  ;;  %v6407_v40 = vpack.c.bf16 %v350_v39, %v349_v38  ;;  %v352_v42 = vld [vmem:[#allocation2 + $0x38] sm:$0xff]  ;;  %v353_v44 = vld [vmem:[#allocation2 + $0x40] sm:$0xff]  ;;  %v354_v55 = vld [vmem:[#allocation2 + $0x48] sm:$0xff] }
  0x43   :  { %6471 = vmatpush3.bf16.msk.msra.mxu1 %vm7836_vm3, %v7599_v59  ;;  %6376 = vmatprep.subr.bf16.mxu0 %v6375_v11  ;;  %v6411_v43 = vpack.c.bf16 %v352_v42, %v351_v41  ;;  %v6415_v62 = vpack.c.bf16 %v354_v55, %v353_v44  ;;  %v355_v63 = vld [vmem:[#allocation2 + $0x50] sm:$0xff]  ;;  %v356_v0 = vld [vmem:[#allocation2 + $0x58] sm:$0xff]  ;;  %v357_v5 = vld [vmem:[#allocation2 + $0x60] sm:$0xff] }
  0x44   :  { %6472 = vmatprep.subr.bf16.mxu1 %v7598_v58  ;;  %v6419_v4 = vpack.c.bf16 %v356_v0, %v355_v63  ;;  %v358_v6 = vld [vmem:[#allocation2 + $0x68] sm:$0xff]  ;;  %v359_v10 = vld [vmem:[#allocation2 + $0x70] sm:$0xff]  ;;  %v377_v13 = vld [vmem:[#allocation2 + $0x100] sm:$0xff] }
  0x45   :  { %v6423_v7 = vpack.c.bf16 %v358_v6, %v357_v5  ;;  %v379_v19 = vld [vmem:[#allocation2 + $0x110] sm:$0xff]  ;;  %v380_v20 = vld [vmem:[#allocation2 + $0x118] sm:$0xff]  ;;  %v382_v25 = vld [vmem:[#allocation2 + $0x128] sm:$0xff] }
  0x46   :  { %6378 = vmatpush3.bf16.msra.mxu0 %v6375_v11  ;;  %v360_v11 = vld [vmem:[#allocation2 + $0x78] sm:$0xff]  ;;  %v6435_v22 = vpack.c.bf16 %v380_v20, %v379_v19  ;;  %v386_v33 = vld [vmem:[#allocation2 + $0x148] sm:$0xff]  ;;  %v391_v39 = vld [vmem:[#allocation2 + $0x170] sm:$0xff] }
  0x47   :  { %6380 = vmatprep.subr.bf16.mxu0 %v6379_v14  ;;  %v6427_v12 = vpack.c.bf16 %v360_v11, %v359_v10  ;;  %v384_v30 = vld [vmem:[#allocation2 + $0x138] sm:$0xff]  ;;  %vm7865_vm6 = vmpackc.low %vm7734_vm9, %vm7730_vm8  ;;  %vm8639_vm8 = vnez %v8617_v49 }
  0x48   :  { %v388_v34 = vld [vmem:[#allocation2 + $0x158] sm:$0xff]  ;;  %6474 = vmatpush3.bf16.msk.msra.mxu1 %vm7865_vm6, %v7599_v59  ;;  %vm7877_vm7 = vmpackc.low %vm7742_vm11, %vm7738_vm10  ;;  %vm8644_vm11 = vnez %v8627_v54 }
  0x49   :  { %6475 = vmatprep.subr.bf16.mxu1 %v7598_v58  ;;  %vm7889_vm9 = vmpackc.low %vm7750_vm13, %vm8639_vm8  ;;  %vm7600_vm13 = vmmov 0  }
  0x4a   :  { %6382 = vmatpush3.bf16.msra.mxu0 %v6379_v14  ;;  %v378_v14 = vld [vmem:[#allocation2 + $0x108] sm:$0xff]  ;;  %vm7901_vm10 = vmpackc.low %vm7758_vm15, %vm7754_vm14  ;;  %5344 = vmatprep.mubr.msk.f32.mxu1 %vm7600_vm13, %v7596_v8  ;;  %vm636_vm14 = vcmask 1040384   ;;  %vm749_vm15 = vcmask 1043456  }
  0x4b   :  { %6384 = vmatprep.subr.bf16.mxu0 %v6383_v18  ;;  %v6431_v15 = vpack.c.bf16 %v378_v14, %v377_v13  ;;  %vm7913_vm12 = vmpackc.low %vm8644_vm11, %vm7762_vm0  ;;  %vm745_vm0 = vcmask 31744  }
  0x4c   :  { %6477 = vmatpush3.bf16.msk.msra.mxu1 %vm7877_vm7, %v7599_v59 }
  0x4d   :  { %6478 = vmatprep.subr.bf16.mxu1 %v7598_v58 }
  0x4e   :  { %6386 = vmatpush3.bf16.msra.mxu0 %v6383_v18  ;;  %v339_v18 = vrot.slane %v7635_v2, 1 }
  0x4f   :  { %6388 = vmatprep.subr.bf16.mxu0 %v6387_v21 }
  0x50   :  { %v341_v23 = vsel %vm340_vm5, %v338_v17, %v339_v18  ;;  %v342_v42 = vsel %vm340_vm5, %v339_v18, %v338_v17  ;;  %6480 = vmatpush3.bf16.msk.msra.mxu1 %vm7889_vm9, %v7599_v59 }
  0x51   :  { %6481 = vmatprep.subr.bf16.mxu1 %v7598_v58 }
  0x52   :  { %6390 = vmatpush3.bf16.msra.mxu0 %v6387_v21  ;;  %v334_v21 = vsel %vm333_vm4, %v331_v28, %v332_v29  ;;  %v387_v29 = vld [vmem:[#allocation2 + $0x150] sm:$0xff] }
  0x53   :  { %6392 = vmatprep.subr.bf16.mxu0 %v6391_v24  ;;  %v6451_v35 = vpack.c.bf16 %v388_v34, %v387_v29  ;;  %v735_v29 = vld [vmem:[%s8593_s3] sm:$0x1] }
  0x54   :  { %6483 = vmatpush3.bf16.msk.msra.mxu1 %vm7901_vm10, %v7599_v59 }
  0x55   :  { %6484 = vmatprep.subr.bf16.mxu1 %v7598_v58 }
  0x56   :  { %6394 = vmatpush3.bf16.msra.mxu0 %v6391_v24  ;;  %v381_v24 = vld [vmem:[#allocation2 + $0x120] sm:$0xff] }
  0x57   :  { %6396 = vmatprep.subr.bf16.mxu0 %v6395_v27  ;;  %v6439_v26 = vpack.c.bf16 %v382_v25, %v381_v24 }
  0x58   :  { %6486 = vmatpush3.bf16.msk.msra.mxu1 %vm7913_vm12, %v7599_v59 }
  0x59   :  { %5347 = vmatprep.subr.mxu1 %v7596_v8 }
  0x5a   :  { %6398 = vmatpush3.bf16.msra.mxu0 %v6395_v27  ;;  %v383_v27 = vld [vmem:[#allocation2 + $0x130] sm:$0xff] }
  0x5b   :  { %6400 = vmatprep.subr.bf16.mxu0 %v6399_v32  ;;  %v6443_v31 = vpack.c.bf16 %v384_v30, %v383_v27 }
  0x5d   :  { %5240 = vmatmul.mubr.f32.vlgmr.msra.gmra.mrb[0].mxu0 %v7635_v2 }
  0x5e   :  { %6402 = vmatpush3.bf16.msra.mxu0 %v6399_v32  ;;  %5274 = vmatprep.mubr.f32.mxu0 %v336_v36  ;;  %v385_v32 = vld [vmem:[#allocation2 + $0x140] sm:$0xff] }
  0x5f   :  { %6404 = vmatprep.subr.bf16.mxu0 %v6403_v37  ;;  %v6447_v28 = vpack.c.bf16 %v386_v33, %v385_v32  ;;  %v389_v36 = vld [vmem:[#allocation2 + $0x160] sm:$0xff] }
  0x60   :  { %v716_v32 = vld [vmem:[%s8592_s2] sm:$0x1] }
  0x62   :  { %6406 = vmatpush3.bf16.msra.mxu0 %v6403_v37  ;;  %v390_v37 = vld [vmem:[#allocation2 + $0x168] sm:$0xff] }
  0x63   :  { %6408 = vmatprep.subr.bf16.mxu0 %v6407_v40  ;;  %v6455_v38 = vpack.c.bf16 %v390_v37, %v389_v36 }
  0x66   :  { %6410 = vmatpush3.bf16.msra.mxu0 %v6407_v40  ;;  %v392_v40 = vld [vmem:[#allocation2 + $0x178] sm:$0xff] }
  0x67   :  { %6412 = vmatprep.subr.bf16.mxu0 %v6411_v43  ;;  %v6459_v41 = vpack.c.bf16 %v392_v40, %v391_v39  ;;  %v7946_v39 = vsub.s32 1, %v7639_v3 }
  0x6a   :  { %6414 = vmatpush3.bf16.msra.mxu0 %v6411_v43  ;;  %v344_v43 = vmul.f32 %v7697_v16, %v342_v42 }
  0x6b   :  { %6416 = vmatprep.subr.bf16.mxu0 %v6415_v62 }
  0x6e   :  { %6418 = vmatpush3.bf16.msra.mxu0 %v6415_v62 }
  0x6f   :  { %6420 = vmatprep.subr.bf16.mxu0 %v6419_v4 }
  0x72   :  { %6422 = vmatpush3.bf16.msra.mxu0 %v6419_v4 }
  0x73   :  { %6424 = vmatprep.subr.bf16.mxu0 %v6423_v7 }
  0x76   :  { %6426 = vmatpush3.bf16.msra.mxu0 %v6423_v7 }
  0x77   :  { %6428 = vmatprep.subr.bf16.mxu0 %v6427_v12 }
  0x7a   :  { %6430 = vmatpush3.bf16.msra.mxu0 %v6427_v12 }
  0x7b   :  { %6432 = vmatprep.subr.bf16.mxu0 %v6431_v15 }
  0x7d   :  { %5275 = vmatmul.mubr.f32.vlgmr.msra.gmra.mrb[0].mxu0 %v334_v21 }
  0x7e   :  { %6434 = vmatpush3.bf16.msra.mxu0 %v6431_v15  ;;  %5309 = vmatprep.mubr.f32.mxu0 %v341_v23  ;;  %v7601_v23 = vmov 1966171168  }
  0x7f   :  { %6436 = vmatprep.subr.bf16.mxu0 %v6435_v22  ;;  %v719_v24 = vunpack.c.l.s4 %v7601_v23 }
  0x81   :  { %v720_v25 = vunpack.c.0.s8 %v719_v24 }
  0x82   :  { %6438 = vmatpush3.bf16.msra.mxu0 %v6435_v22 }
  0x83   :  { %6440 = vmatprep.subr.bf16.mxu0 %v6439_v26 }
  0x86   :  { %6442 = vmatpush3.bf16.msra.mxu0 %v6439_v26  ;;  %v7929_v26 = vsub.s32 %v720_v25, %v7639_v3 }
  0x87   :  { %6444 = vmatprep.subr.bf16.mxu0 %v6443_v31 }
  0x8a   :  { %6446 = vmatpush3.bf16.msra.mxu0 %v6443_v31 }
  0x8b   :  { %6448 = vmatprep.subr.bf16.mxu0 %v6447_v28 }
  0x8e   :  { %6450 = vmatpush3.bf16.msra.mxu0 %v6447_v28 }
  0x8f   :  { %6452 = vmatprep.subr.bf16.mxu0 %v6451_v35 }
  0x92   :  { %6454 = vmatpush3.bf16.msra.mxu0 %v6451_v35  ;;  %v7940_v35 = vsub.s32 0, %v7639_v3 }
  0x93   :  { %6456 = vmatprep.subr.bf16.mxu0 %v6455_v38 }
  0x96   :  { %6458 = vmatpush3.bf16.msra.mxu0 %v6455_v38 }
  0x97   :  { %6460 = vmatprep.subr.bf16.mxu0 %v6459_v41 }
  0x9a   :  { %6462 = vmatpush3.bf16.msra.mxu0 %v6459_v41 }
  0x9d   :  { %5310 = vmatmul.mubr.f32.vlgmr.msra.gmra.mrb[0].mxu0 %v344_v43 }
 0x170   :  { %v5311_v48 = vpop.f32.mrb[0].mxu0 }
 0x171   :  { %v628_v49 = vmul.f32 %v5311_v48, %v5311_v48  ;;  %v609_v50 = vpop.f32.mrb[1].mxu0 }
 0x172   :  { %v620_v51 = vadd.f32 %v5311_v48, %v609_v50  ;;  %v627_v52 = vmul.f32 %v609_v50, %v609_v50 }
 0x174   :  { %v621_v53 = vrot.slane %v620_v51, 4  ;;  %v629_v54 = vadd.f32 %v628_v49, %v627_v52 }
 0x176   :  { %v622_v62 = vadd.f32 %v621_v53, %v620_v51  ;;  %v630_v63 = vrot.slane %v629_v54, 4 }
 0x178   :  { %v623_v0 = vrot.slane %v622_v62, 2  ;;  %v631_v4 = vadd.f32 %v630_v63, %v629_v54 }
 0x17a   :  { %v624_v5 = vadd.f32 %v623_v0, %v622_v62  ;;  %v632_v6 = vrot.slane %v631_v4, 2 }
 0x17c   :  { %v625_v7 = vrot.slane %v624_v5, 1  ;;  %v633_v10 = vadd.f32 %v632_v6, %v631_v4 }
 0x17e   :  { %v634_v11 = vrot.slane %v633_v10, 1  ;;  %v626_v12 = vadd.f32 %v625_v7, %v624_v5 }
 0x180   :  { %v635_v13 = vadd.f32 %v634_v11, %v633_v10 }
 0x182   :  { %v637_v14 = vsel %vm636_vm14, %v626_v12, %v635_v13 }
 0x183   :  { %5345 = vmatmul.mubr.f32.vlgmr.msra.gmra.mrb[0].mxu1 %v637_v14 }
 0x184   :  { %5349 = vmatprep.mubr.msk.f32.mxu1 %vm7600_vm13, %v7596_v8  ;;  %5348 = vmatpush3.msk.msra.mxu1 %vm749_vm15, %v7772_v56 }
 0x256   :  { %v704_v15 = vpop.f32.mrb[0].mxu1 }
 0x257   :  { %v708_v17 = vmul.f32 0.001953125, %v704_v15  ;;  %v5346_v18 = vpop.f32.mrb[1].mxu1 }
 0x259   :  { %v709_v19 = vmul.f32 %v708_v17, %v708_v17 }
 0x25b   :  { %v711_v20 = vrot.slane %v709_v19, 7 }
 0x25d   :  { %v713_v21 = vsub.f32 %v708_v17, %v711_v20 }
 0x25f   :  { %v714_v22 = vadd.f32 1e-05, %v713_v21 }
 0x261   :  { %7366 = vrsqrt.f32 %v714_v22 }
 0x26b   :  { %v7367_v27 = vpop.eup %7366 }
 0x26c   :  { %v724_v30 = vrot.slane %v7367_v27, %v7929_v26 }
 0x26e   :  { %v725_v31 = vcombine.high %v724_v30, %v724_v30 }
 0x270   :  { %v732_v33 = vrot.slane %v725_v31, %v7929_v26 }
 0x272   :  { %v734_v28 = vmul.f32 %v732_v33, %v716_v32 }
 0x274   :  { %v736_v34 = vmul.f32 %v734_v28, %v708_v17 }
 0x276   :  { %v737_v36 = vsub.f32 %v735_v29, %v736_v34 }
 0x278   :  { %v742_v37 = vrot.slane %v737_v36, %v7940_v35 }
 0x27a   :  { %v744_v38 = vsel %vm636_vm14, %v734_v28, %v742_v37 }
 0x27b   :  { %5350 = vmatmul.mubr.msk.f32.vlgmr.msra.gmra.mrb[2].mxu1 %vm745_vm0, %v744_v38 }
 0x34e   :  { %v819_v40 = vpop.f32.mrb[2].mxu1 }
 0x34f   :  { %v826_v41 = vrot.slane %v819_v40, %v7940_v35  ;;  %v5351_v42 = vpop.f32.mrb[3].mxu1  ;;  %v832_v51 = vrot.slane %v819_v40, %v7946_v39 }
 0x351   :  { %v827_v43 = vmul.f32 %v826_v41, %v609_v50  ;;  %v828_v49 = vmul.f32 %v5311_v48, %v826_v41 }
 0x353   :  { %v833_v52 = vadd.f32 %v832_v51, %v827_v43  ;;  %v834_v53 = vadd.f32 %v832_v51, %v828_v49 }
 0x355   :  { %v7950_v54 = vmax.f32 %v833_v52, 0.0  ;;  %v7952_v62 = vmax.f32 %v834_v53, 0.0 }
 0x356   :  { %7581 = dma.done.wait [#allocation3 + $0x1], 6144 }
 0x357   :  { %7582 = vsyncadd [#allocation3 + $0x1], 4294961152  ;;  %5384 = vmatprep.mubr.f32.mxu1 %v7950_v54  ;;  %6583 = vmatprep.subr.bf16.mxu0 %v7598_v58  ;;  %s7959_s0 = scalar_lea.hbm %s8591_s1, 18432  ;;  %p7432_p8 = scmp.lt.u32.totalorder %s7788_s15, %s8591_s1 }
 0x358   :  { %p7430_p2 = scmp.ne.s32.totalorder %s7788_s15, %s7959_s0  ;;  %p7433_p10 = scmp.lt.u32.totalorder %s7653_s27, %s7959_s0 }
 0x359   :  { %p7435_p12 = scmp.lt.u32.totalorder %s7959_s0, %s7788_s15 }
 0x35a   :  { %p7434_p11 = por %p7433_p10, %p7432_p8 }
 0x35c   :  { %p7436_p13 = por %p7435_p12, %p7434_p11 }
 0x35e   :  { %p7437_p0 = pnand %p7436_p13, %p7430_p2 }
 0x360   :  { %7440 = shalt.err (!%p7437_p0)  }
 0x361   :  { %7452 = shalt.err (!%p7673_p9)  }
 0x362   :  { %850 = dma.hbm_to_vmem [thread:$0]  %s7788_s15, 6144, %s7637_s16, [#allocation3]  ;;  %6585 = vmatpush3.bf16.msk.msra.mxu0 %vm7779_vm1, %v7599_v59  ;;  %5489 = vmatprep.mubr.msk.f32.mxu0 %vm7600_vm13, %v7596_v8  ;;  %v851_v30 = vrot.slane %v7950_v54, 7  ;;  %v852_v31 = vrot.slane %v7952_v62, 7 }
 0x363   :  { %6586 = vmatprep.subr.bf16.mxu0 %v7598_v58  ;;  %v879_v48 = vld [vmem:[#allocation2 + $0x200] sm:$0xff]  ;;  %v880_v50 = vld [vmem:[#allocation2 + $0x208] sm:$0xff]  ;;  %v881_v63 = vld [vmem:[#allocation2 + $0x210] sm:$0xff] }
 0x364   :  { %v6487_v0 = vpack.c.bf16 %v880_v50, %v879_v48  ;;  %v882_v4 = vld [vmem:[#allocation2 + $0x218] sm:$0xff]  ;;  %v883_v6 = vld [vmem:[#allocation2 + $0x220] sm:$0xff]  ;;  %v884_v7 = vld [vmem:[#allocation2 + $0x228] sm:$0xff]  ;;  %v854_v29 = vsel %vm333_vm4, %v852_v31, %v851_v30 }
 0x365   :  { %v6491_v5 = vpack.c.bf16 %v882_v4, %v881_v63  ;;  %v6495_v10 = vpack.c.bf16 %v884_v7, %v883_v6  ;;  %v885_v11 = vld [vmem:[#allocation2 + $0x230] sm:$0xff]  ;;  %v886_v12 = vld [vmem:[#allocation2 + $0x238] sm:$0xff]  ;;  %v887_v14 = vld [vmem:[#allocation2 + $0x240] sm:$0xff]  ;;  %v855_v37 = vmul.f32 %v7688_v9, %v854_v29 }
 0x366   :  { %6588 = vmatpush3.bf16.msk.msra.mxu0 %vm7824_vm2, %v7599_v59  ;;  %6488 = vmatprep.subr.bf16.mxu1 %v6487_v0  ;;  %v6499_v13 = vpack.c.bf16 %v886_v12, %v885_v11  ;;  %v888_v15 = vld [vmem:[#allocation2 + $0x248] sm:$0xff]  ;;  %v889_v18 = vld [vmem:[#allocation2 + $0x250] sm:$0xff]  ;;  %v890_v19 = vld [vmem:[#allocation2 + $0x258] sm:$0xff] }
 0x367   :  { %6589 = vmatprep.subr.bf16.mxu0 %v7598_v58  ;;  %6490 = vmatpush3.bf16.msra.mxu1 %v6487_v0  ;;  %v6503_v17 = vpack.c.bf16 %v888_v15, %v887_v14  ;;  %v6507_v20 = vpack.c.bf16 %v890_v19, %v889_v18  ;;  %v891_v21 = vld [vmem:[#allocation2 + $0x260] sm:$0xff]  ;;  %v892_v22 = vld [vmem:[#allocation2 + $0x268] sm:$0xff]  ;;  %v893_v24 = vld [vmem:[#allocation2 + $0x270] sm:$0xff]  ;;  %v857_v15 = vrot.slane %v7950_v54, 1 }
 0x368   :  { %6492 = vmatprep.subr.bf16.mxu1 %v6491_v5  ;;  %v6511_v23 = vpack.c.bf16 %v892_v22, %v891_v21  ;;  %v894_v25 = vld [vmem:[#allocation2 + $0x278] sm:$0xff]  ;;  %v863_v32 = vld [vmem:[#allocation2 + $0x180] sm:$0xff]  ;;  %v864_v33 = vld [vmem:[#allocation2 + $0x188] sm:$0xff] }
 0x369   :  { %v6515_v27 = vpack.c.bf16 %v894_v25, %v893_v24  ;;  %v6519_v28 = vpack.c.bf16 %v864_v33, %v863_v32  ;;  %v865_v34 = vld [vmem:[#allocation2 + $0x190] sm:$0xff]  ;;  %v866_v36 = vld [vmem:[#allocation2 + $0x198] sm:$0xff]  ;;  %v867_v40 = vld [vmem:[#allocation2 + $0x1a0] sm:$0xff] }
 0x36a   :  { %6591 = vmatpush3.bf16.msk.msra.mxu0 %vm7836_vm3, %v7599_v59  ;;  %v6523_v38 = vpack.c.bf16 %v866_v36, %v865_v34  ;;  %v868_v41 = vld [vmem:[#allocation2 + $0x1a8] sm:$0xff]  ;;  %v869_v43 = vld [vmem:[#allocation2 + $0x1b0] sm:$0xff]  ;;  %v870_v49 = vld [vmem:[#allocation2 + $0x1b8] sm:$0xff] }
 0x36b   :  { %6592 = vmatprep.subr.bf16.mxu0 %v7598_v58  ;;  %6494 = vmatpush3.bf16.msra.mxu1 %v6491_v5  ;;  %v6527_v42 = vpack.c.bf16 %v868_v41, %v867_v40  ;;  %v6531_v51 = vpack.c.bf16 %v870_v49, %v869_v43  ;;  %v871_v52 = vld [vmem:[#allocation2 + $0x1c0] sm:$0xff]  ;;  %v872_v53 = vld [vmem:[#allocation2 + $0x1c8] sm:$0xff]  ;;  %v873_v50 = vld [vmem:[#allocation2 + $0x1d0] sm:$0xff] }
 0x36c   :  { %6496 = vmatprep.subr.bf16.mxu1 %v6495_v10  ;;  %v6535_v48 = vpack.c.bf16 %v872_v53, %v871_v52  ;;  %v874_v63 = vld [vmem:[#allocation2 + $0x1d8] sm:$0xff]  ;;  %v875_v4 = vld [vmem:[#allocation2 + $0x1e0] sm:$0xff]  ;;  %v876_v5 = vld [vmem:[#allocation2 + $0x1e8] sm:$0xff] }
 0x36d   :  { %v6539_v0 = vpack.c.bf16 %v874_v63, %v873_v50  ;;  %v6543_v6 = vpack.c.bf16 %v876_v5, %v875_v4  ;;  %v877_v7 = vld [vmem:[#allocation2 + $0x1f0] sm:$0xff]  ;;  %v895_v12 = vld [vmem:[#allocation2 + $0x280] sm:$0xff]  ;;  %v898_v19 = vld [vmem:[#allocation2 + $0x298] sm:$0xff] }
 0x36e   :  { %6594 = vmatpush3.bf16.msk.msra.mxu0 %vm7865_vm6, %v7599_v59  ;;  %v897_v18 = vld [vmem:[#allocation2 + $0x290] sm:$0xff]  ;;  %v900_v24 = vld [vmem:[#allocation2 + $0x2a8] sm:$0xff]  ;;  %v903_v32 = vld [vmem:[#allocation2 + $0x2c0] sm:$0xff] }
 0x36f   :  { %6595 = vmatprep.subr.bf16.mxu0 %v7598_v58  ;;  %6498 = vmatpush3.bf16.msra.mxu1 %v6495_v10  ;;  %v878_v10 = vld [vmem:[#allocation2 + $0x1f8] sm:$0xff]  ;;  %v6555_v21 = vpack.c.bf16 %v898_v19, %v897_v18  ;;  %v901_v25 = vld [vmem:[#allocation2 + $0x2b0] sm:$0xff]  ;;  %v904_v33 = vld [vmem:[#allocation2 + $0x2c8] sm:$0xff] }
 0x370   :  { %6500 = vmatprep.subr.bf16.mxu1 %v6499_v13  ;;  %v6547_v11 = vpack.c.bf16 %v878_v10, %v877_v7  ;;  %v907_v34 = vld [vmem:[#allocation2 + $0x2e0] sm:$0xff]  ;;  %v908_v36 = vld [vmem:[#allocation2 + $0x2e8] sm:$0xff]  ;;  %v910_v40 = vld [vmem:[#allocation2 + $0x2f8] sm:$0xff] }
 0x372   :  { %6597 = vmatpush3.bf16.msk.msra.mxu0 %vm7877_vm7, %v7599_v59 }
 0x373   :  { %6598 = vmatprep.subr.bf16.mxu0 %v7598_v58  ;;  %6502 = vmatpush3.bf16.msra.mxu1 %v6499_v13  ;;  %v896_v13 = vld [vmem:[#allocation2 + $0x288] sm:$0xff] }
 0x374   :  { %6504 = vmatprep.subr.bf16.mxu1 %v6503_v17  ;;  %v6551_v14 = vpack.c.bf16 %v896_v13, %v895_v12 }
 0x376   :  { %6600 = vmatpush3.bf16.msk.msra.mxu0 %vm7889_vm9, %v7599_v59 }
 0x377   :  { %6601 = vmatprep.subr.bf16.mxu0 %v7598_v58  ;;  %6506 = vmatpush3.bf16.msra.mxu1 %v6503_v17  ;;  %v858_v17 = vrot.slane %v7952_v62, 1 }
 0x378   :  { %6508 = vmatprep.subr.bf16.mxu1 %v6507_v20 }
 0x379   :  { %v859_v22 = vsel %vm340_vm5, %v857_v15, %v858_v17 }
 0x37a   :  { %6603 = vmatpush3.bf16.msk.msra.mxu0 %vm7901_vm10, %v7599_v59 }
 0x37b   :  { %6604 = vmatprep.subr.bf16.mxu0 %v7598_v58  ;;  %6510 = vmatpush3.bf16.msra.mxu1 %v6507_v20  ;;  %v853_v20 = vsel %vm333_vm4, %v851_v30, %v852_v31  ;;  %v6567_v30 = vpack.c.bf16 %v904_v33, %v903_v32  ;;  %v905_v31 = vld [vmem:[#allocation2 + $0x2d0] sm:$0xff] }
 0x37c   :  { %6512 = vmatprep.subr.bf16.mxu1 %v6511_v23 }
 0x37e   :  { %6606 = vmatpush3.bf16.msk.msra.mxu0 %vm7913_vm12, %v7599_v59 }
 0x37f   :  { %5492 = vmatprep.subr.mxu0 %v7596_v8  ;;  %6514 = vmatpush3.bf16.msra.mxu1 %v6511_v23  ;;  %v899_v23 = vld [vmem:[#allocation2 + $0x2a0] sm:$0xff] }
 0x380   :  { %6516 = vmatprep.subr.bf16.mxu1 %v6515_v27  ;;  %v6559_v54 = vpack.c.bf16 %v900_v24, %v899_v23 }
 0x383   :  { %6518 = vmatpush3.bf16.msra.mxu1 %v6515_v27 }
 0x384   :  { %6520 = vmatprep.subr.bf16.mxu1 %v6519_v28 }
 0x386   :  { %5385 = vmatmul.mubr.f32.vlgmr.msra.gmra.mrb[4].mxu1 %v7952_v62  ;;  %v902_v62 = vld [vmem:[#allocation2 + $0x2b8] sm:$0xff] }
 0x387   :  { %6522 = vmatpush3.bf16.msra.mxu1 %v6519_v28  ;;  %5419 = vmatprep.mubr.f32.mxu1 %v855_v37  ;;  %v6563_v27 = vpack.c.bf16 %v902_v62, %v901_v25  ;;  %v906_v28 = vld [vmem:[#allocation2 + $0x2d8] sm:$0xff]  ;;  %v6575_v37 = vpack.c.bf16 %v908_v36, %v907_v34 }
 0x388   :  { %6524 = vmatprep.subr.bf16.mxu1 %v6523_v38  ;;  %v6571_v29 = vpack.c.bf16 %v906_v28, %v905_v31 }
 0x38b   :  { %6526 = vmatpush3.bf16.msra.mxu1 %v6523_v38  ;;  %v909_v38 = vld [vmem:[#allocation2 + $0x2f0] sm:$0xff] }
 0x38c   :  { %6528 = vmatprep.subr.bf16.mxu1 %v6527_v42  ;;  %v6579_v41 = vpack.c.bf16 %v910_v40, %v909_v38 }
 0x38f   :  { %6530 = vmatpush3.bf16.msra.mxu1 %v6527_v42  ;;  %v860_v42 = vsel %vm340_vm5, %v858_v17, %v857_v15 }
 0x390   :  { %6532 = vmatprep.subr.bf16.mxu1 %v6531_v51  ;;  %v862_v43 = vmul.f32 %v7697_v16, %v860_v42 }
 0x393   :  { %6534 = vmatpush3.bf16.msra.mxu1 %v6531_v51 }
 0x394   :  { %6536 = vmatprep.subr.bf16.mxu1 %v6535_v48 }
 0x397   :  { %6538 = vmatpush3.bf16.msra.mxu1 %v6535_v48 }
 0x398   :  { %6540 = vmatprep.subr.bf16.mxu1 %v6539_v0 }
 0x39b   :  { %6542 = vmatpush3.bf16.msra.mxu1 %v6539_v0 }
 0x39c   :  { %6544 = vmatprep.subr.bf16.mxu1 %v6543_v6 }
 0x39f   :  { %6546 = vmatpush3.bf16.msra.mxu1 %v6543_v6 }
 0x3a0   :  { %6548 = vmatprep.subr.bf16.mxu1 %v6547_v11 }
 0x3a3   :  { %6550 = vmatpush3.bf16.msra.mxu1 %v6547_v11 }
 0x3a4   :  { %6552 = vmatprep.subr.bf16.mxu1 %v6551_v14 }
 0x3a6   :  { %5420 = vmatmul.mubr.f32.vlgmr.msra.gmra.mrb[4].mxu1 %v853_v20 }
 0x3a7   :  { %6554 = vmatpush3.bf16.msra.mxu1 %v6551_v14  ;;  %5454 = vmatprep.mubr.f32.mxu1 %v859_v22 }
 0x3a8   :  { %6556 = vmatprep.subr.bf16.mxu1 %v6555_v21 }
 0x3ab   :  { %6558 = vmatpush3.bf16.msra.mxu1 %v6555_v21 }
 0x3ac   :  { %6560 = vmatprep.subr.bf16.mxu1 %v6559_v54 }
 0x3af   :  { %6562 = vmatpush3.bf16.msra.mxu1 %v6559_v54 }
 0x3b0   :  { %6564 = vmatprep.subr.bf16.mxu1 %v6563_v27 }
 0x3b3   :  { %6566 = vmatpush3.bf16.msra.mxu1 %v6563_v27  ;;  %v4497_v27 = vld [vmem:[%s8592_s2 + $0x1] sm:$0x1] }
 0x3b4   :  { %6568 = vmatprep.subr.bf16.mxu1 %v6567_v30 }
 0x3b7   :  { %6570 = vmatpush3.bf16.msra.mxu1 %v6567_v30  ;;  %v4498_v30 = vld [vmem:[%s8593_s3 + $0x1] sm:$0x1] }
 0x3b8   :  { %6572 = vmatprep.subr.bf16.mxu1 %v6571_v29 }
 0x3bb   :  { %6574 = vmatpush3.bf16.msra.mxu1 %v6571_v29 }
 0x3bc   :  { %6576 = vmatprep.subr.bf16.mxu1 %v6575_v37 }
 0x3bf   :  { %6578 = vmatpush3.bf16.msra.mxu1 %v6575_v37 }
 0x3c0   :  { %6580 = vmatprep.subr.bf16.mxu1 %v6579_v41 }
 0x3c3   :  { %6582 = vmatpush3.bf16.msra.mxu1 %v6579_v41 }
 0x3c6   :  { %5455 = vmatmul.mubr.f32.vlgmr.msra.gmra.mrb[4].mxu1 %v862_v43 }
 0x499   :  { %v5456_v49 = vpop.f32.mrb[4].mxu1 }
 0x49a   :  { %v1146_v51 = vmul.f32 %v5456_v49, %v5456_v49  ;;  %v1127_v52 = vpop.f32.mrb[5].mxu1 }
 0x49b   :  { %v1138_v53 = vadd.f32 %v5456_v49, %v1127_v52  ;;  %v1145_v48 = vmul.f32 %v1127_v52, %v1127_v52 }
 0x49d   :  { %v1139_v50 = vrot.slane %v1138_v53, 4  ;;  %v1147_v63 = vadd.f32 %v1146_v51, %v1145_v48 }
 0x49f   :  { %v1140_v0 = vadd.f32 %v1139_v50, %v1138_v53  ;;  %v1148_v4 = vrot.slane %v1147_v63, 4 }
 0x4a1   :  { %v1141_v5 = vrot.slane %v1140_v0, 2  ;;  %v1149_v6 = vadd.f32 %v1148_v4, %v1147_v63 }
 0x4a3   :  { %v1142_v7 = vadd.f32 %v1141_v5, %v1140_v0  ;;  %v1150_v10 = vrot.slane %v1149_v6, 2 }
 0x4a5   :  { %v1143_v11 = vrot.slane %v1142_v7, 1  ;;  %v1151_v12 = vadd.f32 %v1150_v10, %v1149_v6 }
 0x4a7   :  { %v1152_v13 = vrot.slane %v1151_v12, 1  ;;  %v1144_v14 = vadd.f32 %v1143_v11, %v1142_v7 }
 0x4a9   :  { %v1153_v15 = vadd.f32 %v1152_v13, %v1151_v12 }
 0x4ab   :  { %v1154_v17 = vsel %vm636_vm14, %v1144_v14, %v1153_v15 }
 0x4ac   :  { %5490 = vmatmul.mubr.f32.vlgmr.msra.gmra.mrb[2].mxu0 %v1154_v17 }
 0x4ad   :  { %5493 = vmatpush3.msk.msra.mxu0 %vm749_vm15, %v7772_v56  ;;  %5494 = vmatprep.mubr.msk.f32.mxu0 %vm7600_vm13, %v7596_v8 }
 0x57f   :  { %v1221_v18 = vpop.f32.mrb[2].mxu0 }
 0x580   :  { %v1225_v19 = vmul.f32 0.001953125, %v1221_v18  ;;  %v5491_v20 = vpop.f32.mrb[3].mxu0 }
 0x582   :  { %v1226_v21 = vmul.f32 %v1225_v19, %v1225_v19 }
 0x584   :  { %v1228_v22 = vrot.slane %v1226_v21, 7 }
 0x586   :  { %v1230_v23 = vsub.f32 %v1225_v19, %v1228_v22 }
 0x588   :  { %v1231_v24 = vadd.f32 1e-05, %v1230_v23 }
 0x58a   :  { %7368 = vrsqrt.f32 %v1231_v24 }
 0x594   :  { %v7369_v54 = vpop.eup %7368 }
 0x595   :  { %v1242_v25 = vrot.slane %v7369_v54, %v7929_v26 }
 0x597   :  { %v1243_v62 = vcombine.high %v1242_v25, %v1242_v25 }
 0x599   :  { %v1250_v32 = vrot.slane %v1243_v62, %v7929_v26 }
 0x59b   :  { %v1252_v33 = vmul.f32 %v4497_v27, %v1250_v32 }
 0x59d   :  { %v1255_v31 = vmul.f32 %v1252_v33, %v1225_v19 }
 0x59f   :  { %v1256_v28 = vsub.f32 %v4498_v30, %v1255_v31 }
 0x5a1   :  { %v1261_v29 = vrot.slane %v1256_v28, %v7940_v35 }
 0x5a3   :  { %v1263_v34 = vsel %vm636_vm14, %v1252_v33, %v1261_v29 }
 0x5a4   :  { %5495 = vmatmul.mubr.msk.f32.vlgmr.msra.gmra.mrb[4].mxu0 %vm745_vm0, %v1263_v34 }
 0x677   :  { %v1333_v36 = vpop.f32.mrb[4].mxu0 }
 0x678   :  { %v1340_v37 = vrot.slane %v1333_v36, %v7940_v35  ;;  %v5496_v38 = vpop.f32.mrb[5].mxu0  ;;  %v1346_v42 = vrot.slane %v1333_v36, %v7946_v39 }
 0x67a   :  { %v1341_v40 = vmul.f32 %v1340_v37, %v1127_v52  ;;  %v1342_v41 = vmul.f32 %v5456_v49, %v1340_v37 }
 0x67c   :  { %v1347_v43 = vadd.f32 %v1346_v42, %v1341_v40  ;;  %v1348_v51 = vadd.f32 %v1346_v42, %v1342_v41 }
 0x67e   :  { %v8043_v53 = vadd.f32 %v1347_v43, %v7630_v1  ;;  %v8046_v48 = vadd.f32 %v1348_v51, %v7635_v2 }
 0x67f   :  { %7583 = dma.done.wait [#allocation3], 6144 }
 0x680   :  { %7584 = vsyncadd [#allocation3], 4294961152  ;;  %5529 = vmatprep.mubr.f32.mxu0 %v8043_v53  ;;  %6703 = vmatprep.subr.bf16.mxu1 %v7598_v58  ;;  %s8053_s11 = scalar_lea.hbm %s8591_s1, 24576  ;;  %p7457_p3 = scmp.lt.u32.totalorder %s7959_s0, %s8591_s1 }
 0x681   :  { %p7455_p1 = scmp.ne.s32.totalorder %s7959_s0, %s8053_s11  ;;  %p7458_p4 = scmp.lt.u32.totalorder %s7653_s27, %s8053_s11 }
 0x682   :  { %p7460_p6 = scmp.lt.u32.totalorder %s8053_s11, %s7959_s0 }
 0x683   :  { %p7459_p5 = por %p7458_p4, %p7457_p3 }
 0x685   :  { %p7461_p2 = por %p7460_p6, %p7459_p5 }
 0x687   :  { %p7462_p8 = pnand %p7461_p2, %p7455_p1 }
 0x689   :  { %7465 = shalt.err (!%p7462_p8)  }
 0x68a   :  { %7477 = shalt.err (!%p7807_p7)  }
 0x68b   :  { %1364 = dma.hbm_to_vmem [thread:$0]  %s7959_s0, 6144, %s7783_s12, [#allocation3 + $0x1]  ;;  %6705 = vmatpush3.bf16.msk.msra.mxu1 %vm7779_vm1, %v7599_v59  ;;  %5634 = vmatprep.mubr.msk.f32.mxu1 %vm7600_vm13, %v7596_v8  ;;  %v1365_v25 = vrot.slane %v8043_v53, 7  ;;  %v1366_v62 = vrot.slane %v8046_v48, 7 }
 0x68c   :  { %6706 = vmatprep.subr.bf16.mxu1 %v7598_v58  ;;  %v1393_v49 = vld [vmem:[#allocation2 + $0x80] sm:$0xff]  ;;  %v1394_v52 = vld [vmem:[#allocation2 + $0x88] sm:$0xff]  ;;  %v1395_v50 = vld [vmem:[#allocation2 + $0x90] sm:$0xff] }
 0x68d   :  { %v6607_v63 = vpack.c.bf16 %v1394_v52, %v1393_v49  ;;  %v1396_v0 = vld [vmem:[#allocation2 + $0x98] sm:$0xff]  ;;  %v1397_v5 = vld [vmem:[#allocation2 + $0xa0] sm:$0xff]  ;;  %v1398_v6 = vld [vmem:[#allocation2 + $0xa8] sm:$0xff]  ;;  %v1368_v30 = vsel %vm333_vm4, %v1366_v62, %v1365_v25 }
 0x68e   :  { %v6611_v4 = vpack.c.bf16 %v1396_v0, %v1395_v50  ;;  %v6615_v7 = vpack.c.bf16 %v1398_v6, %v1397_v5  ;;  %v1399_v10 = vld [vmem:[#allocation2 + $0xb0] sm:$0xff]  ;;  %v1400_v11 = vld [vmem:[#allocation2 + $0xb8] sm:$0xff]  ;;  %v1401_v13 = vld [vmem:[#allocation2 + $0xc0] sm:$0xff]  ;;  %v1369_v29 = vmul.f32 %v7688_v9, %v1368_v30 }
 0x68f   :  { %6708 = vmatpush3.bf16.msk.msra.mxu1 %vm7824_vm2, %v7599_v59  ;;  %6608 = vmatprep.subr.bf16.mxu0 %v6607_v63  ;;  %v6619_v12 = vpack.c.bf16 %v1400_v11, %v1399_v10  ;;  %v1402_v14 = vld [vmem:[#allocation2 + $0xc8] sm:$0xff]  ;;  %v1403_v17 = vld [vmem:[#allocation2 + $0xd0] sm:$0xff]  ;;  %v1404_v18 = vld [vmem:[#allocation2 + $0xd8] sm:$0xff] }
 0x690   :  { %6709 = vmatprep.subr.bf16.mxu1 %v7598_v58  ;;  %6610 = vmatpush3.bf16.msra.mxu0 %v6607_v63  ;;  %v6623_v15 = vpack.c.bf16 %v1402_v14, %v1401_v13  ;;  %v6627_v19 = vpack.c.bf16 %v1404_v18, %v1403_v17  ;;  %v1405_v20 = vld [vmem:[#allocation2 + $0xe0] sm:$0xff]  ;;  %v1406_v21 = vld [vmem:[#allocation2 + $0xe8] sm:$0xff]  ;;  %v1407_v23 = vld [vmem:[#allocation2 + $0xf0] sm:$0xff]  ;;  %v1371_v14 = vrot.slane %v8043_v53, 1 }
 0x691   :  { %6612 = vmatprep.subr.bf16.mxu0 %v6611_v4  ;;  %v6631_v22 = vpack.c.bf16 %v1406_v21, %v1405_v20  ;;  %v1408_v24 = vld [vmem:[#allocation2 + $0xf8] sm:$0xff]  ;;  %v1377_v27 = vld [vmem:[#allocation2] sm:$0xff]  ;;  %v1378_v32 = vld [vmem:[#allocation2 + $0x8] sm:$0xff] }
 0x692   :  { %v6635_v54 = vpack.c.bf16 %v1408_v24, %v1407_v23  ;;  %v6639_v33 = vpack.c.bf16 %v1378_v32, %v1377_v27  ;;  %v1379_v31 = vld [vmem:[#allocation2 + $0x10] sm:$0xff]  ;;  %v1380_v28 = vld [vmem:[#allocation2 + $0x18] sm:$0xff]  ;;  %v1381_v36 = vld [vmem:[#allocation2 + $0x20] sm:$0xff] }
 0x693   :  { %6711 = vmatpush3.bf16.msk.msra.mxu1 %vm7836_vm3, %v7599_v59  ;;  %v6643_v34 = vpack.c.bf16 %v1380_v28, %v1379_v31  ;;  %v1382_v37 = vld [vmem:[#allocation2 + $0x28] sm:$0xff]  ;;  %v1383_v40 = vld [vmem:[#allocation2 + $0x30] sm:$0xff]  ;;  %v1384_v41 = vld [vmem:[#allocation2 + $0x38] sm:$0xff] }
 0x694   :  { %6712 = vmatprep.subr.bf16.mxu1 %v7598_v58  ;;  %6614 = vmatpush3.bf16.msra.mxu0 %v6611_v4  ;;  %v6647_v38 = vpack.c.bf16 %v1382_v37, %v1381_v36  ;;  %v6651_v42 = vpack.c.bf16 %v1384_v41, %v1383_v40  ;;  %v1385_v43 = vld [vmem:[#allocation2 + $0x40] sm:$0xff]  ;;  %v1386_v51 = vld [vmem:[#allocation2 + $0x48] sm:$0xff]  ;;  %v1387_v52 = vld [vmem:[#allocation2 + $0x50] sm:$0xff] }
 0x695   :  { %6616 = vmatprep.subr.bf16.mxu0 %v6615_v7  ;;  %v6655_v49 = vpack.c.bf16 %v1386_v51, %v1385_v43  ;;  %v1388_v50 = vld [vmem:[#allocation2 + $0x58] sm:$0xff]  ;;  %v1389_v0 = vld [vmem:[#allocation2 + $0x60] sm:$0xff]  ;;  %v1390_v4 = vld [vmem:[#allocation2 + $0x68] sm:$0xff] }
 0x696   :  { %v6659_v63 = vpack.c.bf16 %v1388_v50, %v1387_v52  ;;  %v6663_v5 = vpack.c.bf16 %v1390_v4, %v1389_v0  ;;  %v1391_v6 = vld [vmem:[#allocation2 + $0x70] sm:$0xff]  ;;  %v1409_v11 = vld [vmem:[#allocation2 + $0x100] sm:$0xff]  ;;  %v1412_v18 = vld [vmem:[#allocation2 + $0x118] sm:$0xff] }
 0x697   :  { %6714 = vmatpush3.bf16.msk.msra.mxu1 %vm7865_vm6, %v7599_v59  ;;  %v1411_v17 = vld [vmem:[#allocation2 + $0x110] sm:$0xff]  ;;  %v1414_v23 = vld [vmem:[#allocation2 + $0x128] sm:$0xff]  ;;  %v1416_v27 = vld [vmem:[#allocation2 + $0x138] sm:$0xff] }
 0x698   :  { %6715 = vmatprep.subr.bf16.mxu1 %v7598_v58  ;;  %6618 = vmatpush3.bf16.msra.mxu0 %v6615_v7  ;;  %v1392_v7 = vld [vmem:[#allocation2 + $0x78] sm:$0xff]  ;;  %v6675_v20 = vpack.c.bf16 %v1412_v18, %v1411_v17  ;;  %v1418_v30 = vld [vmem:[#allocation2 + $0x148] sm:$0xff]  ;;  %v1423_v37 = vld [vmem:[#allocation2 + $0x170] sm:$0xff] }
 0x699   :  { %6620 = vmatprep.subr.bf16.mxu0 %v6619_v12  ;;  %v6667_v10 = vpack.c.bf16 %v1392_v7, %v1391_v6  ;;  %v1420_v31 = vld [vmem:[#allocation2 + $0x158] sm:$0xff] }
 0x69b   :  { %6717 = vmatpush3.bf16.msk.msra.mxu1 %vm7877_vm7, %v7599_v59 }
 0x69c   :  { %6718 = vmatprep.subr.bf16.mxu1 %v7598_v58  ;;  %6622 = vmatpush3.bf16.msra.mxu0 %v6619_v12  ;;  %v1410_v12 = vld [vmem:[#allocation2 + $0x108] sm:$0xff] }
 0x69d   :  { %6624 = vmatprep.subr.bf16.mxu0 %v6623_v15  ;;  %v6671_v13 = vpack.c.bf16 %v1410_v12, %v1409_v11 }
 0x69f   :  { %6720 = vmatpush3.bf16.msk.msra.mxu1 %vm7889_vm9, %v7599_v59 }
 0x6a0   :  { %6721 = vmatprep.subr.bf16.mxu1 %v7598_v58  ;;  %6626 = vmatpush3.bf16.msra.mxu0 %v6623_v15  ;;  %v1372_v15 = vrot.slane %v8046_v48, 1 }
 0x6a1   :  { %6628 = vmatprep.subr.bf16.mxu0 %v6627_v19 }
 0x6a2   :  { %v1373_v21 = vsel %vm340_vm5, %v1371_v14, %v1372_v15  ;;  %v1374_v41 = vsel %vm340_vm5, %v1372_v15, %v1371_v14 }
 0x6a3   :  { %6723 = vmatpush3.bf16.msk.msra.mxu1 %vm7901_vm10, %v7599_v59 }
 0x6a4   :  { %6724 = vmatprep.subr.bf16.mxu1 %v7598_v58  ;;  %6630 = vmatpush3.bf16.msra.mxu0 %v6627_v19  ;;  %v1367_v19 = vsel %vm333_vm4, %v1365_v25, %v1366_v62  ;;  %v1419_v62 = vld [vmem:[#allocation2 + $0x150] sm:$0xff] }
 0x6a5   :  { %6632 = vmatprep.subr.bf16.mxu0 %v6631_v22  ;;  %v6691_v28 = vpack.c.bf16 %v1420_v31, %v1419_v62  ;;  %v4518_v31 = vld [vmem:[%s8593_s3 + $0x2] sm:$0x1] }
 0x6a7   :  { %6726 = vmatpush3.bf16.msk.msra.mxu1 %vm7913_vm12, %v7599_v59 }
 0x6a8   :  { %5637 = vmatprep.subr.mxu1 %v7596_v8  ;;  %6634 = vmatpush3.bf16.msra.mxu0 %v6631_v22  ;;  %v1413_v22 = vld [vmem:[#allocation2 + $0x120] sm:$0xff] }
 0x6a9   :  { %6636 = vmatprep.subr.bf16.mxu0 %v6635_v54  ;;  %v6679_v24 = vpack.c.bf16 %v1414_v23, %v1413_v22 }
 0x6ac   :  { %6638 = vmatpush3.bf16.msra.mxu0 %v6635_v54  ;;  %v1415_v54 = vld [vmem:[#allocation2 + $0x130] sm:$0xff] }
 0x6ad   :  { %6640 = vmatprep.subr.bf16.mxu0 %v6639_v33  ;;  %v6683_v32 = vpack.c.bf16 %v1416_v27, %v1415_v54 }
 0x6af   :  { %5530 = vmatmul.mubr.f32.vlgmr.msra.gmra.mrb[6].mxu0 %v8046_v48 }
 0x6b0   :  { %6642 = vmatpush3.bf16.msra.mxu0 %v6639_v33  ;;  %5564 = vmatprep.mubr.f32.mxu0 %v1369_v29  ;;  %v1417_v33 = vld [vmem:[#allocation2 + $0x140] sm:$0xff] }
 0x6b1   :  { %6644 = vmatprep.subr.bf16.mxu0 %v6643_v34  ;;  %v6687_v25 = vpack.c.bf16 %v1418_v30, %v1417_v33  ;;  %v1421_v29 = vld [vmem:[#allocation2 + $0x160] sm:$0xff] }
 0x6b2   :  { %v4517_v30 = vld [vmem:[%s8592_s2 + $0x2] sm:$0x1] }
 0x6b4   :  { %6646 = vmatpush3.bf16.msra.mxu0 %v6643_v34  ;;  %v1422_v34 = vld [vmem:[#allocation2 + $0x168] sm:$0xff] }
 0x6b5   :  { %6648 = vmatprep.subr.bf16.mxu0 %v6647_v38  ;;  %v6695_v36 = vpack.c.bf16 %v1422_v34, %v1421_v29 }
 0x6b8   :  { %6650 = vmatpush3.bf16.msra.mxu0 %v6647_v38  ;;  %v1424_v38 = vld [vmem:[#allocation2 + $0x178] sm:$0xff] }
 0x6b9   :  { %6652 = vmatprep.subr.bf16.mxu0 %v6651_v42  ;;  %v6699_v40 = vpack.c.bf16 %v1424_v38, %v1423_v37 }
 0x6bc   :  { %6654 = vmatpush3.bf16.msra.mxu0 %v6651_v42  ;;  %v1376_v42 = vmul.f32 %v7697_v16, %v1374_v41 }
 0x6bd   :  { %6656 = vmatprep.subr.bf16.mxu0 %v6655_v49 }
 0x6c0   :  { %6658 = vmatpush3.bf16.msra.mxu0 %v6655_v49 }
 0x6c1   :  { %6660 = vmatprep.subr.bf16.mxu0 %v6659_v63 }
 0x6c4   :  { %6662 = vmatpush3.bf16.msra.mxu0 %v6659_v63 }
 0x6c5   :  { %6664 = vmatprep.subr.bf16.mxu0 %v6663_v5 }
 0x6c8   :  { %6666 = vmatpush3.bf16.msra.mxu0 %v6663_v5 }
 0x6c9   :  { %6668 = vmatprep.subr.bf16.mxu0 %v6667_v10 }
 0x6cc   :  { %6670 = vmatpush3.bf16.msra.mxu0 %v6667_v10 }
 0x6cd   :  { %6672 = vmatprep.subr.bf16.mxu0 %v6671_v13 }
 0x6cf   :  { %5565 = vmatmul.mubr.f32.vlgmr.msra.gmra.mrb[6].mxu0 %v1367_v19 }
 0x6d0   :  { %6674 = vmatpush3.bf16.msra.mxu0 %v6671_v13  ;;  %5599 = vmatprep.mubr.f32.mxu0 %v1373_v21 }
 0x6d1   :  { %6676 = vmatprep.subr.bf16.mxu0 %v6675_v20 }
 0x6d4   :  { %6678 = vmatpush3.bf16.msra.mxu0 %v6675_v20 }
 0x6d5   :  { %6680 = vmatprep.subr.bf16.mxu0 %v6679_v24 }
 0x6d8   :  { %6682 = vmatpush3.bf16.msra.mxu0 %v6679_v24 }
 0x6d9   :  { %6684 = vmatprep.subr.bf16.mxu0 %v6683_v32 }
 0x6dc   :  { %6686 = vmatpush3.bf16.msra.mxu0 %v6683_v32 }
 0x6dd   :  { %6688 = vmatprep.subr.bf16.mxu0 %v6687_v25 }
 0x6e0   :  { %6690 = vmatpush3.bf16.msra.mxu0 %v6687_v25 }
 0x6e1   :  { %6692 = vmatprep.subr.bf16.mxu0 %v6691_v28 }
 0x6e4   :  { %6694 = vmatpush3.bf16.msra.mxu0 %v6691_v28 }
 0x6e5   :  { %6696 = vmatprep.subr.bf16.mxu0 %v6695_v36 }
 0x6e8   :  { %6698 = vmatpush3.bf16.msra.mxu0 %v6695_v36 }
 0x6e9   :  { %6700 = vmatprep.subr.bf16.mxu0 %v6699_v40 }
 0x6ec   :  { %6702 = vmatpush3.bf16.msra.mxu0 %v6699_v40 }
 0x6ef   :  { %5600 = vmatmul.mubr.f32.vlgmr.msra.gmra.mrb[6].mxu0 %v1376_v42 }
 0x7c2   :  { %v5601_v43 = vpop.f32.mrb[6].mxu0 }
 0x7c3   :  { %v1660_v51 = vmul.f32 %v5601_v43, %v5601_v43  ;;  %v1641_v49 = vpop.f32.mrb[7].mxu0 }
 0x7c4   :  { %v1652_v52 = vadd.f32 %v5601_v43, %v1641_v49  ;;  %v1659_v50 = vmul.f32 %v1641_v49, %v1641_v49 }
 0x7c6   :  { %v1653_v63 = vrot.slane %v1652_v52, 4  ;;  %v1661_v0 = vadd.f32 %v1660_v51, %v1659_v50 }
 0x7c8   :  { %v1654_v4 = vadd.f32 %v1653_v63, %v1652_v52  ;;  %v1662_v5 = vrot.slane %v1661_v0, 4 }
 0x7ca   :  { %v1655_v6 = vrot.slane %v1654_v4, 2  ;;  %v1663_v7 = vadd.f32 %v1662_v5, %v1661_v0 }
 0x7cc   :  { %v1656_v10 = vadd.f32 %v1655_v6, %v1654_v4  ;;  %v1664_v11 = vrot.slane %v1663_v7, 2 }
 0x7ce   :  { %v1657_v12 = vrot.slane %v1656_v10, 1  ;;  %v1665_v13 = vadd.f32 %v1664_v11, %v1663_v7 }
 0x7d0   :  { %v1666_v14 = vrot.slane %v1665_v13, 1  ;;  %v1658_v15 = vadd.f32 %v1657_v12, %v1656_v10 }
 0x7d2   :  { %v1667_v17 = vadd.f32 %v1666_v14, %v1665_v13 }
 0x7d4   :  { %v1668_v18 = vsel %vm636_vm14, %v1658_v15, %v1667_v17 }
 0x7d5   :  { %5635 = vmatmul.mubr.f32.vlgmr.msra.gmra.mrb[6].mxu1 %v1668_v18 }
 0x7d6   :  { %5638 = vmatpush3.msk.msra.mxu1 %vm749_vm15, %v7772_v56  ;;  %5639 = vmatprep.mubr.msk.f32.mxu1 %vm7600_vm13, %v7596_v8 }
 0x8a8   :  { %v1735_v19 = vpop.f32.mrb[6].mxu1 }
 0x8a9   :  { %v1739_v20 = vmul.f32 0.001953125, %v1735_v19  ;;  %v5636_v21 = vpop.f32.mrb[7].mxu1 }
 0x8ab   :  { %v1740_v22 = vmul.f32 %v1739_v20, %v1739_v20 }
 0x8ad   :  { %v1742_v23 = vrot.slane %v1740_v22, 7 }
 0x8af   :  { %v1744_v24 = vsub.f32 %v1739_v20, %v1742_v23 }
 0x8b1   :  { %v1745_v54 = vadd.f32 1e-05, %v1744_v24 }
 0x8b3   :  { %7370 = vrsqrt.f32 %v1745_v54 }
 0x8bd   :  { %v7371_v27 = vpop.eup %7370 }
 0x8be   :  { %v1756_v32 = vrot.slane %v7371_v27, %v7929_v26 }
 0x8c0   :  { %v1757_v33 = vcombine.high %v1756_v32, %v1756_v32 }
 0x8c2   :  { %v1764_v25 = vrot.slane %v1757_v33, %v7929_v26 }
 0x8c4   :  { %v1766_v62 = vmul.f32 %v4517_v30, %v1764_v25 }
 0x8c6   :  { %v1769_v28 = vmul.f32 %v1766_v62, %v1739_v20 }
 0x8c8   :  { %v1770_v29 = vsub.f32 %v4518_v31, %v1769_v28 }
 0x8ca   :  { %v1775_v34 = vrot.slane %v1770_v29, %v7940_v35 }
 0x8cc   :  { %v1777_v36 = vsel %vm636_vm14, %v1766_v62, %v1775_v34 }
 0x8cd   :  { %5640 = vmatmul.mubr.msk.f32.vlgmr.msra.gmra.mrb[8].mxu1 %vm745_vm0, %v1777_v36 }
 0x9a0   :  { %v1847_v37 = vpop.f32.mrb[8].mxu1 }
 0x9a1   :  { %v1854_v38 = vrot.slane %v1847_v37, %v7940_v35  ;;  %v5641_v40 = vpop.f32.mrb[9].mxu1  ;;  %v1860_v51 = vrot.slane %v1847_v37, %v7946_v39 }
 0x9a3   :  { %v1855_v41 = vmul.f32 %v1854_v38, %v1641_v49  ;;  %v1856_v42 = vmul.f32 %v5601_v43, %v1854_v38 }
 0x9a5   :  { %v1861_v52 = vadd.f32 %v1860_v51, %v1855_v41  ;;  %v1862_v50 = vadd.f32 %v1860_v51, %v1856_v42 }
 0x9a7   :  { %v8136_v63 = vmax.f32 %v1861_v52, 0.0  ;;  %v8138_v0 = vmax.f32 %v1862_v50, 0.0 }
 0x9a8   :  { %7585 = dma.done.wait [#allocation3 + $0x1], 6144 }
 0x9a9   :  { %7586 = vsyncadd [#allocation3 + $0x1], 4294961152  ;;  %5674 = vmatprep.mubr.f32.mxu1 %v8136_v63  ;;  %6823 = vmatprep.subr.bf16.mxu0 %v7598_v58  ;;  %s8145_s23 = scalar_lea.hbm %s8591_s1, 30720  ;;  %p7482_p11 = scmp.lt.u32.totalorder %s8053_s11, %s8591_s1 }
 0x9aa   :  { %p7480_p10 = scmp.ne.s32.totalorder %s8053_s11, %s8145_s23  ;;  %p7483_p12 = scmp.lt.u32.totalorder %s7653_s27, %s8145_s23 }
 0x9ab   :  { %p7485_p0 = scmp.lt.u32.totalorder %s8145_s23, %s8053_s11 }
 0x9ac   :  { %p7484_p13 = por %p7483_p12, %p7482_p11 }
 0x9ae   :  { %p7486_p1 = por %p7485_p0, %p7484_p13 }
 0x9b0   :  { %p7487_p3 = pnand %p7486_p1, %p7480_p10 }
 0x9b2   :  { %7490 = shalt.err (!%p7487_p3)  }
 0x9b3   :  { %7502 = shalt.err (!%p7673_p9)  }
 0x9b4   :  { %1878 = dma.hbm_to_vmem [thread:$0]  %s8053_s11, 6144, %s7637_s16, [#allocation3]  ;;  %6825 = vmatpush3.bf16.msk.msra.mxu0 %vm7779_vm1, %v7599_v59  ;;  %5779 = vmatprep.mubr.msk.f32.mxu0 %vm7600_vm13, %v7596_v8  ;;  %v1879_v30 = vrot.slane %v8136_v63, 7  ;;  %v1880_v25 = vrot.slane %v8138_v0, 7 }
 0x9b5   :  { %6826 = vmatprep.subr.bf16.mxu0 %v7598_v58  ;;  %v1907_v43 = vld [vmem:[#allocation2 + $0x200] sm:$0xff]  ;;  %v1908_v49 = vld [vmem:[#allocation2 + $0x208] sm:$0xff]  ;;  %v1909_v4 = vld [vmem:[#allocation2 + $0x210] sm:$0xff] }
 0x9b6   :  { %v6727_v5 = vpack.c.bf16 %v1908_v49, %v1907_v43  ;;  %v1910_v6 = vld [vmem:[#allocation2 + $0x218] sm:$0xff]  ;;  %v1911_v10 = vld [vmem:[#allocation2 + $0x220] sm:$0xff]  ;;  %v1912_v11 = vld [vmem:[#allocation2 + $0x228] sm:$0xff]  ;;  %v1882_v29 = vsel %vm333_vm4, %v1880_v25, %v1879_v30 }
 0x9b7   :  { %v6731_v7 = vpack.c.bf16 %v1910_v6, %v1909_v4  ;;  %v6735_v12 = vpack.c.bf16 %v1912_v11, %v1911_v10  ;;  %v1913_v13 = vld [vmem:[#allocation2 + $0x230] sm:$0xff]  ;;  %v1914_v14 = vld [vmem:[#allocation2 + $0x238] sm:$0xff]  ;;  %v1915_v17 = vld [vmem:[#allocation2 + $0x240] sm:$0xff]  ;;  %v1883_v37 = vmul.f32 %v7688_v9, %v1882_v29 }
 0x9b8   :  { %6828 = vmatpush3.bf16.msk.msra.mxu0 %vm7824_vm2, %v7599_v59  ;;  %6728 = vmatprep.subr.bf16.mxu1 %v6727_v5  ;;  %v6739_v15 = vpack.c.bf16 %v1914_v14, %v1913_v13  ;;  %v1916_v18 = vld [vmem:[#allocation2 + $0x248] sm:$0xff]  ;;  %v1917_v20 = vld [vmem:[#allocation2 + $0x250] sm:$0xff]  ;;  %v1918_v21 = vld [vmem:[#allocation2 + $0x258] sm:$0xff] }
 0x9b9   :  { %6829 = vmatprep.subr.bf16.mxu0 %v7598_v58  ;;  %6730 = vmatpush3.bf16.msra.mxu1 %v6727_v5  ;;  %v6743_v19 = vpack.c.bf16 %v1916_v18, %v1915_v17  ;;  %v6747_v22 = vpack.c.bf16 %v1918_v21, %v1917_v20  ;;  %v1919_v23 = vld [vmem:[#allocation2 + $0x260] sm:$0xff]  ;;  %v1920_v24 = vld [vmem:[#allocation2 + $0x268] sm:$0xff]  ;;  %v1921_v27 = vld [vmem:[#allocation2 + $0x270] sm:$0xff]  ;;  %v1885_v20 = vrot.slane %v8136_v63, 1  ;;  %v1886_v21 = vrot.slane %v8138_v0, 1 }
 0x9ba   :  { %6732 = vmatprep.subr.bf16.mxu1 %v6731_v7  ;;  %v6751_v54 = vpack.c.bf16 %v1920_v24, %v1919_v23  ;;  %v1922_v32 = vld [vmem:[#allocation2 + $0x278] sm:$0xff]  ;;  %v1891_v62 = vld [vmem:[#allocation2 + $0x180] sm:$0xff]  ;;  %v1892_v31 = vld [vmem:[#allocation2 + $0x188] sm:$0xff]  ;;  %v1881_v24 = vsel %vm333_vm4, %v1879_v30, %v1880_v25 }
 0x9bb   :  { %v6755_v33 = vpack.c.bf16 %v1922_v32, %v1921_v27  ;;  %v6759_v28 = vpack.c.bf16 %v1892_v31, %v1891_v62  ;;  %v1893_v34 = vld [vmem:[#allocation2 + $0x190] sm:$0xff]  ;;  %v1894_v36 = vld [vmem:[#allocation2 + $0x198] sm:$0xff]  ;;  %v1895_v40 = vld [vmem:[#allocation2 + $0x1a0] sm:$0xff]  ;;  %v1887_v27 = vsel %vm340_vm5, %v1885_v20, %v1886_v21 }
 0x9bc   :  { %6831 = vmatpush3.bf16.msk.msra.mxu0 %vm7836_vm3, %v7599_v59  ;;  %v6763_v38 = vpack.c.bf16 %v1894_v36, %v1893_v34  ;;  %v1896_v41 = vld [vmem:[#allocation2 + $0x1a8] sm:$0xff]  ;;  %v1897_v51 = vld [vmem:[#allocation2 + $0x1b0] sm:$0xff]  ;;  %v1898_v52 = vld [vmem:[#allocation2 + $0x1b8] sm:$0xff] }
 0x9bd   :  { %6832 = vmatprep.subr.bf16.mxu0 %v7598_v58  ;;  %6734 = vmatpush3.bf16.msra.mxu1 %v6731_v7  ;;  %v6767_v42 = vpack.c.bf16 %v1896_v41, %v1895_v40  ;;  %v6771_v50 = vpack.c.bf16 %v1898_v52, %v1897_v51  ;;  %v1899_v43 = vld [vmem:[#allocation2 + $0x1c0] sm:$0xff]  ;;  %v1900_v49 = vld [vmem:[#allocation2 + $0x1c8] sm:$0xff]  ;;  %v1901_v5 = vld [vmem:[#allocation2 + $0x1d0] sm:$0xff]  ;;  %v1888_v52 = vsel %vm340_vm5, %v1886_v21, %v1885_v20 }
 0x9be   :  { %6736 = vmatprep.subr.bf16.mxu1 %v6735_v12  ;;  %v6775_v4 = vpack.c.bf16 %v1900_v49, %v1899_v43  ;;  %v1902_v6 = vld [vmem:[#allocation2 + $0x1d8] sm:$0xff]  ;;  %v1903_v10 = vld [vmem:[#allocation2 + $0x1e0] sm:$0xff]  ;;  %v1904_v11 = vld [vmem:[#allocation2 + $0x1e8] sm:$0xff] }
 0x9bf   :  { %v6779_v7 = vpack.c.bf16 %v1902_v6, %v1901_v5  ;;  %v1905_v13 = vld [vmem:[#allocation2 + $0x1f0] sm:$0xff]  ;;  %v1906_v14 = vld [vmem:[#allocation2 + $0x1f8] sm:$0xff]  ;;  %v1923_v17 = vld [vmem:[#allocation2 + $0x280] sm:$0xff] }
 0x9c0   :  { %6834 = vmatpush3.bf16.msk.msra.mxu0 %vm7865_vm6, %v7599_v59  ;;  %v1924_v18 = vld [vmem:[#allocation2 + $0x288] sm:$0xff]  ;;  %v1926_v23 = vld [vmem:[#allocation2 + $0x298] sm:$0xff]  ;;  %v1927_v32 = vld [vmem:[#allocation2 + $0x2a0] sm:$0xff] }
 0x9c1   :  { %6835 = vmatprep.subr.bf16.mxu0 %v7598_v58  ;;  %6738 = vmatpush3.bf16.msra.mxu1 %v6735_v12  ;;  %v6783_v12 = vpack.c.bf16 %v1904_v11, %v1903_v10  ;;  %v1929_v62 = vld [vmem:[#allocation2 + $0x2b0] sm:$0xff]  ;;  %v1932_v29 = vld [vmem:[#allocation2 + $0x2c8] sm:$0xff]  ;;  %v1934_v34 = vld [vmem:[#allocation2 + $0x2d8] sm:$0xff] }
 0x9c2   :  { %6740 = vmatprep.subr.bf16.mxu1 %v6739_v15  ;;  %v1933_v25 = vld [vmem:[#allocation2 + $0x2d0] sm:$0xff] }
 0x9c3   :  { %v6811_v36 = vpack.c.bf16 %v1934_v34, %v1933_v25  ;;  %v1937_v41 = vld [vmem:[#allocation2 + $0x2f0] sm:$0xff]  ;;  %v4538_v34 = vld [vmem:[%s8593_s3 + $0x3] sm:$0x1] }
 0x9c4   :  { %6837 = vmatpush3.bf16.msk.msra.mxu0 %vm7877_vm7, %v7599_v59 }
 0x9c5   :  { %6838 = vmatprep.subr.bf16.mxu0 %v7598_v58  ;;  %6742 = vmatpush3.bf16.msra.mxu1 %v6739_v15  ;;  %v6787_v15 = vpack.c.bf16 %v1906_v14, %v1905_v13 }
 0x9c6   :  { %6744 = vmatprep.subr.bf16.mxu1 %v6743_v19 }
 0x9c8   :  { %6840 = vmatpush3.bf16.msk.msra.mxu0 %vm7889_vm9, %v7599_v59 }
 0x9c9   :  { %6841 = vmatprep.subr.bf16.mxu0 %v7598_v58  ;;  %6746 = vmatpush3.bf16.msra.mxu1 %v6743_v19  ;;  %v6791_v19 = vpack.c.bf16 %v1924_v18, %v1923_v17 }
 0x9ca   :  { %6748 = vmatprep.subr.bf16.mxu1 %v6747_v22 }
 0x9cc   :  { %6843 = vmatpush3.bf16.msk.msra.mxu0 %vm7901_vm10, %v7599_v59 }
 0x9cd   :  { %6844 = vmatprep.subr.bf16.mxu0 %v7598_v58  ;;  %6750 = vmatpush3.bf16.msra.mxu1 %v6747_v22  ;;  %v1925_v22 = vld [vmem:[#allocation2 + $0x290] sm:$0xff] }
 0x9ce   :  { %6752 = vmatprep.subr.bf16.mxu1 %v6751_v54 }
 0x9d0   :  { %6846 = vmatpush3.bf16.msk.msra.mxu0 %vm7913_vm12, %v7599_v59 }
 0x9d1   :  { %5782 = vmatprep.subr.mxu0 %v7596_v8  ;;  %6754 = vmatpush3.bf16.msra.mxu1 %v6751_v54  ;;  %v6795_v54 = vpack.c.bf16 %v1926_v23, %v1925_v22 }
 0x9d2   :  { %6756 = vmatprep.subr.bf16.mxu1 %v6755_v33 }
 0x9d5   :  { %6758 = vmatpush3.bf16.msra.mxu1 %v6755_v33  ;;  %v1928_v33 = vld [vmem:[#allocation2 + $0x2a8] sm:$0xff] }
 0x9d6   :  { %6760 = vmatprep.subr.bf16.mxu1 %v6759_v28  ;;  %v6799_v63 = vpack.c.bf16 %v1928_v33, %v1927_v32 }
 0x9d8   :  { %5675 = vmatmul.mubr.f32.vlgmr.msra.gmra.mrb[10].mxu1 %v8138_v0  ;;  %v1930_v0 = vld [vmem:[#allocation2 + $0x2b8] sm:$0xff] }
 0x9d9   :  { %6762 = vmatpush3.bf16.msra.mxu1 %v6759_v28  ;;  %5709 = vmatprep.mubr.f32.mxu1 %v1883_v37  ;;  %v6803_v31 = vpack.c.bf16 %v1930_v0, %v1929_v62  ;;  %v1931_v28 = vld [vmem:[#allocation2 + $0x2c0] sm:$0xff] }
 0x9da   :  { %6764 = vmatprep.subr.bf16.mxu1 %v6763_v38  ;;  %v6807_v30 = vpack.c.bf16 %v1932_v29, %v1931_v28  ;;  %v1935_v37 = vld [vmem:[#allocation2 + $0x2e0] sm:$0xff] }
 0x9db   :  { %v4537_v29 = vld [vmem:[%s8592_s2 + $0x3] sm:$0x1] }
 0x9dd   :  { %6766 = vmatpush3.bf16.msra.mxu1 %v6763_v38  ;;  %v1936_v38 = vld [vmem:[#allocation2 + $0x2e8] sm:$0xff] }
 0x9de   :  { %6768 = vmatprep.subr.bf16.mxu1 %v6767_v42  ;;  %v6815_v40 = vpack.c.bf16 %v1936_v38, %v1935_v37 }
 0x9e1   :  { %6770 = vmatpush3.bf16.msra.mxu1 %v6767_v42  ;;  %v1938_v42 = vld [vmem:[#allocation2 + $0x2f8] sm:$0xff] }
 0x9e2   :  { %6772 = vmatprep.subr.bf16.mxu1 %v6771_v50  ;;  %v6819_v51 = vpack.c.bf16 %v1938_v42, %v1937_v41 }
 0x9e5   :  { %6774 = vmatpush3.bf16.msra.mxu1 %v6771_v50  ;;  %v1890_v50 = vmul.f32 %v7697_v16, %v1888_v52 }
 0x9e6   :  { %6776 = vmatprep.subr.bf16.mxu1 %v6775_v4 }
 0x9e9   :  { %6778 = vmatpush3.bf16.msra.mxu1 %v6775_v4 }
 0x9ea   :  { %6780 = vmatprep.subr.bf16.mxu1 %v6779_v7 }
 0x9ed   :  { %6782 = vmatpush3.bf16.msra.mxu1 %v6779_v7 }
 0x9ee   :  { %6784 = vmatprep.subr.bf16.mxu1 %v6783_v12 }
 0x9f1   :  { %6786 = vmatpush3.bf16.msra.mxu1 %v6783_v12 }
 0x9f2   :  { %6788 = vmatprep.subr.bf16.mxu1 %v6787_v15 }
 0x9f5   :  { %6790 = vmatpush3.bf16.msra.mxu1 %v6787_v15 }
 0x9f6   :  { %6792 = vmatprep.subr.bf16.mxu1 %v6791_v19 }
 0x9f8   :  { %5710 = vmatmul.mubr.f32.vlgmr.msra.gmra.mrb[10].mxu1 %v1881_v24 }
 0x9f9   :  { %6794 = vmatpush3.bf16.msra.mxu1 %v6791_v19  ;;  %5744 = vmatprep.mubr.f32.mxu1 %v1887_v27 }
 0x9fa   :  { %6796 = vmatprep.subr.bf16.mxu1 %v6795_v54 }
 0x9fd   :  { %6798 = vmatpush3.bf16.msra.mxu1 %v6795_v54 }
 0x9fe   :  { %6800 = vmatprep.subr.bf16.mxu1 %v6799_v63 }
 0xa01   :  { %6802 = vmatpush3.bf16.msra.mxu1 %v6799_v63 }
 0xa02   :  { %6804 = vmatprep.subr.bf16.mxu1 %v6803_v31 }
 0xa05   :  { %6806 = vmatpush3.bf16.msra.mxu1 %v6803_v31 }
 0xa06   :  { %6808 = vmatprep.subr.bf16.mxu1 %v6807_v30 }
 0xa09   :  { %6810 = vmatpush3.bf16.msra.mxu1 %v6807_v30 }
 0xa0a   :  { %6812 = vmatprep.subr.bf16.mxu1 %v6811_v36 }
 0xa0d   :  { %6814 = vmatpush3.bf16.msra.mxu1 %v6811_v36 }
 0xa0e   :  { %6816 = vmatprep.subr.bf16.mxu1 %v6815_v40 }
 0xa11   :  { %6818 = vmatpush3.bf16.msra.mxu1 %v6815_v40 }
 0xa12   :  { %6820 = vmatprep.subr.bf16.mxu1 %v6819_v51 }
 0xa15   :  { %6822 = vmatpush3.bf16.msra.mxu1 %v6819_v51 }
 0xa18   :  { %5745 = vmatmul.mubr.f32.vlgmr.msra.gmra.mrb[10].mxu1 %v1890_v50 }
 0xaeb   :  { %v5746_v43 = vpop.f32.mrb[10].mxu1 }
 0xaec   :  { %v2174_v49 = vmul.f32 %v5746_v43, %v5746_v43  ;;  %v2155_v4 = vpop.f32.mrb[11].mxu1 }
 0xaed   :  { %v2166_v5 = vadd.f32 %v5746_v43, %v2155_v4  ;;  %v2173_v6 = vmul.f32 %v2155_v4, %v2155_v4 }
 0xaef   :  { %v2167_v7 = vrot.slane %v2166_v5, 4  ;;  %v2175_v10 = vadd.f32 %v2174_v49, %v2173_v6 }
 0xaf1   :  { %v2168_v11 = vadd.f32 %v2167_v7, %v2166_v5  ;;  %v2176_v12 = vrot.slane %v2175_v10, 4 }
 0xaf3   :  { %v2169_v13 = vrot.slane %v2168_v11, 2  ;;  %v2177_v14 = vadd.f32 %v2176_v12, %v2175_v10 }
 0xaf5   :  { %v2170_v15 = vadd.f32 %v2169_v13, %v2168_v11  ;;  %v2178_v17 = vrot.slane %v2177_v14, 2 }
 0xaf7   :  { %v2171_v18 = vrot.slane %v2170_v15, 1  ;;  %v2179_v19 = vadd.f32 %v2178_v17, %v2177_v14 }
 0xaf9   :  { %v2180_v20 = vrot.slane %v2179_v19, 1  ;;  %v2172_v21 = vadd.f32 %v2171_v18, %v2170_v15 }
 0xafb   :  { %v2181_v22 = vadd.f32 %v2180_v20, %v2179_v19 }
 0xafd   :  { %v2182_v23 = vsel %vm636_vm14, %v2172_v21, %v2181_v22 }
 0xafe   :  { %5780 = vmatmul.mubr.f32.vlgmr.msra.gmra.mrb[8].mxu0 %v2182_v23 }
 0xaff   :  { %5783 = vmatpush3.msk.msra.mxu0 %vm749_vm15, %v7772_v56  ;;  %5784 = vmatprep.mubr.msk.f32.mxu0 %vm7600_vm13, %v7596_v8 }
 0xbd1   :  { %v2249_v24 = vpop.f32.mrb[8].mxu0 }
 0xbd2   :  { %v2253_v54 = vmul.f32 0.001953125, %v2249_v24  ;;  %v5781_v27 = vpop.f32.mrb[9].mxu0 }
 0xbd4   :  { %v2254_v32 = vmul.f32 %v2253_v54, %v2253_v54 }
 0xbd6   :  { %v2256_v33 = vrot.slane %v2254_v32, 7 }
 0xbd8   :  { %v2258_v63 = vsub.f32 %v2253_v54, %v2256_v33 }
 0xbda   :  { %v2259_v62 = vadd.f32 1e-05, %v2258_v63 }
 0xbdc   :  { %7372 = vrsqrt.f32 %v2259_v62 }
 0xbe6   :  { %v7373_v0 = vpop.eup %7372 }
 0xbe7   :  { %v2270_v31 = vrot.slane %v7373_v0, %v7929_v26 }
 0xbe9   :  { %v2271_v28 = vcombine.high %v2270_v31, %v2270_v31 }
 0xbeb   :  { %v2278_v30 = vrot.slane %v2271_v28, %v7929_v26 }
 0xbed   :  { %v2280_v25 = vmul.f32 %v4537_v29, %v2278_v30 }
 0xbef   :  { %v2283_v36 = vmul.f32 %v2280_v25, %v2253_v54 }
 0xbf1   :  { %v2284_v37 = vsub.f32 %v4538_v34, %v2283_v36 }
 0xbf3   :  { %v2289_v38 = vrot.slane %v2284_v37, %v7940_v35 }
 0xbf5   :  { %v2291_v40 = vsel %vm636_vm14, %v2280_v25, %v2289_v38 }
 0xbf6   :  { %5785 = vmatmul.mubr.msk.f32.vlgmr.msra.gmra.mrb[10].mxu0 %vm745_vm0, %v2291_v40 }
 0xcc9   :  { %v2361_v41 = vpop.f32.mrb[10].mxu0 }
 0xcca   :  { %v2368_v42 = vrot.slane %v2361_v41, %v7940_v35  ;;  %v5786_v51 = vpop.f32.mrb[11].mxu0  ;;  %v2374_v49 = vrot.slane %v2361_v41, %v7946_v39 }
 0xccc   :  { %v2369_v52 = vmul.f32 %v2368_v42, %v2155_v4  ;;  %v2370_v50 = vmul.f32 %v5746_v43, %v2368_v42 }
 0xcce   :  { %v2375_v5 = vadd.f32 %v2374_v49, %v2369_v52  ;;  %v2376_v6 = vadd.f32 %v2374_v49, %v2370_v50 }
 0xcd0   :  { %v8229_v7 = vadd.f32 %v2375_v5, %v8043_v53  ;;  %v8232_v10 = vadd.f32 %v2376_v6, %v8046_v48 }
 0xcd1   :  { %7587 = dma.done.wait [#allocation3], 6144 }
 0xcd2   :  { %7588 = vsyncadd [#allocation3], 4294961152  ;;  %5819 = vmatprep.mubr.f32.mxu0 %v8229_v7  ;;  %6943 = vmatprep.subr.bf16.mxu1 %v7598_v58  ;;  %s8239_s6 = scalar_lea.hbm %s8591_s1, 36864  ;;  %p7507_p5 = scmp.lt.u32.totalorder %s8145_s23, %s8591_s1 }
 0xcd3   :  { %p7505_p4 = scmp.ne.s32.totalorder %s8145_s23, %s8239_s6  ;;  %p7508_p6 = scmp.lt.u32.totalorder %s7653_s27, %s8239_s6 }
 0xcd4   :  { %p7510_p8 = scmp.lt.u32.totalorder %s8239_s6, %s8145_s23 }
 0xcd5   :  { %p7509_p2 = por %p7508_p6, %p7507_p5 }
 0xcd7   :  { %p7511_p10 = por %p7510_p8, %p7509_p2 }
 0xcd9   :  { %p7512_p11 = pnand %p7511_p10, %p7505_p4 }
 0xcdb   :  { %7515 = shalt.err (!%p7512_p11)  }
 0xcdc   :  { %7527 = shalt.err (!%p7807_p7)  }
 0xcdd   :  { %2392 = dma.hbm_to_vmem [thread:$0]  %s8145_s23, 6144, %s7783_s12, [#allocation3 + $0x1]  ;;  %6945 = vmatpush3.bf16.msk.msra.mxu1 %vm7779_vm1, %v7599_v59  ;;  %5924 = vmatprep.mubr.msk.f32.mxu1 %vm7600_vm13, %v7596_v8  ;;  %v2393_v31 = vrot.slane %v8229_v7, 7  ;;  %v2394_v28 = vrot.slane %v8232_v10, 7 }
 0xcde   :  { %6946 = vmatprep.subr.bf16.mxu1 %v7598_v58  ;;  %v2421_v53 = vld [vmem:[#allocation2 + $0x80] sm:$0xff]  ;;  %v2422_v48 = vld [vmem:[#allocation2 + $0x88] sm:$0xff]  ;;  %v2423_v43 = vld [vmem:[#allocation2 + $0x90] sm:$0xff] }
 0xcdf   :  { %v6847_v4 = vpack.c.bf16 %v2422_v48, %v2421_v53  ;;  %v2424_v11 = vld [vmem:[#allocation2 + $0x98] sm:$0xff]  ;;  %v2425_v13 = vld [vmem:[#allocation2 + $0xa0] sm:$0xff]  ;;  %v2426_v14 = vld [vmem:[#allocation2 + $0xa8] sm:$0xff]  ;;  %v2396_v34 = vsel %vm333_vm4, %v2394_v28, %v2393_v31 }
 0xce0   :  { %v6851_v12 = vpack.c.bf16 %v2424_v11, %v2423_v43  ;;  %v6855_v15 = vpack.c.bf16 %v2426_v14, %v2425_v13  ;;  %v2427_v17 = vld [vmem:[#allocation2 + $0xb0] sm:$0xff]  ;;  %v2428_v18 = vld [vmem:[#allocation2 + $0xb8] sm:$0xff]  ;;  %v2429_v20 = vld [vmem:[#allocation2 + $0xc0] sm:$0xff]  ;;  %v2397_v38 = vmul.f32 %v7688_v9, %v2396_v34 }
 0xce1   :  { %6948 = vmatpush3.bf16.msk.msra.mxu1 %vm7824_vm2, %v7599_v59  ;;  %6848 = vmatprep.subr.bf16.mxu0 %v6847_v4  ;;  %v6859_v19 = vpack.c.bf16 %v2428_v18, %v2427_v17  ;;  %v2430_v21 = vld [vmem:[#allocation2 + $0xc8] sm:$0xff]  ;;  %v2431_v23 = vld [vmem:[#allocation2 + $0xd0] sm:$0xff]  ;;  %v2432_v24 = vld [vmem:[#allocation2 + $0xd8] sm:$0xff] }
 0xce2   :  { %6949 = vmatprep.subr.bf16.mxu1 %v7598_v58  ;;  %6850 = vmatpush3.bf16.msra.mxu0 %v6847_v4  ;;  %v6863_v22 = vpack.c.bf16 %v2430_v21, %v2429_v20  ;;  %v6867_v54 = vpack.c.bf16 %v2432_v24, %v2431_v23  ;;  %v2433_v27 = vld [vmem:[#allocation2 + $0xe0] sm:$0xff]  ;;  %v2434_v32 = vld [vmem:[#allocation2 + $0xe8] sm:$0xff]  ;;  %v2435_v63 = vld [vmem:[#allocation2 + $0xf0] sm:$0xff]  ;;  %v2399_v21 = vrot.slane %v8229_v7, 1 }
 0xce3   :  { %6852 = vmatprep.subr.bf16.mxu0 %v6851_v12  ;;  %v6871_v33 = vpack.c.bf16 %v2434_v32, %v2433_v27  ;;  %v2436_v62 = vld [vmem:[#allocation2 + $0xf8] sm:$0xff]  ;;  %v2405_v29 = vld [vmem:[#allocation2] sm:$0xff]  ;;  %v2406_v30 = vld [vmem:[#allocation2 + $0x8] sm:$0xff] }
 0xce4   :  { %v6875_v0 = vpack.c.bf16 %v2436_v62, %v2435_v63  ;;  %v6879_v25 = vpack.c.bf16 %v2406_v30, %v2405_v29  ;;  %v2407_v36 = vld [vmem:[#allocation2 + $0x10] sm:$0xff]  ;;  %v2408_v37 = vld [vmem:[#allocation2 + $0x18] sm:$0xff]  ;;  %v2409_v41 = vld [vmem:[#allocation2 + $0x20] sm:$0xff] }
 0xce5   :  { %6951 = vmatpush3.bf16.msk.msra.mxu1 %vm7836_vm3, %v7599_v59  ;;  %v6883_v40 = vpack.c.bf16 %v2408_v37, %v2407_v36  ;;  %v2410_v42 = vld [vmem:[#allocation2 + $0x28] sm:$0xff]  ;;  %v2411_v52 = vld [vmem:[#allocation2 + $0x30] sm:$0xff]  ;;  %v2412_v50 = vld [vmem:[#allocation2 + $0x38] sm:$0xff] }
 0xce6   :  { %6952 = vmatprep.subr.bf16.mxu1 %v7598_v58  ;;  %6854 = vmatpush3.bf16.msra.mxu0 %v6851_v12  ;;  %v6887_v51 = vpack.c.bf16 %v2410_v42, %v2409_v41  ;;  %v6891_v49 = vpack.c.bf16 %v2412_v50, %v2411_v52  ;;  %v2413_v5 = vld [vmem:[#allocation2 + $0x40] sm:$0xff]  ;;  %v2414_v6 = vld [vmem:[#allocation2 + $0x48] sm:$0xff]  ;;  %v2415_v48 = vld [vmem:[#allocation2 + $0x50] sm:$0xff] }
 0xce7   :  { %6856 = vmatprep.subr.bf16.mxu0 %v6855_v15  ;;  %v6895_v53 = vpack.c.bf16 %v2414_v6, %v2413_v5  ;;  %v2416_v43 = vld [vmem:[#allocation2 + $0x58] sm:$0xff]  ;;  %v2417_v11 = vld [vmem:[#allocation2 + $0x60] sm:$0xff]  ;;  %v2418_v12 = vld [vmem:[#allocation2 + $0x68] sm:$0xff] }
 0xce8   :  { %v6899_v4 = vpack.c.bf16 %v2416_v43, %v2415_v48  ;;  %v6903_v13 = vpack.c.bf16 %v2418_v12, %v2417_v11  ;;  %v2419_v14 = vld [vmem:[#allocation2 + $0x70] sm:$0xff]  ;;  %v2437_v18 = vld [vmem:[#allocation2 + $0x100] sm:$0xff]  ;;  %v2440_v24 = vld [vmem:[#allocation2 + $0x118] sm:$0xff] }
 0xce9   :  { %6954 = vmatpush3.bf16.msk.msra.mxu1 %vm7865_vm6, %v7599_v59  ;;  %v2439_v23 = vld [vmem:[#allocation2 + $0x110] sm:$0xff]  ;;  %v2442_v63 = vld [vmem:[#allocation2 + $0x128] sm:$0xff]  ;;  %v2444_v29 = vld [vmem:[#allocation2 + $0x138] sm:$0xff] }
 0xcea   :  { %6955 = vmatprep.subr.bf16.mxu1 %v7598_v58  ;;  %6858 = vmatpush3.bf16.msra.mxu0 %v6855_v15  ;;  %v2420_v15 = vld [vmem:[#allocation2 + $0x78] sm:$0xff]  ;;  %v6915_v27 = vpack.c.bf16 %v2440_v24, %v2439_v23  ;;  %v2446_v34 = vld [vmem:[#allocation2 + $0x148] sm:$0xff]  ;;  %v2451_v42 = vld [vmem:[#allocation2 + $0x170] sm:$0xff] }
 0xceb   :  { %6860 = vmatprep.subr.bf16.mxu0 %v6859_v19  ;;  %v6907_v17 = vpack.c.bf16 %v2420_v15, %v2419_v14  ;;  %v2448_v36 = vld [vmem:[#allocation2 + $0x158] sm:$0xff] }
 0xced   :  { %6957 = vmatpush3.bf16.msk.msra.mxu1 %vm7877_vm7, %v7599_v59 }
 0xcee   :  { %6958 = vmatprep.subr.bf16.mxu1 %v7598_v58  ;;  %6862 = vmatpush3.bf16.msra.mxu0 %v6859_v19  ;;  %v2438_v19 = vld [vmem:[#allocation2 + $0x108] sm:$0xff] }
 0xcef   :  { %6864 = vmatprep.subr.bf16.mxu0 %v6863_v22  ;;  %v6911_v20 = vpack.c.bf16 %v2438_v19, %v2437_v18 }
 0xcf1   :  { %6960 = vmatpush3.bf16.msk.msra.mxu1 %vm7889_vm9, %v7599_v59 }
 0xcf2   :  { %6961 = vmatprep.subr.bf16.mxu1 %v7598_v58  ;;  %6866 = vmatpush3.bf16.msra.mxu0 %v6863_v22  ;;  %v2400_v22 = vrot.slane %v8232_v10, 1 }
 0xcf3   :  { %6868 = vmatprep.subr.bf16.mxu0 %v6867_v54 }
 0xcf4   :  { %v2401_v32 = vsel %vm340_vm5, %v2399_v21, %v2400_v22  ;;  %v2402_v50 = vsel %vm340_vm5, %v2400_v22, %v2399_v21 }
 0xcf5   :  { %6963 = vmatpush3.bf16.msk.msra.mxu1 %vm7901_vm10, %v7599_v59 }
 0xcf6   :  { %6964 = vmatprep.subr.bf16.mxu1 %v7598_v58  ;;  %6870 = vmatpush3.bf16.msra.mxu0 %v6867_v54  ;;  %v2395_v54 = vsel %vm333_vm4, %v2393_v31, %v2394_v28  ;;  %v2447_v28 = vld [vmem:[#allocation2 + $0x150] sm:$0xff] }
 0xcf7   :  { %6872 = vmatprep.subr.bf16.mxu0 %v6871_v33  ;;  %v6931_v37 = vpack.c.bf16 %v2448_v36, %v2447_v28  ;;  %v4558_v36 = vld [vmem:[%s8593_s3 + $0x4] sm:$0x1] }
 0xcf9   :  { %6966 = vmatpush3.bf16.msk.msra.mxu1 %vm7913_vm12, %v7599_v59 }
 0xcfa   :  { %5927 = vmatprep.subr.mxu1 %v7596_v8  ;;  %6874 = vmatpush3.bf16.msra.mxu0 %v6871_v33  ;;  %v2441_v33 = vld [vmem:[#allocation2 + $0x120] sm:$0xff] }
 0xcfb   :  { %6876 = vmatprep.subr.bf16.mxu0 %v6875_v0  ;;  %v6919_v62 = vpack.c.bf16 %v2442_v63, %v2441_v33 }
 0xcfe   :  { %6878 = vmatpush3.bf16.msra.mxu0 %v6875_v0  ;;  %v2443_v0 = vld [vmem:[#allocation2 + $0x130] sm:$0xff] }
 0xcff   :  { %6880 = vmatprep.subr.bf16.mxu0 %v6879_v25  ;;  %v6923_v30 = vpack.c.bf16 %v2444_v29, %v2443_v0 }
 0xd01   :  { %5820 = vmatmul.mubr.f32.vlgmr.msra.gmra.mrb[12].mxu0 %v8232_v10 }
 0xd02   :  { %6882 = vmatpush3.bf16.msra.mxu0 %v6879_v25  ;;  %5854 = vmatprep.mubr.f32.mxu0 %v2397_v38  ;;  %v2445_v25 = vld [vmem:[#allocation2 + $0x140] sm:$0xff] }
 0xd03   :  { %6884 = vmatprep.subr.bf16.mxu0 %v6883_v40  ;;  %v6927_v31 = vpack.c.bf16 %v2446_v34, %v2445_v25  ;;  %v2449_v38 = vld [vmem:[#allocation2 + $0x160] sm:$0xff] }
 0xd04   :  { %v4557_v34 = vld [vmem:[%s8592_s2 + $0x4] sm:$0x1] }
 0xd06   :  { %6886 = vmatpush3.bf16.msra.mxu0 %v6883_v40  ;;  %v2450_v40 = vld [vmem:[#allocation2 + $0x168] sm:$0xff] }
 0xd07   :  { %6888 = vmatprep.subr.bf16.mxu0 %v6887_v51  ;;  %v6935_v41 = vpack.c.bf16 %v2450_v40, %v2449_v38 }
 0xd0a   :  { %6890 = vmatpush3.bf16.msra.mxu0 %v6887_v51  ;;  %v2452_v51 = vld [vmem:[#allocation2 + $0x178] sm:$0xff] }
 0xd0b   :  { %6892 = vmatprep.subr.bf16.mxu0 %v6891_v49  ;;  %v6939_v52 = vpack.c.bf16 %v2452_v51, %v2451_v42 }
 0xd0e   :  { %6894 = vmatpush3.bf16.msra.mxu0 %v6891_v49  ;;  %v2404_v49 = vmul.f32 %v7697_v16, %v2402_v50 }
 0xd0f   :  { %6896 = vmatprep.subr.bf16.mxu0 %v6895_v53 }
 0xd12   :  { %6898 = vmatpush3.bf16.msra.mxu0 %v6895_v53 }
 0xd13   :  { %6900 = vmatprep.subr.bf16.mxu0 %v6899_v4 }
 0xd16   :  { %6902 = vmatpush3.bf16.msra.mxu0 %v6899_v4 }
 0xd17   :  { %6904 = vmatprep.subr.bf16.mxu0 %v6903_v13 }
 0xd1a   :  { %6906 = vmatpush3.bf16.msra.mxu0 %v6903_v13 }
 0xd1b   :  { %6908 = vmatprep.subr.bf16.mxu0 %v6907_v17 }
 0xd1e   :  { %6910 = vmatpush3.bf16.msra.mxu0 %v6907_v17 }
 0xd1f   :  { %6912 = vmatprep.subr.bf16.mxu0 %v6911_v20 }
 0xd21   :  { %5855 = vmatmul.mubr.f32.vlgmr.msra.gmra.mrb[12].mxu0 %v2395_v54 }
 0xd22   :  { %6914 = vmatpush3.bf16.msra.mxu0 %v6911_v20  ;;  %5889 = vmatprep.mubr.f32.mxu0 %v2401_v32 }
 0xd23   :  { %6916 = vmatprep.subr.bf16.mxu0 %v6915_v27 }
 0xd26   :  { %6918 = vmatpush3.bf16.msra.mxu0 %v6915_v27 }
 0xd27   :  { %6920 = vmatprep.subr.bf16.mxu0 %v6919_v62 }
 0xd2a   :  { %6922 = vmatpush3.bf16.msra.mxu0 %v6919_v62 }
 0xd2b   :  { %6924 = vmatprep.subr.bf16.mxu0 %v6923_v30 }
 0xd2e   :  { %6926 = vmatpush3.bf16.msra.mxu0 %v6923_v30 }
 0xd2f   :  { %6928 = vmatprep.subr.bf16.mxu0 %v6927_v31 }
 0xd32   :  { %6930 = vmatpush3.bf16.msra.mxu0 %v6927_v31 }
 0xd33   :  { %6932 = vmatprep.subr.bf16.mxu0 %v6931_v37 }
 0xd36   :  { %6934 = vmatpush3.bf16.msra.mxu0 %v6931_v37 }
 0xd37   :  { %6936 = vmatprep.subr.bf16.mxu0 %v6935_v41 }
 0xd3a   :  { %6938 = vmatpush3.bf16.msra.mxu0 %v6935_v41 }
 0xd3b   :  { %6940 = vmatprep.subr.bf16.mxu0 %v6939_v52 }
 0xd3e   :  { %6942 = vmatpush3.bf16.msra.mxu0 %v6939_v52 }
 0xd41   :  { %5890 = vmatmul.mubr.f32.vlgmr.msra.gmra.mrb[12].mxu0 %v2404_v49 }
 0xe14   :  { %v5891_v5 = vpop.f32.mrb[12].mxu0 }
 0xe15   :  { %v2688_v6 = vmul.f32 %v5891_v5, %v5891_v5  ;;  %v2669_v53 = vpop.f32.mrb[13].mxu0 }
 0xe16   :  { %v2680_v48 = vadd.f32 %v5891_v5, %v2669_v53  ;;  %v2687_v43 = vmul.f32 %v2669_v53, %v2669_v53 }
 0xe18   :  { %v2681_v4 = vrot.slane %v2680_v48, 4  ;;  %v2689_v11 = vadd.f32 %v2688_v6, %v2687_v43 }
 0xe1a   :  { %v2682_v12 = vadd.f32 %v2681_v4, %v2680_v48  ;;  %v2690_v13 = vrot.slane %v2689_v11, 4 }
 0xe1c   :  { %v2683_v14 = vrot.slane %v2682_v12, 2  ;;  %v2691_v15 = vadd.f32 %v2690_v13, %v2689_v11 }
 0xe1e   :  { %v2684_v17 = vadd.f32 %v2683_v14, %v2682_v12  ;;  %v2692_v18 = vrot.slane %v2691_v15, 2 }
 0xe20   :  { %v2685_v19 = vrot.slane %v2684_v17, 1  ;;  %v2693_v20 = vadd.f32 %v2692_v18, %v2691_v15 }
 0xe22   :  { %v2694_v21 = vrot.slane %v2693_v20, 1  ;;  %v2686_v22 = vadd.f32 %v2685_v19, %v2684_v17 }
 0xe24   :  { %v2695_v23 = vadd.f32 %v2694_v21, %v2693_v20 }
 0xe26   :  { %v2696_v24 = vsel %vm636_vm14, %v2686_v22, %v2695_v23 }
 0xe27   :  { %5925 = vmatmul.mubr.f32.vlgmr.msra.gmra.mrb[12].mxu1 %v2696_v24 }
 0xe28   :  { %5928 = vmatpush3.msk.msra.mxu1 %vm749_vm15, %v7772_v56  ;;  %5929 = vmatprep.mubr.msk.f32.mxu1 %vm7600_vm13, %v7596_v8 }
 0xefa   :  { %v2763_v54 = vpop.f32.mrb[12].mxu1 }
 0xefb   :  { %v2767_v27 = vmul.f32 0.001953125, %v2763_v54  ;;  %v5926_v32 = vpop.f32.mrb[13].mxu1 }
 0xefd   :  { %v2768_v33 = vmul.f32 %v2767_v27, %v2767_v27 }
 0xeff   :  { %v2770_v63 = vrot.slane %v2768_v33, 7 }
 0xf01   :  { %v2772_v62 = vsub.f32 %v2767_v27, %v2770_v63 }
 0xf03   :  { %v2773_v0 = vadd.f32 1e-05, %v2772_v62 }
 0xf05   :  { %7374 = vrsqrt.f32 %v2773_v0 }
 0xf0f   :  { %v7375_v29 = vpop.eup %7374 }
 0xf10   :  { %v2784_v30 = vrot.slane %v7375_v29, %v7929_v26 }
 0xf12   :  { %v2785_v25 = vcombine.high %v2784_v30, %v2784_v30 }
 0xf14   :  { %v2792_v31 = vrot.slane %v2785_v25, %v7929_v26 }
 0xf16   :  { %v2794_v28 = vmul.f32 %v4557_v34, %v2792_v31 }
 0xf18   :  { %v2797_v37 = vmul.f32 %v2794_v28, %v2767_v27 }
 0xf1a   :  { %v2798_v38 = vsub.f32 %v4558_v36, %v2797_v37 }
 0xf1c   :  { %v2803_v40 = vrot.slane %v2798_v38, %v7940_v35 }
 0xf1e   :  { %v2805_v41 = vsel %vm636_vm14, %v2794_v28, %v2803_v40 }
 0xf1f   :  { %5930 = vmatmul.mubr.msk.f32.vlgmr.msra.gmra.mrb[14].mxu1 %vm745_vm0, %v2805_v41 }
 0xff2   :  { %v2875_v42 = vpop.f32.mrb[14].mxu1 }
 0xff3   :  { %v2882_v51 = vrot.slane %v2875_v42, %v7940_v35  ;;  %v5931_v52 = vpop.f32.mrb[15].mxu1  ;;  %v2888_v6 = vrot.slane %v2875_v42, %v7946_v39 }
 0xff5   :  { %v2883_v50 = vmul.f32 %v2882_v51, %v2669_v53  ;;  %v2884_v49 = vmul.f32 %v5891_v5, %v2882_v51 }
 0xff7   :  { %v2889_v48 = vadd.f32 %v2888_v6, %v2883_v50  ;;  %v2890_v43 = vadd.f32 %v2888_v6, %v2884_v49 }
 0xff9   :  { %v8322_v4 = vmax.f32 %v2889_v48, 0.0  ;;  %v8324_v11 = vmax.f32 %v2890_v43, 0.0 }
 0xffa   :  { %7589 = dma.done.wait [#allocation3 + $0x1], 6144 }
 0xffb   :  { %7590 = vsyncadd [#allocation3 + $0x1], 4294961152  ;;  %5964 = vmatprep.mubr.f32.mxu1 %v8322_v4  ;;  %7063 = vmatprep.subr.bf16.mxu0 %v7598_v58  ;;  %s8331_s18 = scalar_lea.hbm %s8591_s1, 43008  ;;  %p7532_p13 = scmp.lt.u32.totalorder %s8239_s6, %s8591_s1 }
 0xffc   :  { %p7530_p12 = scmp.ne.s32.totalorder %s8239_s6, %s8331_s18  ;;  %p7533_p0 = scmp.lt.u32.totalorder %s7653_s27, %s8331_s18 }
 0xffd   :  { %p7535_p3 = scmp.lt.u32.totalorder %s8331_s18, %s8239_s6 }
 0xffe   :  { %p7534_p1 = por %p7533_p0, %p7532_p13 }
0x1000   :  { %p7536_p4 = por %p7535_p3, %p7534_p1 }
0x1002   :  { %p7537_p5 = pnand %p7536_p4, %p7530_p12 }
0x1004   :  { %7540 = shalt.err (!%p7537_p5)  }
0x1005   :  { %7552 = shalt.err (!%p7673_p9)  }
0x1006   :  { %2906 = dma.hbm_to_vmem [thread:$0]  %s8239_s6, 6144, %s7637_s16, [#allocation3]  ;;  %7065 = vmatpush3.bf16.msk.msra.mxu0 %vm7779_vm1, %v7599_v59  ;;  %6069 = vmatprep.mubr.msk.f32.mxu0 %vm7600_vm13, %v7596_v8  ;;  %v2907_v34 = vrot.slane %v8322_v4, 7  ;;  %v2908_v31 = vrot.slane %v8324_v11, 7 }
0x1007   :  { %7066 = vmatprep.subr.bf16.mxu0 %v7598_v58  ;;  %v2935_v5 = vld [vmem:[#allocation2 + $0x200] sm:$0xff]  ;;  %v2936_v53 = vld [vmem:[#allocation2 + $0x208] sm:$0xff]  ;;  %v2937_v12 = vld [vmem:[#allocation2 + $0x210] sm:$0xff] }
0x1008   :  { %v6967_v13 = vpack.c.bf16 %v2936_v53, %v2935_v5  ;;  %v2938_v14 = vld [vmem:[#allocation2 + $0x218] sm:$0xff]  ;;  %v2939_v17 = vld [vmem:[#allocation2 + $0x220] sm:$0xff]  ;;  %v2940_v18 = vld [vmem:[#allocation2 + $0x228] sm:$0xff]  ;;  %v2910_v38 = vsel %vm333_vm4, %v2908_v31, %v2907_v34 }
0x1009   :  { %v6971_v15 = vpack.c.bf16 %v2938_v14, %v2937_v12  ;;  %v6975_v19 = vpack.c.bf16 %v2940_v18, %v2939_v17  ;;  %v2941_v20 = vld [vmem:[#allocation2 + $0x230] sm:$0xff]  ;;  %v2942_v21 = vld [vmem:[#allocation2 + $0x238] sm:$0xff]  ;;  %v2943_v23 = vld [vmem:[#allocation2 + $0x240] sm:$0xff]  ;;  %v2911_v42 = vmul.f32 %v7688_v9, %v2910_v38 }
0x100a   :  { %7068 = vmatpush3.bf16.msk.msra.mxu0 %vm7824_vm2, %v7599_v59  ;;  %6968 = vmatprep.subr.bf16.mxu1 %v6967_v13  ;;  %v6979_v22 = vpack.c.bf16 %v2942_v21, %v2941_v20  ;;  %v2944_v24 = vld [vmem:[#allocation2 + $0x248] sm:$0xff]  ;;  %v2945_v27 = vld [vmem:[#allocation2 + $0x250] sm:$0xff]  ;;  %v2946_v32 = vld [vmem:[#allocation2 + $0x258] sm:$0xff] }
0x100b   :  { %7069 = vmatprep.subr.bf16.mxu0 %v7598_v58  ;;  %6970 = vmatpush3.bf16.msra.mxu1 %v6967_v13  ;;  %v6983_v54 = vpack.c.bf16 %v2944_v24, %v2943_v23  ;;  %v6987_v33 = vpack.c.bf16 %v2946_v32, %v2945_v27  ;;  %v2947_v63 = vld [vmem:[#allocation2 + $0x260] sm:$0xff]  ;;  %v2948_v62 = vld [vmem:[#allocation2 + $0x268] sm:$0xff]  ;;  %v2949_v29 = vld [vmem:[#allocation2 + $0x270] sm:$0xff]  ;;  %v2913_v27 = vrot.slane %v8322_v4, 1  ;;  %v2914_v32 = vrot.slane %v8324_v11, 1 }
0x100c   :  { %6972 = vmatprep.subr.bf16.mxu1 %v6971_v15  ;;  %v6991_v0 = vpack.c.bf16 %v2948_v62, %v2947_v63  ;;  %v2950_v30 = vld [vmem:[#allocation2 + $0x278] sm:$0xff]  ;;  %v2919_v28 = vld [vmem:[#allocation2 + $0x180] sm:$0xff]  ;;  %v2920_v36 = vld [vmem:[#allocation2 + $0x188] sm:$0xff]  ;;  %v2909_v62 = vsel %vm333_vm4, %v2907_v34, %v2908_v31 }
0x100d   :  { %v6995_v25 = vpack.c.bf16 %v2950_v30, %v2949_v29  ;;  %v6999_v37 = vpack.c.bf16 %v2920_v36, %v2919_v28  ;;  %v2921_v40 = vld [vmem:[#allocation2 + $0x190] sm:$0xff]  ;;  %v2922_v41 = vld [vmem:[#allocation2 + $0x198] sm:$0xff]  ;;  %v2923_v52 = vld [vmem:[#allocation2 + $0x1a0] sm:$0xff]  ;;  %v2915_v29 = vsel %vm340_vm5, %v2913_v27, %v2914_v32 }
0x100e   :  { %7071 = vmatpush3.bf16.msk.msra.mxu0 %vm7836_vm3, %v7599_v59  ;;  %v7003_v51 = vpack.c.bf16 %v2922_v41, %v2921_v40  ;;  %v2924_v50 = vld [vmem:[#allocation2 + $0x1a8] sm:$0xff]  ;;  %v2925_v6 = vld [vmem:[#allocation2 + $0x1b0] sm:$0xff]  ;;  %v2926_v48 = vld [vmem:[#allocation2 + $0x1b8] sm:$0xff] }
0x100f   :  { %7072 = vmatprep.subr.bf16.mxu0 %v7598_v58  ;;  %6974 = vmatpush3.bf16.msra.mxu1 %v6971_v15  ;;  %v7007_v49 = vpack.c.bf16 %v2924_v50, %v2923_v52  ;;  %v7011_v43 = vpack.c.bf16 %v2926_v48, %v2925_v6  ;;  %v2927_v5 = vld [vmem:[#allocation2 + $0x1c0] sm:$0xff]  ;;  %v2928_v53 = vld [vmem:[#allocation2 + $0x1c8] sm:$0xff]  ;;  %v2929_v13 = vld [vmem:[#allocation2 + $0x1d0] sm:$0xff]  ;;  %v2916_v48 = vsel %vm340_vm5, %v2914_v32, %v2913_v27 }
0x1010   :  { %6976 = vmatprep.subr.bf16.mxu1 %v6975_v19  ;;  %v7015_v12 = vpack.c.bf16 %v2928_v53, %v2927_v5  ;;  %v2930_v14 = vld [vmem:[#allocation2 + $0x1d8] sm:$0xff]  ;;  %v2931_v17 = vld [vmem:[#allocation2 + $0x1e0] sm:$0xff]  ;;  %v2932_v18 = vld [vmem:[#allocation2 + $0x1e8] sm:$0xff] }
0x1011   :  { %v7019_v15 = vpack.c.bf16 %v2930_v14, %v2929_v13  ;;  %v2933_v20 = vld [vmem:[#allocation2 + $0x1f0] sm:$0xff]  ;;  %v2934_v21 = vld [vmem:[#allocation2 + $0x1f8] sm:$0xff]  ;;  %v2951_v23 = vld [vmem:[#allocation2 + $0x280] sm:$0xff] }
0x1012   :  { %7074 = vmatpush3.bf16.msk.msra.mxu0 %vm7865_vm6, %v7599_v59  ;;  %v2952_v24 = vld [vmem:[#allocation2 + $0x288] sm:$0xff]  ;;  %v2954_v63 = vld [vmem:[#allocation2 + $0x298] sm:$0xff]  ;;  %v2955_v30 = vld [vmem:[#allocation2 + $0x2a0] sm:$0xff] }
0x1013   :  { %7075 = vmatprep.subr.bf16.mxu0 %v7598_v58  ;;  %6978 = vmatpush3.bf16.msra.mxu1 %v6975_v19  ;;  %v7023_v19 = vpack.c.bf16 %v2932_v18, %v2931_v17  ;;  %v2957_v28 = vld [vmem:[#allocation2 + $0x2b0] sm:$0xff]  ;;  %v2960_v38 = vld [vmem:[#allocation2 + $0x2c8] sm:$0xff]  ;;  %v2962_v40 = vld [vmem:[#allocation2 + $0x2d8] sm:$0xff] }
0x1014   :  { %6980 = vmatprep.subr.bf16.mxu1 %v6979_v22  ;;  %v2961_v31 = vld [vmem:[#allocation2 + $0x2d0] sm:$0xff] }
0x1015   :  { %v7051_v41 = vpack.c.bf16 %v2962_v40, %v2961_v31  ;;  %v2965_v50 = vld [vmem:[#allocation2 + $0x2f0] sm:$0xff]  ;;  %v4578_v40 = vld [vmem:[%s8593_s3 + $0x5] sm:$0x1] }
0x1016   :  { %7077 = vmatpush3.bf16.msk.msra.mxu0 %vm7877_vm7, %v7599_v59 }
0x1017   :  { %7078 = vmatprep.subr.bf16.mxu0 %v7598_v58  ;;  %6982 = vmatpush3.bf16.msra.mxu1 %v6979_v22  ;;  %v7027_v22 = vpack.c.bf16 %v2934_v21, %v2933_v20 }
0x1018   :  { %6984 = vmatprep.subr.bf16.mxu1 %v6983_v54 }
0x101a   :  { %7080 = vmatpush3.bf16.msk.msra.mxu0 %vm7889_vm9, %v7599_v59 }
0x101b   :  { %7081 = vmatprep.subr.bf16.mxu0 %v7598_v58  ;;  %6986 = vmatpush3.bf16.msra.mxu1 %v6983_v54  ;;  %v7031_v54 = vpack.c.bf16 %v2952_v24, %v2951_v23 }
0x101c   :  { %6988 = vmatprep.subr.bf16.mxu1 %v6987_v33 }
0x101e   :  { %7083 = vmatpush3.bf16.msk.msra.mxu0 %vm7901_vm10, %v7599_v59 }
0x101f   :  { %7084 = vmatprep.subr.bf16.mxu0 %v7598_v58  ;;  %6990 = vmatpush3.bf16.msra.mxu1 %v6987_v33  ;;  %v2953_v33 = vld [vmem:[#allocation2 + $0x290] sm:$0xff] }
0x1020   :  { %6992 = vmatprep.subr.bf16.mxu1 %v6991_v0 }
0x1022   :  { %7086 = vmatpush3.bf16.msk.msra.mxu0 %vm7913_vm12, %v7599_v59 }
0x1023   :  { %6072 = vmatprep.subr.mxu0 %v7596_v8  ;;  %6994 = vmatpush3.bf16.msra.mxu1 %v6991_v0  ;;  %v7035_v0 = vpack.c.bf16 %v2954_v63, %v2953_v33 }
0x1024   :  { %6996 = vmatprep.subr.bf16.mxu1 %v6995_v25 }
0x1027   :  { %6998 = vmatpush3.bf16.msra.mxu1 %v6995_v25  ;;  %v2956_v25 = vld [vmem:[#allocation2 + $0x2a8] sm:$0xff] }
0x1028   :  { %7000 = vmatprep.subr.bf16.mxu1 %v6999_v37  ;;  %v7039_v4 = vpack.c.bf16 %v2956_v25, %v2955_v30 }
0x102a   :  { %5965 = vmatmul.mubr.f32.vlgmr.msra.gmra.mrb[16].mxu1 %v8324_v11  ;;  %v2958_v11 = vld [vmem:[#allocation2 + $0x2b8] sm:$0xff] }
0x102b   :  { %7002 = vmatpush3.bf16.msra.mxu1 %v6999_v37  ;;  %5999 = vmatprep.mubr.f32.mxu1 %v2911_v42  ;;  %v7043_v36 = vpack.c.bf16 %v2958_v11, %v2957_v28  ;;  %v2959_v37 = vld [vmem:[#allocation2 + $0x2c0] sm:$0xff] }
0x102c   :  { %7004 = vmatprep.subr.bf16.mxu1 %v7003_v51  ;;  %v7047_v34 = vpack.c.bf16 %v2960_v38, %v2959_v37  ;;  %v2963_v42 = vld [vmem:[#allocation2 + $0x2e0] sm:$0xff] }
0x102d   :  { %v4577_v38 = vld [vmem:[%s8592_s2 + $0x5] sm:$0x1] }
0x102f   :  { %7006 = vmatpush3.bf16.msra.mxu1 %v7003_v51  ;;  %v2964_v51 = vld [vmem:[#allocation2 + $0x2e8] sm:$0xff] }
0x1030   :  { %7008 = vmatprep.subr.bf16.mxu1 %v7007_v49  ;;  %v7055_v52 = vpack.c.bf16 %v2964_v51, %v2963_v42 }
0x1033   :  { %7010 = vmatpush3.bf16.msra.mxu1 %v7007_v49  ;;  %v2966_v49 = vld [vmem:[#allocation2 + $0x2f8] sm:$0xff] }
0x1034   :  { %7012 = vmatprep.subr.bf16.mxu1 %v7011_v43  ;;  %v7059_v6 = vpack.c.bf16 %v2966_v49, %v2965_v50 }
0x1037   :  { %7014 = vmatpush3.bf16.msra.mxu1 %v7011_v43  ;;  %v2918_v43 = vmul.f32 %v7697_v16, %v2916_v48 }
0x1038   :  { %7016 = vmatprep.subr.bf16.mxu1 %v7015_v12 }
0x103b   :  { %7018 = vmatpush3.bf16.msra.mxu1 %v7015_v12 }
0x103c   :  { %7020 = vmatprep.subr.bf16.mxu1 %v7019_v15 }
0x103f   :  { %7022 = vmatpush3.bf16.msra.mxu1 %v7019_v15 }
0x1040   :  { %7024 = vmatprep.subr.bf16.mxu1 %v7023_v19 }
0x1043   :  { %7026 = vmatpush3.bf16.msra.mxu1 %v7023_v19 }
0x1044   :  { %7028 = vmatprep.subr.bf16.mxu1 %v7027_v22 }
0x1047   :  { %7030 = vmatpush3.bf16.msra.mxu1 %v7027_v22 }
0x1048   :  { %7032 = vmatprep.subr.bf16.mxu1 %v7031_v54 }
0x104a   :  { %6000 = vmatmul.mubr.f32.vlgmr.msra.gmra.mrb[16].mxu1 %v2909_v62 }
0x104b   :  { %7034 = vmatpush3.bf16.msra.mxu1 %v7031_v54  ;;  %6034 = vmatprep.mubr.f32.mxu1 %v2915_v29 }
0x104c   :  { %7036 = vmatprep.subr.bf16.mxu1 %v7035_v0 }
0x104f   :  { %7038 = vmatpush3.bf16.msra.mxu1 %v7035_v0 }
0x1050   :  { %7040 = vmatprep.subr.bf16.mxu1 %v7039_v4 }
0x1053   :  { %7042 = vmatpush3.bf16.msra.mxu1 %v7039_v4 }
0x1054   :  { %7044 = vmatprep.subr.bf16.mxu1 %v7043_v36 }
0x1057   :  { %7046 = vmatpush3.bf16.msra.mxu1 %v7043_v36 }
0x1058   :  { %7048 = vmatprep.subr.bf16.mxu1 %v7047_v34 }
0x105b   :  { %7050 = vmatpush3.bf16.msra.mxu1 %v7047_v34 }
0x105c   :  { %7052 = vmatprep.subr.bf16.mxu1 %v7051_v41 }
0x105f   :  { %7054 = vmatpush3.bf16.msra.mxu1 %v7051_v41 }
0x1060   :  { %7056 = vmatprep.subr.bf16.mxu1 %v7055_v52 }
0x1063   :  { %7058 = vmatpush3.bf16.msra.mxu1 %v7055_v52 }
0x1064   :  { %7060 = vmatprep.subr.bf16.mxu1 %v7059_v6 }
0x1067   :  { %7062 = vmatpush3.bf16.msra.mxu1 %v7059_v6 }
0x106a   :  { %6035 = vmatmul.mubr.f32.vlgmr.msra.gmra.mrb[16].mxu1 %v2918_v43 }
0x113d   :  { %v6036_v5 = vpop.f32.mrb[16].mxu1 }
0x113e   :  { %v3202_v53 = vmul.f32 %v6036_v5, %v6036_v5  ;;  %v3183_v12 = vpop.f32.mrb[17].mxu1 }
0x113f   :  { %v3194_v13 = vadd.f32 %v6036_v5, %v3183_v12  ;;  %v3201_v14 = vmul.f32 %v3183_v12, %v3183_v12 }
0x1141   :  { %v3195_v15 = vrot.slane %v3194_v13, 4  ;;  %v3203_v17 = vadd.f32 %v3202_v53, %v3201_v14 }
0x1143   :  { %v3196_v18 = vadd.f32 %v3195_v15, %v3194_v13  ;;  %v3204_v19 = vrot.slane %v3203_v17, 4 }
0x1145   :  { %v3197_v20 = vrot.slane %v3196_v18, 2  ;;  %v3205_v21 = vadd.f32 %v3204_v19, %v3203_v17 }
0x1147   :  { %v3198_v22 = vadd.f32 %v3197_v20, %v3196_v18  ;;  %v3206_v23 = vrot.slane %v3205_v21, 2 }
0x1149   :  { %v3199_v24 = vrot.slane %v3198_v22, 1  ;;  %v3207_v54 = vadd.f32 %v3206_v23, %v3205_v21 }
0x114b   :  { %v3208_v27 = vrot.slane %v3207_v54, 1  ;;  %v3200_v32 = vadd.f32 %v3199_v24, %v3198_v22 }
0x114d   :  { %v3209_v33 = vadd.f32 %v3208_v27, %v3207_v54 }
0x114f   :  { %v3210_v63 = vsel %vm636_vm14, %v3200_v32, %v3209_v33 }
0x1150   :  { %6070 = vmatmul.mubr.f32.vlgmr.msra.gmra.mrb[14].mxu0 %v3210_v63 }
0x1151   :  { %6073 = vmatpush3.msk.msra.mxu0 %vm749_vm15, %v7772_v56  ;;  %6074 = vmatprep.mubr.msk.f32.mxu0 %vm7600_vm13, %v7596_v8 }
0x1223   :  { %v3277_v62 = vpop.f32.mrb[14].mxu0 }
0x1224   :  { %v3281_v0 = vmul.f32 0.001953125, %v3277_v62  ;;  %v6071_v29 = vpop.f32.mrb[15].mxu0 }
0x1226   :  { %v3282_v30 = vmul.f32 %v3281_v0, %v3281_v0 }
0x1228   :  { %v3284_v25 = vrot.slane %v3282_v30, 7 }
0x122a   :  { %v3286_v4 = vsub.f32 %v3281_v0, %v3284_v25 }
0x122c   :  { %v3287_v28 = vadd.f32 1e-05, %v3286_v4 }
0x122e   :  { %7376 = vrsqrt.f32 %v3287_v28 }
0x1238   :  { %v7377_v11 = vpop.eup %7376 }
0x1239   :  { %v3298_v36 = vrot.slane %v7377_v11, %v7929_v26 }
0x123b   :  { %v3299_v37 = vcombine.high %v3298_v36, %v3298_v36 }
0x123d   :  { %v3306_v34 = vrot.slane %v3299_v37, %v7929_v26 }
0x123f   :  { %v3308_v31 = vmul.f32 %v4577_v38, %v3306_v34 }
0x1241   :  { %v3311_v41 = vmul.f32 %v3308_v31, %v3281_v0 }
0x1243   :  { %v3312_v42 = vsub.f32 %v4578_v40, %v3311_v41 }
0x1245   :  { %v3317_v51 = vrot.slane %v3312_v42, %v7940_v35 }
0x1247   :  { %v3319_v52 = vsel %vm636_vm14, %v3308_v31, %v3317_v51 }
0x1248   :  { %6075 = vmatmul.mubr.msk.f32.vlgmr.msra.gmra.mrb[16].mxu0 %vm745_vm0, %v3319_v52 }
0x131b   :  { %v3389_v50 = vpop.f32.mrb[16].mxu0 }
0x131c   :  { %v3396_v49 = vrot.slane %v3389_v50, %v7940_v35  ;;  %v6076_v6 = vpop.f32.mrb[17].mxu0  ;;  %v3402_v53 = vrot.slane %v3389_v50, %v7946_v39 }
0x131e   :  { %v3397_v48 = vmul.f32 %v3396_v49, %v3183_v12  ;;  %v3398_v43 = vmul.f32 %v6036_v5, %v3396_v49 }
0x1320   :  { %v3403_v13 = vadd.f32 %v3402_v53, %v3397_v48  ;;  %v3404_v14 = vadd.f32 %v3402_v53, %v3398_v43 }
0x1322   :  { %v8418_v15 = vadd.f32 %v3403_v13, %v8229_v7  ;;  %v8421_v17 = vadd.f32 %v3404_v14, %v8232_v10 }
0x1323   :  { %7591 = dma.done.wait [#allocation3], 6144 }
0x1324   :  { %7592 = vsyncadd [#allocation3], 4294961152  ;;  %6109 = vmatprep.mubr.f32.mxu0 %v8418_v15  ;;  %7183 = vmatprep.subr.bf16.mxu1 %v7598_v58  ;;  %p7555_p9 = scmp.ne.s32.totalorder %s8331_s18, %s7653_s27  ;;  %p7557_p6 = scmp.lt.u32.totalorder %s8331_s18, %s8591_s1 }
0x1325   :  { %p7558_p2 = scmp.lt.u32.totalorder %s7653_s27, %s7653_s27 }
0x1327   :  { %p7559_p8 = por %p7558_p2, %p7557_p6 }
0x1329   :  { %p7561_p10 = por %p7559_p8, %p7533_p0 }
0x132b   :  { %p7562_p11 = pnand %p7561_p10, %p7555_p9 }
0x132d   :  { %7565 = shalt.err (!%p7562_p11)  }
0x132e   :  { %7577 = shalt.err (!%p7807_p7)  }
0x132f   :  { %3420 = dma.hbm_to_vmem [thread:$0]  %s8331_s18, 6144, %s7783_s12, [#allocation3 + $0x1]  ;;  %7185 = vmatpush3.bf16.msk.msra.mxu1 %vm7779_vm1, %v7599_v59  ;;  %6214 = vmatprep.mubr.msk.f32.mxu1 %vm7600_vm13, %v7596_v8  ;;  %v3421_v36 = vrot.slane %v8418_v15, 7  ;;  %v3422_v37 = vrot.slane %v8421_v17, 7 }
0x1330   :  { %7186 = vmatprep.subr.bf16.mxu1 %v7598_v58  ;;  %v3449_v7 = vld [vmem:[#allocation2 + $0x80] sm:$0xff]  ;;  %v3450_v10 = vld [vmem:[#allocation2 + $0x88] sm:$0xff]  ;;  %v3451_v5 = vld [vmem:[#allocation2 + $0x90] sm:$0xff] }
0x1331   :  { %v7087_v12 = vpack.c.bf16 %v3450_v10, %v3449_v7  ;;  %v3452_v18 = vld [vmem:[#allocation2 + $0x98] sm:$0xff]  ;;  %v3453_v20 = vld [vmem:[#allocation2 + $0xa0] sm:$0xff]  ;;  %v3454_v21 = vld [vmem:[#allocation2 + $0xa8] sm:$0xff]  ;;  %v3424_v40 = vsel %vm333_vm4, %v3422_v37, %v3421_v36 }
0x1332   :  { %v7091_v19 = vpack.c.bf16 %v3452_v18, %v3451_v5  ;;  %v7095_v22 = vpack.c.bf16 %v3454_v21, %v3453_v20  ;;  %v3455_v23 = vld [vmem:[#allocation2 + $0xb0] sm:$0xff]  ;;  %v3456_v24 = vld [vmem:[#allocation2 + $0xb8] sm:$0xff]  ;;  %v3457_v27 = vld [vmem:[#allocation2 + $0xc0] sm:$0xff]  ;;  %v3425_v51 = vmul.f32 %v7688_v9, %v3424_v40 }
0x1333   :  { %7188 = vmatpush3.bf16.msk.msra.mxu1 %vm7824_vm2, %v7599_v59  ;;  %7088 = vmatprep.subr.bf16.mxu0 %v7087_v12  ;;  %v7099_v54 = vpack.c.bf16 %v3456_v24, %v3455_v23  ;;  %v3458_v32 = vld [vmem:[#allocation2 + $0xc8] sm:$0xff]  ;;  %v3459_v63 = vld [vmem:[#allocation2 + $0xd0] sm:$0xff]  ;;  %v3460_v62 = vld [vmem:[#allocation2 + $0xd8] sm:$0xff] }
0x1334   :  { %7189 = vmatprep.subr.bf16.mxu1 %v7598_v58  ;;  %7090 = vmatpush3.bf16.msra.mxu0 %v7087_v12  ;;  %v7103_v33 = vpack.c.bf16 %v3458_v32, %v3457_v27  ;;  %v7107_v0 = vpack.c.bf16 %v3460_v62, %v3459_v63  ;;  %v3461_v29 = vld [vmem:[#allocation2 + $0xe0] sm:$0xff]  ;;  %v3462_v30 = vld [vmem:[#allocation2 + $0xe8] sm:$0xff]  ;;  %v3463_v4 = vld [vmem:[#allocation2 + $0xf0] sm:$0xff]  ;;  %v3427_v32 = vrot.slane %v8418_v15, 1 }
0x1335   :  { %7092 = vmatprep.subr.bf16.mxu0 %v7091_v19  ;;  %v7111_v25 = vpack.c.bf16 %v3462_v30, %v3461_v29  ;;  %v3464_v28 = vld [vmem:[#allocation2 + $0xf8] sm:$0xff]  ;;  %v3433_v38 = vld [vmem:[#allocation2] sm:$0xff]  ;;  %v3434_v34 = vld [vmem:[#allocation2 + $0x8] sm:$0xff] }
0x1336   :  { %v7115_v11 = vpack.c.bf16 %v3464_v28, %v3463_v4  ;;  %v7119_v31 = vpack.c.bf16 %v3434_v34, %v3433_v38  ;;  %v3435_v41 = vld [vmem:[#allocation2 + $0x10] sm:$0xff]  ;;  %v3436_v42 = vld [vmem:[#allocation2 + $0x18] sm:$0xff]  ;;  %v3437_v50 = vld [vmem:[#allocation2 + $0x20] sm:$0xff] }
0x1337   :  { %7191 = vmatpush3.bf16.msk.msra.mxu1 %vm7836_vm3, %v7599_v59  ;;  %v7123_v52 = vpack.c.bf16 %v3436_v42, %v3435_v41  ;;  %v3438_v49 = vld [vmem:[#allocation2 + $0x28] sm:$0xff]  ;;  %v3439_v48 = vld [vmem:[#allocation2 + $0x30] sm:$0xff]  ;;  %v3440_v43 = vld [vmem:[#allocation2 + $0x38] sm:$0xff] }
0x1338   :  { %7192 = vmatprep.subr.bf16.mxu1 %v7598_v58  ;;  %7094 = vmatpush3.bf16.msra.mxu0 %v7091_v19  ;;  %v7127_v6 = vpack.c.bf16 %v3438_v49, %v3437_v50  ;;  %v7131_v53 = vpack.c.bf16 %v3440_v43, %v3439_v48  ;;  %v3441_v13 = vld [vmem:[#allocation2 + $0x40] sm:$0xff]  ;;  %v3442_v14 = vld [vmem:[#allocation2 + $0x48] sm:$0xff]  ;;  %v3443_v10 = vld [vmem:[#allocation2 + $0x50] sm:$0xff] }
0x1339   :  { %7096 = vmatprep.subr.bf16.mxu0 %v7095_v22  ;;  %v7135_v7 = vpack.c.bf16 %v3442_v14, %v3441_v13  ;;  %v3444_v5 = vld [vmem:[#allocation2 + $0x58] sm:$0xff]  ;;  %v3445_v18 = vld [vmem:[#allocation2 + $0x60] sm:$0xff]  ;;  %v3446_v19 = vld [vmem:[#allocation2 + $0x68] sm:$0xff] }
0x133a   :  { %v7139_v12 = vpack.c.bf16 %v3444_v5, %v3443_v10  ;;  %v7143_v20 = vpack.c.bf16 %v3446_v19, %v3445_v18  ;;  %v3447_v21 = vld [vmem:[#allocation2 + $0x70] sm:$0xff]  ;;  %v3465_v24 = vld [vmem:[#allocation2 + $0x100] sm:$0xff]  ;;  %v3468_v62 = vld [vmem:[#allocation2 + $0x118] sm:$0xff] }
0x133b   :  { %7194 = vmatpush3.bf16.msk.msra.mxu1 %vm7865_vm6, %v7599_v59  ;;  %v3467_v63 = vld [vmem:[#allocation2 + $0x110] sm:$0xff]  ;;  %v3470_v4 = vld [vmem:[#allocation2 + $0x128] sm:$0xff]  ;;  %v3472_v38 = vld [vmem:[#allocation2 + $0x138] sm:$0xff] }
0x133c   :  { %7195 = vmatprep.subr.bf16.mxu1 %v7598_v58  ;;  %7098 = vmatpush3.bf16.msra.mxu0 %v7095_v22  ;;  %v3448_v22 = vld [vmem:[#allocation2 + $0x78] sm:$0xff]  ;;  %v7155_v29 = vpack.c.bf16 %v3468_v62, %v3467_v63  ;;  %v3474_v40 = vld [vmem:[#allocation2 + $0x148] sm:$0xff]  ;;  %v3479_v49 = vld [vmem:[#allocation2 + $0x170] sm:$0xff] }
0x133d   :  { %7100 = vmatprep.subr.bf16.mxu0 %v7099_v54  ;;  %v7147_v23 = vpack.c.bf16 %v3448_v22, %v3447_v21  ;;  %v3476_v41 = vld [vmem:[#allocation2 + $0x158] sm:$0xff] }
0x133f   :  { %7197 = vmatpush3.bf16.msk.msra.mxu1 %vm7877_vm7, %v7599_v59 }
0x1340   :  { %7198 = vmatprep.subr.bf16.mxu1 %v7598_v58  ;;  %7102 = vmatpush3.bf16.msra.mxu0 %v7099_v54  ;;  %v3466_v54 = vld [vmem:[#allocation2 + $0x108] sm:$0xff] }
0x1341   :  { %7104 = vmatprep.subr.bf16.mxu0 %v7103_v33  ;;  %v7151_v27 = vpack.c.bf16 %v3466_v54, %v3465_v24 }
0x1343   :  { %7200 = vmatpush3.bf16.msk.msra.mxu1 %vm7889_vm9, %v7599_v59 }
0x1344   :  { %7201 = vmatprep.subr.bf16.mxu1 %v7598_v58  ;;  %7106 = vmatpush3.bf16.msra.mxu0 %v7103_v33  ;;  %v3428_v33 = vrot.slane %v8421_v17, 1 }
0x1345   :  { %7108 = vmatprep.subr.bf16.mxu0 %v7107_v0 }
0x1346   :  { %v3429_v30 = vsel %vm340_vm5, %v3427_v32, %v3428_v33  ;;  %v3430_v43 = vsel %vm340_vm5, %v3428_v33, %v3427_v32 }
0x1347   :  { %7203 = vmatpush3.bf16.msk.msra.mxu1 %vm7901_vm10, %v7599_v59 }
0x1348   :  { %7204 = vmatprep.subr.bf16.mxu1 %v7598_v58  ;;  %7110 = vmatpush3.bf16.msra.mxu0 %v7107_v0  ;;  %v3423_v0 = vsel %vm333_vm4, %v3421_v36, %v3422_v37  ;;  %v3475_v37 = vld [vmem:[#allocation2 + $0x150] sm:$0xff] }
0x1349   :  { %7112 = vmatprep.subr.bf16.mxu0 %v7111_v25  ;;  %v7171_v42 = vpack.c.bf16 %v3476_v41, %v3475_v37  ;;  %v4598_v41 = vld [vmem:[%s8593_s3 + $0x6] sm:$0x1] }
0x134b   :  { %7206 = vmatpush3.bf16.msk.msra.mxu1 %vm7913_vm12, %v7599_v59 }
0x134c   :  { %6217 = vmatprep.subr.mxu1 %v7596_v8  ;;  %7114 = vmatpush3.bf16.msra.mxu0 %v7111_v25  ;;  %v3469_v25 = vld [vmem:[#allocation2 + $0x120] sm:$0xff] }
0x134d   :  { %7116 = vmatprep.subr.bf16.mxu0 %v7115_v11  ;;  %v7159_v28 = vpack.c.bf16 %v3470_v4, %v3469_v25 }
0x1350   :  { %7118 = vmatpush3.bf16.msra.mxu0 %v7115_v11  ;;  %v3471_v11 = vld [vmem:[#allocation2 + $0x130] sm:$0xff] }
0x1351   :  { %7120 = vmatprep.subr.bf16.mxu0 %v7119_v31  ;;  %v7163_v34 = vpack.c.bf16 %v3472_v38, %v3471_v11 }
0x1353   :  { %6110 = vmatmul.mubr.f32.vlgmr.msra.gmra.mrb[18].mxu0 %v8421_v17 }
0x1354   :  { %7122 = vmatpush3.bf16.msra.mxu0 %v7119_v31  ;;  %6144 = vmatprep.mubr.f32.mxu0 %v3425_v51  ;;  %v3473_v31 = vld [vmem:[#allocation2 + $0x140] sm:$0xff] }
0x1355   :  { %7124 = vmatprep.subr.bf16.mxu0 %v7123_v52  ;;  %v7167_v36 = vpack.c.bf16 %v3474_v40, %v3473_v31  ;;  %v3477_v51 = vld [vmem:[#allocation2 + $0x160] sm:$0xff] }
0x1356   :  { %v4597_v40 = vld [vmem:[%s8592_s2 + $0x6] sm:$0x1] }
0x1358   :  { %7126 = vmatpush3.bf16.msra.mxu0 %v7123_v52  ;;  %v3478_v52 = vld [vmem:[#allocation2 + $0x168] sm:$0xff] }
0x1359   :  { %7128 = vmatprep.subr.bf16.mxu0 %v7127_v6  ;;  %v7175_v50 = vpack.c.bf16 %v3478_v52, %v3477_v51 }
0x135c   :  { %7130 = vmatpush3.bf16.msra.mxu0 %v7127_v6  ;;  %v3480_v6 = vld [vmem:[#allocation2 + $0x178] sm:$0xff] }
0x135d   :  { %7132 = vmatprep.subr.bf16.mxu0 %v7131_v53  ;;  %v7179_v48 = vpack.c.bf16 %v3480_v6, %v3479_v49 }
0x1360   :  { %7134 = vmatpush3.bf16.msra.mxu0 %v7131_v53  ;;  %v3432_v53 = vmul.f32 %v7697_v16, %v3430_v43 }
0x1361   :  { %7136 = vmatprep.subr.bf16.mxu0 %v7135_v7 }
0x1364   :  { %7138 = vmatpush3.bf16.msra.mxu0 %v7135_v7 }
0x1365   :  { %7140 = vmatprep.subr.bf16.mxu0 %v7139_v12 }
0x1368   :  { %7142 = vmatpush3.bf16.msra.mxu0 %v7139_v12 }
0x1369   :  { %7144 = vmatprep.subr.bf16.mxu0 %v7143_v20 }
0x136c   :  { %7146 = vmatpush3.bf16.msra.mxu0 %v7143_v20 }
0x136d   :  { %7148 = vmatprep.subr.bf16.mxu0 %v7147_v23 }
0x1370   :  { %7150 = vmatpush3.bf16.msra.mxu0 %v7147_v23 }
0x1371   :  { %7152 = vmatprep.subr.bf16.mxu0 %v7151_v27 }
0x1373   :  { %6145 = vmatmul.mubr.f32.vlgmr.msra.gmra.mrb[18].mxu0 %v3423_v0 }
0x1374   :  { %7154 = vmatpush3.bf16.msra.mxu0 %v7151_v27  ;;  %6179 = vmatprep.mubr.f32.mxu0 %v3429_v30 }
0x1375   :  { %7156 = vmatprep.subr.bf16.mxu0 %v7155_v29 }
0x1378   :  { %7158 = vmatpush3.bf16.msra.mxu0 %v7155_v29 }
0x1379   :  { %7160 = vmatprep.subr.bf16.mxu0 %v7159_v28 }
0x137c   :  { %7162 = vmatpush3.bf16.msra.mxu0 %v7159_v28 }
0x137d   :  { %7164 = vmatprep.subr.bf16.mxu0 %v7163_v34 }
0x1380   :  { %7166 = vmatpush3.bf16.msra.mxu0 %v7163_v34 }
0x1381   :  { %7168 = vmatprep.subr.bf16.mxu0 %v7167_v36 }
0x1384   :  { %7170 = vmatpush3.bf16.msra.mxu0 %v7167_v36 }
0x1385   :  { %7172 = vmatprep.subr.bf16.mxu0 %v7171_v42 }
0x1388   :  { %7174 = vmatpush3.bf16.msra.mxu0 %v7171_v42 }
0x1389   :  { %7176 = vmatprep.subr.bf16.mxu0 %v7175_v50 }
0x138c   :  { %7178 = vmatpush3.bf16.msra.mxu0 %v7175_v50 }
0x138d   :  { %7180 = vmatprep.subr.bf16.mxu0 %v7179_v48 }
0x1390   :  { %7182 = vmatpush3.bf16.msra.mxu0 %v7179_v48 }
0x1393   :  { %6180 = vmatmul.mubr.f32.vlgmr.msra.gmra.mrb[18].mxu0 %v3432_v53 }
0x1466   :  { %v6181_v13 = vpop.f32.mrb[18].mxu0 }
0x1467   :  { %v3716_v14 = vmul.f32 %v6181_v13, %v6181_v13  ;;  %v3697_v7 = vpop.f32.mrb[19].mxu0 }
0x1468   :  { %v3708_v10 = vadd.f32 %v6181_v13, %v3697_v7  ;;  %v3715_v5 = vmul.f32 %v3697_v7, %v3697_v7 }
0x146a   :  { %v3709_v12 = vrot.slane %v3708_v10, 4  ;;  %v3717_v18 = vadd.f32 %v3716_v14, %v3715_v5 }
0x146c   :  { %v3710_v19 = vadd.f32 %v3709_v12, %v3708_v10  ;;  %v3718_v20 = vrot.slane %v3717_v18, 4 }
0x146e   :  { %v3711_v21 = vrot.slane %v3710_v19, 2  ;;  %v3719_v22 = vadd.f32 %v3718_v20, %v3717_v18 }
0x1470   :  { %v3712_v23 = vadd.f32 %v3711_v21, %v3710_v19  ;;  %v3720_v24 = vrot.slane %v3719_v22, 2 }
0x1472   :  { %v3713_v54 = vrot.slane %v3712_v23, 1  ;;  %v3721_v27 = vadd.f32 %v3720_v24, %v3719_v22 }
0x1474   :  { %v3722_v32 = vrot.slane %v3721_v27, 1  ;;  %v3714_v33 = vadd.f32 %v3713_v54, %v3712_v23 }
0x1476   :  { %v3723_v63 = vadd.f32 %v3722_v32, %v3721_v27 }
0x1478   :  { %v3724_v62 = vsel %vm636_vm14, %v3714_v33, %v3723_v63 }
0x1479   :  { %6215 = vmatmul.mubr.f32.vlgmr.msra.gmra.mrb[18].mxu1 %v3724_v62 }
0x147a   :  { %6218 = vmatpush3.msk.msra.mxu1 %vm749_vm15, %v7772_v56  ;;  %6219 = vmatprep.mubr.msk.f32.mxu1 %vm7600_vm13, %v7596_v8 }
0x154c   :  { %v3791_v0 = vpop.f32.mrb[18].mxu1 }
0x154d   :  { %v3795_v29 = vmul.f32 0.001953125, %v3791_v0  ;;  %v6216_v30 = vpop.f32.mrb[19].mxu1 }
0x154f   :  { %v3796_v25 = vmul.f32 %v3795_v29, %v3795_v29 }
0x1551   :  { %v3798_v4 = vrot.slane %v3796_v25, 7 }
0x1553   :  { %v3800_v28 = vsub.f32 %v3795_v29, %v3798_v4 }
0x1555   :  { %v3801_v11 = vadd.f32 1e-05, %v3800_v28 }
0x1557   :  { %7378 = vrsqrt.f32 %v3801_v11 }
0x1561   :  { %v7379_v38 = vpop.eup %7378 }
0x1562   :  { %v3812_v34 = vrot.slane %v7379_v38, %v7929_v26 }
0x1564   :  { %v3813_v31 = vcombine.high %v3812_v34, %v3812_v34 }
0x1566   :  { %v3820_v36 = vrot.slane %v3813_v31, %v7929_v26 }
0x1568   :  { %v3822_v37 = vmul.f32 %v4597_v40, %v3820_v36 }
0x156a   :  { %v3825_v42 = vmul.f32 %v3822_v37, %v3795_v29 }
0x156c   :  { %v3826_v51 = vsub.f32 %v4598_v41, %v3825_v42 }
0x156e   :  { %v3831_v52 = vrot.slane %v3826_v51, %v7940_v35 }
0x1570   :  { %v3833_v50 = vsel %vm636_vm14, %v3822_v37, %v3831_v52 }
0x1571   :  { %6220 = vmatmul.mubr.msk.f32.vlgmr.msra.gmra.mrb[20].mxu1 %vm745_vm0, %v3833_v50 }
0x1644   :  { %v3903_v49 = vpop.f32.mrb[20].mxu1 }
0x1645   :  { %v3910_v6 = vrot.slane %v3903_v49, %v7940_v35  ;;  %v6221_v48 = vpop.f32.mrb[21].mxu1  ;;  %v3916_v14 = vrot.slane %v3903_v49, %v7946_v39 }
0x1647   :  { %v3911_v43 = vmul.f32 %v3910_v6, %v3697_v7  ;;  %v3912_v53 = vmul.f32 %v6181_v13, %v3910_v6 }
0x1649   :  { %v3917_v10 = vadd.f32 %v3916_v14, %v3911_v43  ;;  %v3918_v5 = vadd.f32 %v3916_v14, %v3912_v53 }
0x164b   :  { %v8507_v12 = vmax.f32 %v3917_v10, 0.0  ;;  %v8509_v18 = vmax.f32 %v3918_v5, 0.0 }
0x164c   :  { %7593 = dma.done.wait [#allocation3 + $0x1], 6144 }
0x164d   :  { %7594 = vsyncadd [#allocation3 + $0x1], 4294961152  ;;  %6254 = vmatprep.mubr.f32.mxu1 %v8507_v12  ;;  %7303 = vmatprep.subr.bf16.mxu0 %v7598_v58  ;;  %v3951_v13 = vld [vmem:[#allocation2 + $0x200] sm:$0xff]  ;;  %v3952_v7 = vld [vmem:[#allocation2 + $0x208] sm:$0xff]  ;;  %v3923_v4 = vrot.slane %v8507_v12, 7  ;;  %v3924_v46 = vrot.slane %v8509_v18, 7 }
0x164e   :  { %7305 = vmatpush3.bf16.msk.msra.mxu0 %vm7779_vm1, %v7599_v59  ;;  %6359 = vmatprep.mubr.msk.f32.mxu0 %vm7600_vm13, %v7596_v8  ;;  %v3953_v19 = vld [vmem:[#allocation2 + $0x210] sm:$0xff]  ;;  %v7207_v20 = vpack.c.bf16 %v3952_v7, %v3951_v13  ;;  %v3954_v21 = vld [vmem:[#allocation2 + $0x218] sm:$0xff]  ;;  %v3955_v23 = vld [vmem:[#allocation2 + $0x220] sm:$0xff] }
0x164f   :  { %7306 = vmatprep.subr.bf16.mxu0 %v7598_v58  ;;  %v7211_v22 = vpack.c.bf16 %v3954_v21, %v3953_v19  ;;  %v3956_v57 = vld [vmem:[#allocation2 + $0x228] sm:$0xff]  ;;  %v3957_v24 = vld [vmem:[#allocation2 + $0x230] sm:$0xff]  ;;  %v3958_v54 = vld [vmem:[#allocation2 + $0x238] sm:$0xff]  ;;  %v3926_v38 = vsel %vm333_vm4, %v3924_v46, %v3923_v4  ;;  %v3929_v21 = vrot.slane %v8507_v12, 1 }
0x1650   :  { %7208 = vmatprep.subr.bf16.mxu1 %v7207_v20  ;;  %v7215_v60 = vpack.c.bf16 %v3956_v57, %v3955_v23  ;;  %v7219_v27 = vpack.c.bf16 %v3958_v54, %v3957_v24  ;;  %v3959_v32 = vld [vmem:[#allocation2 + $0x240] sm:$0xff]  ;;  %v3960_v61 = vld [vmem:[#allocation2 + $0x248] sm:$0xff]  ;;  %v3961_v63 = vld [vmem:[#allocation2 + $0x250] sm:$0xff] }
0x1651   :  { %7210 = vmatpush3.bf16.msra.mxu1 %v7207_v20  ;;  %v7223_v33 = vpack.c.bf16 %v3960_v61, %v3959_v32  ;;  %v3962_v62 = vld [vmem:[#allocation2 + $0x258] sm:$0xff]  ;;  %v3963_v0 = vld [vmem:[#allocation2 + $0x260] sm:$0xff]  ;;  %v3964_v29 = vld [vmem:[#allocation2 + $0x268] sm:$0xff] }
0x1652   :  { %7308 = vmatpush3.bf16.msk.msra.mxu0 %vm7824_vm2, %v7599_v59  ;;  %7212 = vmatprep.subr.bf16.mxu1 %v7211_v22  ;;  %v7227_v44 = vpack.c.bf16 %v3962_v62, %v3961_v63  ;;  %v7231_v55 = vpack.c.bf16 %v3964_v29, %v3963_v0  ;;  %v3965_v30 = vld [vmem:[#allocation2 + $0x270] sm:$0xff]  ;;  %v3966_v25 = vld [vmem:[#allocation2 + $0x278] sm:$0xff]  ;;  %v3935_v28 = vld [vmem:[#allocation2 + $0x180] sm:$0xff] }
0x1653   :  { %7309 = vmatprep.subr.bf16.mxu0 %v7598_v58  ;;  %v7235_v45 = vpack.c.bf16 %v3966_v25, %v3965_v30  ;;  %v3937_v34 = vld [vmem:[#allocation2 + $0x190] sm:$0xff]  ;;  %v3938_v47 = vld [vmem:[#allocation2 + $0x198] sm:$0xff]  ;;  %v3939_v40 = vld [vmem:[#allocation2 + $0x1a0] sm:$0xff] }
0x1654   :  { %v7243_v31 = vpack.c.bf16 %v3938_v47, %v3937_v34  ;;  %v3940_v36 = vld [vmem:[#allocation2 + $0x1a8] sm:$0xff]  ;;  %v3941_v41 = vld [vmem:[#allocation2 + $0x1b0] sm:$0xff]  ;;  %v3942_v42 = vld [vmem:[#allocation2 + $0x1b8] sm:$0xff] }
0x1655   :  { %7214 = vmatpush3.bf16.msra.mxu1 %v7211_v22  ;;  %v7247_v37 = vpack.c.bf16 %v3940_v36, %v3939_v40  ;;  %v7251_v51 = vpack.c.bf16 %v3942_v42, %v3941_v41  ;;  %v3943_v52 = vld [vmem:[#allocation2 + $0x1c0] sm:$0xff]  ;;  %v3944_v50 = vld [vmem:[#allocation2 + $0x1c8] sm:$0xff]  ;;  %v3945_v49 = vld [vmem:[#allocation2 + $0x1d0] sm:$0xff]  ;;  %v3930_v22 = vrot.slane %v8509_v18, 1 }
0x1656   :  { %7311 = vmatpush3.bf16.msk.msra.mxu0 %vm7836_vm3, %v7599_v59  ;;  %7216 = vmatprep.subr.bf16.mxu1 %v7215_v60  ;;  %v3946_v6 = vld [vmem:[#allocation2 + $0x1d8] sm:$0xff]  ;;  %v3947_v43 = vld [vmem:[#allocation2 + $0x1e0] sm:$0xff]  ;;  %v3948_v53 = vld [vmem:[#allocation2 + $0x1e8] sm:$0xff] }
0x1657   :  { %7312 = vmatprep.subr.bf16.mxu0 %v7598_v58  ;;  %v7259_v48 = vpack.c.bf16 %v3946_v6, %v3945_v49  ;;  %v7263_v14 = vpack.c.bf16 %v3948_v53, %v3947_v43  ;;  %v3949_v10 = vld [vmem:[#allocation2 + $0x1f0] sm:$0xff]  ;;  %v3950_v5 = vld [vmem:[#allocation2 + $0x1f8] sm:$0xff]  ;;  %v3967_v7 = vld [vmem:[#allocation2 + $0x280] sm:$0xff]  ;;  %v3931_v54 = vsel %vm340_vm5, %v3929_v21, %v3930_v22 }
0x1658   :  { %v7267_v13 = vpack.c.bf16 %v3950_v5, %v3949_v10  ;;  %v3968_v19 = vld [vmem:[#allocation2 + $0x288] sm:$0xff]  ;;  %v3969_v23 = vld [vmem:[#allocation2 + $0x290] sm:$0xff]  ;;  %v3970_v57 = vld [vmem:[#allocation2 + $0x298] sm:$0xff] }
0x1659   :  { %7218 = vmatpush3.bf16.msra.mxu1 %v7215_v60  ;;  %v7271_v20 = vpack.c.bf16 %v3968_v19, %v3967_v7  ;;  %v3925_v60 = vsel %vm333_vm4, %v3923_v4, %v3924_v46  ;;  %v7275_v24 = vpack.c.bf16 %v3970_v57, %v3969_v23  ;;  %v3972_v32 = vld [vmem:[#allocation2 + $0x2a8] sm:$0xff]  ;;  %v3973_v61 = vld [vmem:[#allocation2 + $0x2b0] sm:$0xff]  ;;  %v3975_v63 = vld [vmem:[#allocation2 + $0x2c0] sm:$0xff] }
0x165a   :  { %7314 = vmatpush3.bf16.msk.msra.mxu0 %vm7865_vm6, %v7599_v59  ;;  %7220 = vmatprep.subr.bf16.mxu1 %v7219_v27  ;;  %v3976_v62 = vld [vmem:[#allocation2 + $0x2c8] sm:$0xff]  ;;  %v3977_v0 = vld [vmem:[#allocation2 + $0x2d0] sm:$0xff]  ;;  %v3978_v29 = vld [vmem:[#allocation2 + $0x2d8] sm:$0xff] }
0x165b   :  { %7315 = vmatprep.subr.bf16.mxu0 %v7598_v58  ;;  %v3979_v30 = vld [vmem:[#allocation2 + $0x2e0] sm:$0xff]  ;;  %v3980_v25 = vld [vmem:[#allocation2 + $0x2e8] sm:$0xff]  ;;  %v3981_v4 = vld [vmem:[#allocation2 + $0x2f0] sm:$0xff] }
0x165c   :  { %v3982_v46 = vld [vmem:[#allocation2 + $0x2f8] sm:$0xff] }
0x165d   :  { %7222 = vmatpush3.bf16.msra.mxu1 %v7219_v27  ;;  %v3971_v27 = vld [vmem:[#allocation2 + $0x2a0] sm:$0xff] }
0x165e   :  { %7317 = vmatpush3.bf16.msk.msra.mxu0 %vm7877_vm7, %v7599_v59  ;;  %7224 = vmatprep.subr.bf16.mxu1 %v7223_v33  ;;  %v7279_v12 = vpack.c.bf16 %v3972_v32, %v3971_v27 }
0x165f   :  { %7318 = vmatprep.subr.bf16.mxu0 %v7598_v58 }
0x1661   :  { %7226 = vmatpush3.bf16.msra.mxu1 %v7223_v33 }
0x1662   :  { %7320 = vmatpush3.bf16.msk.msra.mxu0 %vm7889_vm9, %v7599_v59  ;;  %7228 = vmatprep.subr.bf16.mxu1 %v7227_v44 }
0x1663   :  { %7321 = vmatprep.subr.bf16.mxu0 %v7598_v58 }
0x1665   :  { %7230 = vmatpush3.bf16.msra.mxu1 %v7227_v44  ;;  %v7287_v44 = vpack.c.bf16 %v3976_v62, %v3975_v63 }
0x1666   :  { %7323 = vmatpush3.bf16.msk.msra.mxu0 %vm7901_vm10, %v7599_v59  ;;  %7232 = vmatprep.subr.bf16.mxu1 %v7231_v55 }
0x1667   :  { %7324 = vmatprep.subr.bf16.mxu0 %v7598_v58  ;;  %v3936_v58 = vld [vmem:[#allocation2 + $0x188] sm:$0xff] }
0x1668   :  { %v7239_v11 = vpack.c.bf16 %v3936_v58, %v3935_v28  ;;  %v7299_v28 = vpack.c.bf16 %v3982_v46, %v3981_v4  ;;  %v3932_v58 = vsel %vm340_vm5, %v3930_v22, %v3929_v21  ;;  %v4617_v22 = vld [vmem:[%s8592_s2 + $0x7] sm:$0x1] }
0x1669   :  { %7234 = vmatpush3.bf16.msra.mxu1 %v7231_v55  ;;  %v7291_v55 = vpack.c.bf16 %v3978_v29, %v3977_v0 }
0x166a   :  { %7326 = vmatpush3.bf16.msk.msra.mxu0 %vm7913_vm12, %v7599_v59  ;;  %7236 = vmatprep.subr.bf16.mxu1 %v7235_v45  ;;  %v3927_v59 = vmul.f32 %v7688_v9, %v3926_v38  ;;  %v7255_v9 = vpack.c.bf16 %v3944_v50, %v3943_v52 }
0x166b   :  { %6362 = vmatprep.subr.mxu0 %v7596_v8 }
0x166d   :  { %7238 = vmatpush3.bf16.msra.mxu1 %v7235_v45  ;;  %v7295_v45 = vpack.c.bf16 %v3980_v25, %v3979_v30 }
0x166e   :  { %7240 = vmatprep.subr.bf16.mxu1 %v7239_v11 }
0x1670   :  { %6255 = vmatmul.mubr.f32.vlgmr.msra.gmra.mrb[22].mxu1 %v8509_v18  ;;  %v3974_v18 = vld [vmem:[#allocation2 + $0x2b8] sm:$0xff] }
0x1671   :  { %7242 = vmatpush3.bf16.msra.mxu1 %v7239_v11  ;;  %6289 = vmatprep.mubr.f32.mxu1 %v3927_v59  ;;  %v7283_v33 = vpack.c.bf16 %v3974_v18, %v3973_v61  ;;  %v3934_v11 = vmul.f32 %v7697_v16, %v3932_v58 }
0x1672   :  { %7244 = vmatprep.subr.bf16.mxu1 %v7243_v31 }
0x1675   :  { %7246 = vmatpush3.bf16.msra.mxu1 %v7243_v31 }
0x1676   :  { %7248 = vmatprep.subr.bf16.mxu1 %v7247_v37 }
0x1679   :  { %7250 = vmatpush3.bf16.msra.mxu1 %v7247_v37 }
0x167a   :  { %7252 = vmatprep.subr.bf16.mxu1 %v7251_v51 }
0x167d   :  { %7254 = vmatpush3.bf16.msra.mxu1 %v7251_v51 }
0x167e   :  { %7256 = vmatprep.subr.bf16.mxu1 %v7255_v9 }
0x1681   :  { %7258 = vmatpush3.bf16.msra.mxu1 %v7255_v9 }
0x1682   :  { %7260 = vmatprep.subr.bf16.mxu1 %v7259_v48 }
0x1685   :  { %7262 = vmatpush3.bf16.msra.mxu1 %v7259_v48 }
0x1686   :  { %7264 = vmatprep.subr.bf16.mxu1 %v7263_v14 }
0x1689   :  { %7266 = vmatpush3.bf16.msra.mxu1 %v7263_v14 }
0x168a   :  { %7268 = vmatprep.subr.bf16.mxu1 %v7267_v13 }
0x168d   :  { %7270 = vmatpush3.bf16.msra.mxu1 %v7267_v13 }
0x168e   :  { %7272 = vmatprep.subr.bf16.mxu1 %v7271_v20 }
0x1690   :  { %6290 = vmatmul.mubr.f32.vlgmr.msra.gmra.mrb[22].mxu1 %v3925_v60 }
0x1691   :  { %7274 = vmatpush3.bf16.msra.mxu1 %v7271_v20  ;;  %6324 = vmatprep.mubr.f32.mxu1 %v3931_v54 }
0x1692   :  { %7276 = vmatprep.subr.bf16.mxu1 %v7275_v24 }
0x1695   :  { %7278 = vmatpush3.bf16.msra.mxu1 %v7275_v24 }
0x1696   :  { %7280 = vmatprep.subr.bf16.mxu1 %v7279_v12 }
0x1699   :  { %7282 = vmatpush3.bf16.msra.mxu1 %v7279_v12 }
0x169a   :  { %7284 = vmatprep.subr.bf16.mxu1 %v7283_v33 }
0x169d   :  { %7286 = vmatpush3.bf16.msra.mxu1 %v7283_v33 }
0x169e   :  { %7288 = vmatprep.subr.bf16.mxu1 %v7287_v44 }
0x16a1   :  { %7290 = vmatpush3.bf16.msra.mxu1 %v7287_v44 }
0x16a2   :  { %7292 = vmatprep.subr.bf16.mxu1 %v7291_v55 }
0x16a5   :  { %7294 = vmatpush3.bf16.msra.mxu1 %v7291_v55 }
0x16a6   :  { %7296 = vmatprep.subr.bf16.mxu1 %v7295_v45 }
0x16a9   :  { %7298 = vmatpush3.bf16.msra.mxu1 %v7295_v45 }
0x16aa   :  { %7300 = vmatprep.subr.bf16.mxu1 %v7299_v28 }
0x16ad   :  { %7302 = vmatpush3.bf16.msra.mxu1 %v7299_v28 }
0x16b0   :  { %6325 = vmatmul.mubr.f32.vlgmr.msra.gmra.mrb[22].mxu1 %v3934_v11 }
0x1783   :  { %v6326_v38 = vpop.f32.mrb[22].mxu1 }
0x1784   :  { %v4218_v34 = vmul.f32 %v6326_v38, %v6326_v38  ;;  %v4199_v47 = vpop.f32.mrb[23].mxu1 }
0x1785   :  { %v4210_v59 = vadd.f32 %v6326_v38, %v4199_v47  ;;  %v4217_v31 = vmul.f32 %v4199_v47, %v4199_v47 }
0x1787   :  { %v4211_v40 = vrot.slane %v4210_v59, 4  ;;  %v4219_v36 = vadd.f32 %v4218_v34, %v4217_v31 }
0x1789   :  { %v4212_v37 = vadd.f32 %v4211_v40, %v4210_v59  ;;  %v4220_v41 = vrot.slane %v4219_v36, 4 }
0x178b   :  { %v4213_v42 = vrot.slane %v4212_v37, 2  ;;  %v4221_v51 = vadd.f32 %v4220_v41, %v4219_v36 }
0x178d   :  { %v4214_v52 = vadd.f32 %v4213_v42, %v4212_v37  ;;  %v4222_v50 = vrot.slane %v4221_v51, 2 }
0x178f   :  { %v4215_v3 = vrot.slane %v4214_v52, 1  ;;  %v4223_v9 = vadd.f32 %v4222_v50, %v4221_v51 }
0x1791   :  { %v4224_v49 = vrot.slane %v4223_v9, 1  ;;  %v4216_v6 = vadd.f32 %v4215_v3, %v4214_v52 }
0x1793   :  { %v4225_v16 = vadd.f32 %v4224_v49, %v4223_v9 }
0x1795   :  { %v4226_v48 = vsel %vm636_vm14, %v4216_v6, %v4225_v16 }
0x1796   :  { %6360 = vmatmul.mubr.f32.vlgmr.msra.gmra.mrb[20].mxu0 %v4226_v48 }
0x1797   :  { %6363 = vmatpush3.msk.msra.mxu0 %vm749_vm15, %v7772_v56  ;;  %6364 = vmatprep.mubr.msk.f32.mxu0 %vm7600_vm13, %v7596_v8  ;;  %v4618_v8 = vld [vmem:[%s8593_s3 + $0x7] sm:$0x1] }
0x1869   :  { %v4293_v43 = vpop.f32.mrb[20].mxu0 }
0x186a   :  { %v4297_v53 = vmul.f32 0.001953125, %v4293_v43  ;;  %v6361_v14 = vpop.f32.mrb[21].mxu0 }
0x186c   :  { %v4298_v10 = vmul.f32 %v4297_v53, %v4297_v53 }
0x186e   :  { %v4300_v5 = vrot.slane %v4298_v10, 7 }
0x1870   :  { %v4302_v13 = vsub.f32 %v4297_v53, %v4300_v5 }
0x1872   :  { %v4303_v7 = vadd.f32 1e-05, %v4302_v13 }
0x1874   :  { %7380 = vrsqrt.f32 %v4303_v7 }
0x187e   :  { %v7381_v19 = vpop.eup %7380 }
0x187f   :  { %v4314_v20 = vrot.slane %v7381_v19, %v7929_v26 }
0x1881   :  { %v4315_v21 = vcombine.high %v4314_v20, %v4314_v20 }
0x1883   :  { %v4322_v56 = vrot.slane %v4315_v21, %v7929_v26 }
0x1885   :  { %v4324_v23 = vmul.f32 %v4617_v22, %v4322_v56 }
0x1887   :  { %v4327_v57 = vmul.f32 %v4324_v23, %v4297_v53 }
0x1889   :  { %v4328_v60 = vsub.f32 %v4618_v8, %v4327_v57 }
0x188b   :  { %v4333_v24 = vrot.slane %v4328_v60, %v7940_v35 }
0x188d   :  { %v4335_v54 = vsel %vm636_vm14, %v4324_v23, %v4333_v24 }
0x188e   :  { %6365 = vmatmul.mubr.msk.f32.vlgmr.msra.gmra.mrb[22].mxu0 %vm745_vm0, %v4335_v54 }
0x1961   :  { %v4405_v27 = vpop.f32.mrb[22].mxu0 }
0x1962   :  { %v4412_v32 = vrot.slane %v4405_v27, %v7940_v35  ;;  %v6366_v12 = vpop.f32.mrb[23].mxu0  ;;  %v4418_v26 = vrot.slane %v4405_v27, %v7946_v39 }
0x1964   :  { %v4413_v61 = vmul.f32 %v4412_v32, %v4199_v47  ;;  %v4414_v18 = vmul.f32 %v6326_v38, %v4412_v32 }
0x1966   :  { %v4419_v33 = vadd.f32 %v4418_v26, %v4413_v61  ;;  %v4420_v63 = vadd.f32 %v4418_v26, %v4414_v18 }
0x1968   :  { %v4421_v62 = vadd.f32 %v4419_v33, %v8418_v15  ;;  %v4422_v44 = vadd.f32 %v4420_v63, %v8421_v17 }
0x196a   :  { %v4423_v0 = vadd.f32 %v4421_v62, %v7630_v1  ;;  %v4424_v29 = vadd.f32 %v4422_v44, %v7635_v2 }
0x196c   :  { %4425 = vst [vmem:[%s8594_s4] sm:$0xff] %v4423_v0  ;;  %4426 = vst [vmem:[%s8594_s4 + $0x8] sm:$0xff] %v4424_v29 }
0x196d   :  { %4431 = vsyncmov [#allocation3] }
0x1970   :  { %s4432_s6 = vpop.sfrf %4431 }
0x1971   :  { %p4621_p7 = scmp.ne.s32.totalorder %s4432_s6, 0 }
0x1973   :  { %4436 = shalt.err (%p4621_p7)  }
0x1974   :  { %4438 = vsyncmov [#allocation3 + $0x1] }
0x1977   :  { %s4439_s7 = vpop.sfrf %4438 }
0x1978   :  { %p4622_p12 = scmp.ne.s32.totalorder %s4439_s7, 0 }
0x197a   :  { %4443 = shalt.err (%p4622_p12)  }

</bundles_post_ra>
